<compile_context>
chip_gen: v7x
topology: tpu7x:2x2x1
jax: 0.10.0
libtpu: 0.0.40
codegen_flags: <defaults>
</compile_context>

<pallas_src>
import jax
import jax.numpy as jnp
from jax import lax
from jax.experimental import pallas as pl
from jax.experimental.pallas import tpu as pltpu

EPS = 1e-5
LANE = 128
VMEM_LIMIT = 48 * 1024 * 1024   # safe on v5e/v6e/v7x; raise to ~112 MiB on v5e/v6e


def _round_up(x, m):
    return ((x + m - 1) // m) * m


# --------------------------- fused Pallas forward --------------------------- #

def wrn_block_forward_nhwc(x_nhwc, params, stride, mxu_dtype=jnp.bfloat16):
    """WRN block forward, NHWC in / NHWC out, one fused Pallas kernel per image."""
    x = x_nhwc.astype(jnp.float32)
    N, H, W, Cin = x.shape
    Cout = params['conv1_w'].shape[0]
    use_proj = (stride != 1) or (Cin != Cout)
    dt = mxu_dtype

    Ho = (H - 1) // stride + 1
    Wo = (W - 1) // stride + 1
    HP, WP = H + 2, W + 2              # conv1 padded grid (input resolution)
    HP2, WP2 = Ho + 2, Wo + 2          # conv2 padded grid (output resolution)
    L1, L2 = HP * WP, HP2 * WP2
    P0 = _round_up(WP + 1, 8)          # flat-buffer margins for the shifted slices
    P2 = _round_up(WP2 + 1, 8)
    Cp = _round_up(Cout, LANE)         # lane-dense padded output channels

    # fold inference BN (running stats) into per-channel scale / shift
    s1 = params['bn1_gamma'] / jnp.sqrt(params['bn1_var'] + EPS)
    t1 = params['bn1_beta'] - params['bn1_mean'] * s1
    s2 = params['bn2_gamma'] / jnp.sqrt(params['bn2_var'] + EPS)
    t2 = params['bn2_beta'] - params['bn2_mean'] * s2

    # weights: (O, I, 3, 3) -> (tap = dy*3+dx, I, O), zero-padded to Cp lanes
    w1 = jnp.transpose(params['conv1_w'], (2, 3, 1, 0)).reshape(9, Cin, Cout)
    if use_proj:
        Cin_k = Cin
    else:
        # identity residual: pad input channels to Cp so the in-kernel f32 add
        # `acc2 += x` is lane-aligned without any in-kernel concat.
        Cin_k = Cp
        w1 = jnp.pad(w1, ((0, 0), (0, Cp - Cin), (0, 0)))
        x = jnp.pad(x, ((0, 0), (0, 0), (0, 0), (0, Cp - Cin)))
    w1 = jnp.pad(w1, ((0, 0), (0, 0), (0, Cp - Cout))).astype(dt)
    w2 = jnp.transpose(params['conv2_w'], (2, 3, 1, 0)).reshape(9, Cout, Cout)
    w2 = jnp.pad(w2, ((0, 0), (0, Cp - Cout), (0, Cp - Cout))).astype(dt)

    s1v = jnp.pad(s1, (0, Cin_k - Cin)).reshape(1, Cin_k)
    t1v = jnp.pad(t1, (0, Cin_k - Cin)).reshape(1, Cin_k)
    s2v = jnp.pad(s2, (0, Cp - Cout)).reshape(1, Cp)
    t2v = jnp.pad(t2, (0, Cp - Cout)).reshape(1, Cp)

    # raw input: spatial zero-pad by 1 and flatten to (L1, Cin_k) rows (small)
    xp = jnp.pad(x, ((0, 0), (1, 1), (1, 1), (0, 0)))
    x_flat = xp.reshape(N, L1, Cin_k)

    # interior mask of the padded grid (restores the zero padding ring after BN+ReLU)
    yy = jnp.arange(HP).reshape(HP, 1)
    xx = jnp.arange(WP).reshape(1, WP)
    mask1 = (((yy >= 1) & (yy <= HP - 2) & (xx >= 1) & (xx <= WP - 2))
             .astype(jnp.float32).reshape(L1, 1))

    if use_proj:
        ws = jnp.transpose(params['sc_w'].reshape(Cout, Cin), (1, 0))
        ws = jnp.pad(ws, ((0, 0), (0, Cp - Cout))).astype(dt)
        bias = jnp.pad(params['sc_b'], (0, Cp - Cout)).reshape(1, Cp).astype(jnp.float32)
    if stride != 1:
        # stride-s decimation as a tiny selection matmul: sel[ox, 1 + s*ox] = 1
        sel = (jnp.arange(WP).reshape(1, WP)
               == (1 + stride * jnp.arange(Wo)).reshape(Wo, 1)).astype(dt)

    shifts1 = tuple((dy - 1) * WP + (dx - 1) for dy in range(3) for dx in range(3))
    shifts2 = tuple((dy - 1) * WP2 + (dx - 1) for dy in range(3) for dx in range(3))

    def kernel(*refs):
        it = iter(refs)
        x_ref = next(it); mask_ref = next(it)
        s1_ref = next(it); t1_ref = next(it); w1_ref = next(it)
        s2_ref = next(it); t2_ref = next(it); w2_ref = next(it)
        if use_proj:
            ws_ref = next(it); b_ref = next(it)
        if stride != 1:
            sel_ref = next(it)
        o_ref = next(it)
        hbuf = next(it); h2buf = next(it)
        if stride != 1:
            h2full = next(it); xsbuf = next(it)

        # ---- BN1 + ReLU prologue; mask keeps the conv zero-padding ring at 0 ----
        xv = x_ref[...]                                               # (L1, Cin_k) f32
        h = jnp.maximum(xv * s1_ref[...] + t1_ref[...], 0.0) * mask_ref[...]
        hbuf[...] = jnp.zeros_like(hbuf)
        hbuf[pl.ds(P0, L1), :] = h.astype(dt)

        # ---- conv1: 9 contiguous shifted slices -> MXU dots, f32 accumulate ----
        acc1 = jnp.dot(hbuf[pl.ds(P0 + shifts1[0], L1), :], w1_ref[0],
                       preferred_element_type=jnp.float32)
        for t in range(1, 9):
            acc1 = acc1 + jnp.dot(hbuf[pl.ds(P0 + shifts1[t], L1), :], w1_ref[t],
                                  preferred_element_type=jnp.float32)

        # ---- BN2 + ReLU epilogue of conv1 ----
        h2 = jnp.maximum(acc1 * s2_ref[...] + t2_ref[...], 0.0)

        h2buf[...] = jnp.zeros_like(h2buf)
        if stride == 1:
            h2buf[pl.ds(P2, L2), :] = (h2 * mask_ref[...]).astype(dt)
        else:
            # decimate conv1 output (and the raw input for the shortcut) to the
            # strided output grid, writing the zero-bordered conv2 input buffer.
            h2full[...] = h2.astype(dt)
            xsbuf[...] = jnp.zeros_like(xsbuf)
            sel_m = sel_ref[...]

            def dec_body(oy, carry):
                src_row = (1 + stride * oy) * WP
                dec = jnp.dot(sel_m, h2full[pl.ds(src_row, WP), :],
                              preferred_element_type=jnp.float32)
                h2buf[pl.ds(P2 + (1 + oy) * WP2 + 1, Wo), :] = dec.astype(dt)
                xdec = jnp.dot(sel_m, x_ref[pl.ds(src_row, WP), :].astype(dt),
                               preferred_element_type=jnp.float32)
                xsbuf[pl.ds((1 + oy) * WP2 + 1, Wo), :] = xdec.astype(dt)
                return carry

            lax.fori_loop(0, Ho, dec_body, 0)

        # ---- conv2: same shifted-slice accumulation ----
        acc2 = jnp.dot(h2buf[pl.ds(P2 + shifts2[0], L2), :], w2_ref[0],
                       preferred_element_type=jnp.float32)
        for t in range(1, 9):
            acc2 = acc2 + jnp.dot(h2buf[pl.ds(P2 + shifts2[t], L2), :], w2_ref[t],
                                  preferred_element_type=jnp.float32)

        # ---- shortcut / residual (fused epilogue) ----
        if use_proj:
            xs = xv.astype(dt) if stride == 1 else xsbuf[...]
            acc2 = (acc2
                    + jnp.dot(xs, ws_ref[...], preferred_element_type=jnp.float32)
                    + b_ref[...])
        else:
            acc2 = acc2 + xv            # identity residual, kept exact in f32

        o_ref[...] = acc2.astype(o_ref.dtype)

    inputs = [x_flat, mask1, s1v, t1v, w1, s2v, t2v, w2]
    in_specs = [
        pl.BlockSpec((None, L1, Cin_k), lambda i: (i, 0, 0)),
        pl.BlockSpec((L1, 1), lambda i: (0, 0)),
        pl.BlockSpec((1, Cin_k), lambda i: (0, 0)),
        pl.BlockSpec((1, Cin_k), lambda i: (0, 0)),
        pl.BlockSpec((9, Cin_k, Cp), lambda i: (0, 0, 0)),
        pl.BlockSpec((1, Cp), lambda i: (0, 0)),
        pl.BlockSpec((1, Cp), lambda i: (0, 0)),
        pl.BlockSpec((9, Cp, Cp), lambda i: (0, 0, 0)),
    ]
    if use_proj:
        inputs += [ws, bias]
        in_specs += [pl.BlockSpec((Cin, Cp), lambda i: (0, 0)),
                     pl.BlockSpec((1, Cp), lambda i: (0, 0))]
    if stride != 1:
        inputs += [sel]
        in_specs += [pl.BlockSpec((Wo, WP), lambda i: (0, 0))]

    scratch = [pltpu.VMEM((L1 + 2 * P0, Cin_k), dt),
               pltpu.VMEM((L2 + 2 * P2, Cp), dt)]
    if stride != 1:
        scratch += [pltpu.VMEM((L1, Cp), dt),
                    pltpu.VMEM((L2, Cin_k), dt)]

    out_pad = pl.pallas_call(
        kernel,
        out_shape=jax.ShapeDtypeStruct((N, L2, Cp), jnp.float32),
        grid=(N,),
        in_specs=in_specs,
        out_specs=pl.BlockSpec((None, L2, Cp), lambda i: (i, 0, 0)),
        scratch_shapes=scratch,
        compiler_params=pltpu.CompilerParams(
            dimension_semantics=("parallel",),
            vmem_limit_bytes=VMEM_LIMIT),
    )(*inputs)

    # drop the padded border / channels (output stays lane-dense inside the kernel)
    out = out_pad.reshape(N, HP2, WP2, Cp)[:, 1:1 + Ho, 1:1 + Wo, :Cout]
    return out


def wrn_block_forward(x_nchw, params, stride, mxu_dtype=jnp.bfloat16):
    # TODO(synk): these NCHW<->NHWC transposes disappear if callers use the
    # NHWC entry point above.
    x = jnp.transpose(x_nchw, (0, 2, 3, 1))
    out = wrn_block_forward_nhwc(x, params, stride, mxu_dtype)
    return jnp.transpose(out, (0, 3, 1, 2))


# ----------------------------- pure-JAX reference ---------------------------- #

def _ref_conv(x_nhwc, w_oihw, stride, pad):
    w = jnp.transpose(w_oihw, (2, 3, 1, 0))               # HWIO
    return lax.conv_general_dilated(
        x_nhwc, w, (stride, stride), [(pad, pad), (pad, pad)],
        dimension_numbers=('NHWC', 'HWIO', 'NHWC'))


def ref_forward(x_nchw, params, stride):
    x = jnp.transpose(x_nchw, (0, 2, 3, 1)).astype(jnp.float32)
    Cin = x.shape[-1]
    Cout = params['conv1_w'].shape[0]
    s1 = params['bn1_gamma'] / jnp.sqrt(params['bn1_var'] + EPS)
    h = jnp.maximum(x * s1 + (params['bn1_beta'] - params['bn1_mean'] * s1), 0.0)
    o = _ref_conv(h, params['conv1_w'], stride, 1)
    s2 = params['bn2_gamma'] / jnp.sqrt(params['bn2_var'] + EPS)
    o = jnp.maximum(o * s2 + (params['bn2_beta'] - params['bn2_mean'] * s2), 0.0)
    o = _ref_conv(o, params['conv2_w'], 1, 1)
    if stride != 1 or Cin != Cout:
        sc = _ref_conv(x, params['sc_w'], stride, 0) + params['sc_b']
    else:
        sc = x
    return jnp.transpose(o + sc, (0, 3, 1, 2))


# ---------------------------------- main ------------------------------------ #

def make_params(key, cin, cout, with_shortcut):
    ks = jax.random.split(key, 12)
    p = {
        'bn1_gamma': jax.random.uniform(ks[0], (cin,), jnp.float32, 0.5, 1.5),
        'bn1_beta':  jax.random.normal(ks[1], (cin,), jnp.float32) * 0.1,
        'bn1_mean':  jax.random.normal(ks[2], (cin,), jnp.float32) * 0.1,
        'bn1_var':   jax.random.uniform(ks[3], (cin,), jnp.float32, 0.5, 1.5),
        'conv1_w':   jax.random.normal(ks[4], (cout, cin, 3, 3), jnp.float32) * 0.1,
        'bn2_gamma': jax.random.uniform(ks[5], (cout,), jnp.float32, 0.5, 1.5),
        'bn2_beta':  jax.random.normal(ks[6], (cout,), jnp.float32) * 0.1,
        'bn2_mean':  jax.random.normal(ks[7], (cout,), jnp.float32) * 0.1,
        'bn2_var':   jax.random.uniform(ks[8], (cout,), jnp.float32, 0.5, 1.5),
        'conv2_w':   jax.random.normal(ks[9], (cout, cout, 3, 3), jnp.float32) * 0.1,
    }
    if with_shortcut:
        p['sc_w'] = jax.random.normal(ks[10], (cout, cin, 1, 1), jnp.float32) * 0.1
        p['sc_b'] = jax.random.normal(ks[11], (cout,), jnp.float32) * 0.1
    return p


def _check(name, out, ref, tol):
    err = float(jnp.max(jnp.abs(out - ref)))
    assert err < tol, f"{name}: max abs err {err}"


if __name__ == "__main__":
    key = jax.random.PRNGKey(0)

    # --- config A: projection shortcut (stride=2, Cin != Cout) ---
    N, Cin, H, W = 2, 4, 16, 16
    Cout, stride = 8, 2
    params = make_params(jax.random.fold_in(key, 0), Cin, Cout, True)
    x = jax.random.normal(jax.random.fold_in(key, 1), (N, Cin, H, W), jnp.float32)
    ref = jax.block_until_ready(ref_forward(x, params, stride))
    out = jax.block_until_ready(
        wrn_block_forward(x, params, stride, mxu_dtype=jnp.float32))
    assert out.shape == (N, Cout, H // stride, W // stride), out.shape
    _check("strided/f32", out, ref, 1e-4)
    # bf16 MXU inputs (default, recommended on v6e/v7x), f32 accumulation.
    out_bf = jax.block_until_ready(wrn_block_forward(x, params, stride))
    _check("strided/bf16", out_bf, ref, 1e-1)

    # --- config B: identity shortcut (stride=1, Cin == Cout) ---
    N2, C2, H2, W2 = 2, 8, 16, 16
    params2 = make_params(jax.random.fold_in(key, 2), C2, C2, False)
    x2 = jax.random.normal(jax.random.fold_in(key, 3), (N2, C2, H2, W2), jnp.float32)
    ref2 = jax.block_until_ready(ref_forward(x2, params2, 1))
    out2 = jax.block_until_ready(
        wrn_block_forward(x2, params2, 1, mxu_dtype=jnp.float32))
    assert out2.shape == (N2, C2, H2, W2), out2.shape
    _check("identity/f32", out2, ref2, 1e-4)

    # --- config C: projection shortcut with stride 1 (Cin != Cout) ---
    params3 = make_params(jax.random.fold_in(key, 4), 4, 8, True)
    x3 = jax.random.normal(jax.random.fold_in(key, 5), (2, 4, 16, 16), jnp.float32)
    ref3 = jax.block_until_ready(ref_forward(x3, params3, 1))
    out3 = jax.block_until_ready(
        wrn_block_forward(x3, params3, 1, mxu_dtype=jnp.float32))
    assert out3.shape == (2, 8, 16, 16), out3.shape
    _check("proj-s1/f32", out3, ref3, 1e-4)

    print("KERNEL_OK")
</pallas_src>

<mosaic_0001>
module attributes {stable_mosaic.version = 11 : i64} {
  func.func @kernel(%arg0: i32, %arg1: memref<1x324x4xf32, #tpu.memory_space<vmem>>, %arg2: memref<324x1xf32, #tpu.memory_space<vmem>>, %arg3: memref<1x4xf32, #tpu.memory_space<vmem>>, %arg4: memref<1x4xf32, #tpu.memory_space<vmem>>, %arg5: memref<9x4x128xf32, #tpu.memory_space<vmem>>, %arg6: memref<1x128xf32, #tpu.memory_space<vmem>>, %arg7: memref<1x128xf32, #tpu.memory_space<vmem>>, %arg8: memref<9x128x128xf32, #tpu.memory_space<vmem>>, %arg9: memref<4x128xf32, #tpu.memory_space<vmem>>, %arg10: memref<1x128xf32, #tpu.memory_space<vmem>>, %arg11: memref<8x18xf32, #tpu.memory_space<vmem>>, %arg12: memref<1x100x128xf32, #tpu.memory_space<vmem>>, %arg13: memref<372x4xf32, #tpu.memory_space<vmem>>, %arg14: memref<132x128xf32, #tpu.memory_space<vmem>>, %arg15: memref<324x128xf32, #tpu.memory_space<vmem>>, %arg16: memref<100x4xf32, #tpu.memory_space<vmem>>) attributes {dimension_semantics = [#tpu.dimension_semantics<parallel>], iteration_bounds = array<i64: 2>, scalar_prefetch = 0 : i64, scratch_operands = 4 : i64, tpu.core_type = #tpu.core_type<tc>, window_params = [{transform_indices = @transform_0, window_bounds = array<i64: 1, 324, 4>}, {pipeline_mode = #tpu.pipeline_mode<synchronous>, transform_indices = @transform_1, window_bounds = array<i64: 324, 1>}, {pipeline_mode = #tpu.pipeline_mode<synchronous>, transform_indices = @transform_2, window_bounds = array<i64: 1, 4>}, {pipeline_mode = #tpu.pipeline_mode<synchronous>, transform_indices = @transform_3, window_bounds = array<i64: 1, 4>}, {pipeline_mode = #tpu.pipeline_mode<synchronous>, transform_indices = @transform_4, window_bounds = array<i64: 9, 4, 128>}, {pipeline_mode = #tpu.pipeline_mode<synchronous>, transform_indices = @transform_5, window_bounds = array<i64: 1, 128>}, {pipeline_mode = #tpu.pipeline_mode<synchronous>, transform_indices = @transform_6, window_bounds = array<i64: 1, 128>}, {pipeline_mode = #tpu.pipeline_mode<synchronous>, transform_indices = @transform_7, window_bounds = array<i64: 9, 128, 128>}, {pipeline_mode = #tpu.pipeline_mode<synchronous>, transform_indices = @transform_8, window_bounds = array<i64: 4, 128>}, {pipeline_mode = #tpu.pipeline_mode<synchronous>, transform_indices = @transform_9, window_bounds = array<i64: 1, 128>}, {pipeline_mode = #tpu.pipeline_mode<synchronous>, transform_indices = @transform_10, window_bounds = array<i64: 8, 18>}, {transform_indices = @transform_11, window_bounds = array<i64: 1, 100, 128>}]} {
    %c0 = arith.constant 0 : index
    %c0_0 = arith.constant 0 : index
    %c0_1 = arith.constant 0 : index
    %0 = vector.load %arg1[%c0, %c0_0, %c0_1] : memref<1x324x4xf32, #tpu.memory_space<vmem>>, vector<1x324x4xf32>
    %1 = vector.shape_cast %0 : vector<1x324x4xf32> to vector<324x4xf32>
    %c0_2 = arith.constant 0 : index
    %c0_3 = arith.constant 0 : index
    %2 = vector.load %arg3[%c0_2, %c0_3] : memref<1x4xf32, #tpu.memory_space<vmem>>, vector<1x4xf32>
    %3 = vector.broadcast %2 : vector<1x4xf32> to vector<324x4xf32>
    %4 = arith.mulf %1, %3 : vector<324x4xf32>
    %c0_4 = arith.constant 0 : index
    %c0_5 = arith.constant 0 : index
    %5 = vector.load %arg4[%c0_4, %c0_5] : memref<1x4xf32, #tpu.memory_space<vmem>>, vector<1x4xf32>
    %6 = vector.broadcast %5 : vector<1x4xf32> to vector<324x4xf32>
    %7 = arith.addf %4, %6 : vector<324x4xf32>
    %cst = arith.constant 0.000000e+00 : f32
    %8 = vector.broadcast %cst : f32 to vector<324x4xf32>
    %9 = arith.maximumf %7, %8 : vector<324x4xf32>
    %c0_6 = arith.constant 0 : index
    %c0_7 = arith.constant 0 : index
    %10 = vector.load %arg2[%c0_6, %c0_7] : memref<324x1xf32, #tpu.memory_space<vmem>>, vector<324x1xf32>
    %11 = vector.broadcast %10 : vector<324x1xf32> to vector<324x4xf32>
    %12 = arith.mulf %9, %11 : vector<324x4xf32>
    %cst_8 = arith.constant 0.000000e+00 : f32
    %13 = vector.broadcast %cst_8 : f32 to vector<372x4xf32>
    %c0_9 = arith.constant 0 : index
    %c0_10 = arith.constant 0 : index
    %14 = vector.load %arg13[%c0_9, %c0_10] : memref<372x4xf32, #tpu.memory_space<vmem>>, vector<372x4xf32>
    tpu.vector_store %arg13[%c0_9, %c0_10], %13 {strides = array<i32>} : memref<372x4xf32, #tpu.memory_space<vmem>>, vector<372x4xf32>,
    %c24 = arith.constant 24 : index
    %c0_11 = arith.constant 0 : index
    %15 = vector.load %arg13[%c24, %c0_11] : memref<372x4xf32, #tpu.memory_space<vmem>>, vector<324x4xf32>
    tpu.vector_store %arg13[%c24, %c0_11], %12 {strides = array<i32>} : memref<372x4xf32, #tpu.memory_space<vmem>>, vector<324x4xf32>,
    %c5 = arith.constant 5 : index
    %c0_12 = arith.constant 0 : index
    %16 = vector.load %arg13[%c5, %c0_12] : memref<372x4xf32, #tpu.memory_space<vmem>>, vector<324x4xf32>
    %c0_13 = arith.constant 0 : index
    %c0_14 = arith.constant 0 : index
    %c0_15 = arith.constant 0 : index
    %17 = vector.load %arg5[%c0_13, %c0_14, %c0_15] : memref<9x4x128xf32, #tpu.memory_space<vmem>>, vector<1x4x128xf32>
    %18 = vector.shape_cast %17 : vector<1x4x128xf32> to vector<4x128xf32>
    %cst_16 = arith.constant dense<0.000000e+00> : vector<324x128xf32>
    %19 = tpu.matmul %16, %18, %cst_16 {dimension_numbers = #tpu.dot_dimension_numbers<[1], [0], [0], [1], [0, 0, 1, 1], [], []>} : vector<324x4xf32>, vector<4x128xf32>, vector<324x128xf32> -> vector<324x128xf32>
    %c6 = arith.constant 6 : index
    %c0_17 = arith.constant 0 : index
    %20 = vector.load %arg13[%c6, %c0_17] : memref<372x4xf32, #tpu.memory_space<vmem>>, vector<324x4xf32>
    %c1 = arith.constant 1 : index
    %c0_18 = arith.constant 0 : index
    %c0_19 = arith.constant 0 : index
    %21 = vector.load %arg5[%c1, %c0_18, %c0_19] : memref<9x4x128xf32, #tpu.memory_space<vmem>>, vector<1x4x128xf32>
    %22 = vector.shape_cast %21 : vector<1x4x128xf32> to vector<4x128xf32>
    %cst_20 = arith.constant dense<0.000000e+00> : vector<324x128xf32>
    %23 = tpu.matmul %20, %22, %cst_20 {dimension_numbers = #tpu.dot_dimension_numbers<[1], [0], [0], [1], [0, 0, 1, 1], [], []>} : vector<324x4xf32>, vector<4x128xf32>, vector<324x128xf32> -> vector<324x128xf32>
    %24 = arith.addf %19, %23 : vector<324x128xf32>
    %c7 = arith.constant 7 : index
    %c0_21 = arith.constant 0 : index
    %25 = vector.load %arg13[%c7, %c0_21] : memref<372x4xf32, #tpu.memory_space<vmem>>, vector<324x4xf32>
    %c2 = arith.constant 2 : index
    %c0_22 = arith.constant 0 : index
    %c0_23 = arith.constant 0 : index
    %26 = vector.load %arg5[%c2, %c0_22, %c0_23] : memref<9x4x128xf32, #tpu.memory_space<vmem>>, vector<1x4x128xf32>
    %27 = vector.shape_cast %26 : vector<1x4x128xf32> to vector<4x128xf32>
    %cst_24 = arith.constant dense<0.000000e+00> : vector<324x128xf32>
    %28 = tpu.matmul %25, %27, %cst_24 {dimension_numbers = #tpu.dot_dimension_numbers<[1], [0], [0], [1], [0, 0, 1, 1], [], []>} : vector<324x4xf32>, vector<4x128xf32>, vector<324x128xf32> -> vector<324x128xf32>
    %29 = arith.addf %24, %28 : vector<324x128xf32>
    %c23 = arith.constant 23 : index
    %c0_25 = arith.constant 0 : index
    %30 = vector.load %arg13[%c23, %c0_25] : memref<372x4xf32, #tpu.memory_space<vmem>>, vector<324x4xf32>
    %c3 = arith.constant 3 : index
    %c0_26 = arith.constant 0 : index
    %c0_27 = arith.constant 0 : index
    %31 = vector.load %arg5[%c3, %c0_26, %c0_27] : memref<9x4x128xf32, #tpu.memory_space<vmem>>, vector<1x4x128xf32>
    %32 = vector.shape_cast %31 : vector<1x4x128xf32> to vector<4x128xf32>
    %cst_28 = arith.constant dense<0.000000e+00> : vector<324x128xf32>
    %33 = tpu.matmul %30, %32, %cst_28 {dimension_numbers = #tpu.dot_dimension_numbers<[1], [0], [0], [1], [0, 0, 1, 1], [], []>} : vector<324x4xf32>, vector<4x128xf32>, vector<324x128xf32> -> vector<324x128xf32>
    %34 = arith.addf %29, %33 : vector<324x128xf32>
    %c24_29 = arith.constant 24 : index
    %c0_30 = arith.constant 0 : index
    %35 = vector.load %arg13[%c24_29, %c0_30] : memref<372x4xf32, #tpu.memory_space<vmem>>, vector<324x4xf32>
    %c4 = arith.constant 4 : index
    %c0_31 = arith.constant 0 : index
    %c0_32 = arith.constant 0 : index
    %36 = vector.load %arg5[%c4, %c0_31, %c0_32] : memref<9x4x128xf32, #tpu.memory_space<vmem>>, vector<1x4x128xf32>
    %37 = vector.shape_cast %36 : vector<1x4x128xf32> to vector<4x128xf32>
    %cst_33 = arith.constant dense<0.000000e+00> : vector<324x128xf32>
    %38 = tpu.matmul %35, %37, %cst_33 {dimension_numbers = #tpu.dot_dimension_numbers<[1], [0], [0], [1], [0, 0, 1, 1], [], []>} : vector<324x4xf32>, vector<4x128xf32>, vector<324x128xf32> -> vector<324x128xf32>
    %39 = arith.addf %34, %38 : vector<324x128xf32>
    %c25 = arith.constant 25 : index
    %c0_34 = arith.constant 0 : index
    %40 = vector.load %arg13[%c25, %c0_34] : memref<372x4xf32, #tpu.memory_space<vmem>>, vector<324x4xf32>
    %c5_35 = arith.constant 5 : index
    %c0_36 = arith.constant 0 : index
    %c0_37 = arith.constant 0 : index
    %41 = vector.load %arg5[%c5_35, %c0_36, %c0_37] : memref<9x4x128xf32, #tpu.memory_space<vmem>>, vector<1x4x128xf32>
    %42 = vector.shape_cast %41 : vector<1x4x128xf32> to vector<4x128xf32>
    %cst_38 = arith.constant dense<0.000000e+00> : vector<324x128xf32>
    %43 = tpu.matmul %40, %42, %cst_38 {dimension_numbers = #tpu.dot_dimension_numbers<[1], [0], [0], [1], [0, 0, 1, 1], [], []>} : vector<324x4xf32>, vector<4x128xf32>, vector<324x128xf32> -> vector<324x128xf32>
    %44 = arith.addf %39, %43 : vector<324x128xf32>
    %c41 = arith.constant 41 : index
    %c0_39 = arith.constant 0 : index
    %45 = vector.load %arg13[%c41, %c0_39] : memref<372x4xf32, #tpu.memory_space<vmem>>, vector<324x4xf32>
    %c6_40 = arith.constant 6 : index
    %c0_41 = arith.constant 0 : index
    %c0_42 = arith.constant 0 : index
    %46 = vector.load %arg5[%c6_40, %c0_41, %c0_42] : memref<9x4x128xf32, #tpu.memory_space<vmem>>, vector<1x4x128xf32>
    %47 = vector.shape_cast %46 : vector<1x4x128xf32> to vector<4x128xf32>
    %cst_43 = arith.constant dense<0.000000e+00> : vector<324x128xf32>
    %48 = tpu.matmul %45, %47, %cst_43 {dimension_numbers = #tpu.dot_dimension_numbers<[1], [0], [0], [1], [0, 0, 1, 1], [], []>} : vector<324x4xf32>, vector<4x128xf32>, vector<324x128xf32> -> vector<324x128xf32>
    %49 = arith.addf %44, %48 : vector<324x128xf32>
    %c42 = arith.constant 42 : index
    %c0_44 = arith.constant 0 : index
    %50 = vector.load %arg13[%c42, %c0_44] : memref<372x4xf32, #tpu.memory_space<vmem>>, vector<324x4xf32>
    %c7_45 = arith.constant 7 : index
    %c0_46 = arith.constant 0 : index
    %c0_47 = arith.constant 0 : index
    %51 = vector.load %arg5[%c7_45, %c0_46, %c0_47] : memref<9x4x128xf32, #tpu.memory_space<vmem>>, vector<1x4x128xf32>
    %52 = vector.shape_cast %51 : vector<1x4x128xf32> to vector<4x128xf32>
    %cst_48 = arith.constant dense<0.000000e+00> : vector<324x128xf32>
    %53 = tpu.matmul %50, %52, %cst_48 {dimension_numbers = #tpu.dot_dimension_numbers<[1], [0], [0], [1], [0, 0, 1, 1], [], []>} : vector<324x4xf32>, vector<4x128xf32>, vector<324x128xf32> -> vector<324x128xf32>
    %54 = arith.addf %49, %53 : vector<324x128xf32>
    %c43 = arith.constant 43 : index
    %c0_49 = arith.constant 0 : index
    %55 = vector.load %arg13[%c43, %c0_49] : memref<372x4xf32, #tpu.memory_space<vmem>>, vector<324x4xf32>
    %c8 = arith.constant 8 : index
    %c0_50 = arith.constant 0 : index
    %c0_51 = arith.constant 0 : index
    %56 = vector.load %arg5[%c8, %c0_50, %c0_51] : memref<9x4x128xf32, #tpu.memory_space<vmem>>, vector<1x4x128xf32>
    %57 = vector.shape_cast %56 : vector<1x4x128xf32> to vector<4x128xf32>
    %cst_52 = arith.constant dense<0.000000e+00> : vector<324x128xf32>
    %58 = tpu.matmul %55, %57, %cst_52 {dimension_numbers = #tpu.dot_dimension_numbers<[1], [0], [0], [1], [0, 0, 1, 1], [], []>} : vector<324x4xf32>, vector<4x128xf32>, vector<324x128xf32> -> vector<324x128xf32>
    %59 = arith.addf %54, %58 : vector<324x128xf32>
    %c0_53 = arith.constant 0 : index
    %c0_54 = arith.constant 0 : index
    %60 = vector.load %arg6[%c0_53, %c0_54] : memref<1x128xf32, #tpu.memory_space<vmem>>, vector<1x128xf32>
    %61 = vector.broadcast %60 : vector<1x128xf32> to vector<324x128xf32>
    %62 = arith.mulf %59, %61 : vector<324x128xf32>
    %c0_55 = arith.constant 0 : index
    %c0_56 = arith.constant 0 : index
    %63 = vector.load %arg7[%c0_55, %c0_56] : memref<1x128xf32, #tpu.memory_space<vmem>>, vector<1x128xf32>
    %64 = vector.broadcast %63 : vector<1x128xf32> to vector<324x128xf32>
    %65 = arith.addf %62, %64 : vector<324x128xf32>
    %cst_57 = arith.constant 0.000000e+00 : f32
    %66 = vector.broadcast %cst_57 : f32 to vector<324x128xf32>
    %67 = arith.maximumf %65, %66 : vector<324x128xf32>
    %cst_58 = arith.constant 0.000000e+00 : f32
    %68 = vector.broadcast %cst_58 : f32 to vector<132x128xf32>
    %c0_59 = arith.constant 0 : index
    %c0_60 = arith.constant 0 : index
    %69 = vector.load %arg14[%c0_59, %c0_60] : memref<132x128xf32, #tpu.memory_space<vmem>>, vector<132x128xf32>
    tpu.vector_store %arg14[%c0_59, %c0_60], %68 {strides = array<i32>} : memref<132x128xf32, #tpu.memory_space<vmem>>, vector<132x128xf32>,
    %c0_61 = arith.constant 0 : index
    %c0_62 = arith.constant 0 : index
    %70 = vector.load %arg15[%c0_61, %c0_62] : memref<324x128xf32, #tpu.memory_space<vmem>>, vector<324x128xf32>
    tpu.vector_store %arg15[%c0_61, %c0_62], %67 {strides = array<i32>} : memref<324x128xf32, #tpu.memory_space<vmem>>, vector<324x128xf32>,
    %cst_63 = arith.constant 0.000000e+00 : f32
    %71 = vector.broadcast %cst_63 : f32 to vector<100x4xf32>
    %c0_64 = arith.constant 0 : index
    %c0_65 = arith.constant 0 : index
    %72 = vector.load %arg16[%c0_64, %c0_65] : memref<100x4xf32, #tpu.memory_space<vmem>>, vector<100x4xf32>
    tpu.vector_store %arg16[%c0_64, %c0_65], %71 {strides = array<i32>} : memref<100x4xf32, #tpu.memory_space<vmem>>, vector<100x4xf32>,
    %c0_66 = arith.constant 0 : index
    %c0_67 = arith.constant 0 : index
    %73 = vector.load %arg11[%c0_66, %c0_67] : memref<8x18xf32, #tpu.memory_space<vmem>>, vector<8x18xf32>
    %c0_i32 = arith.constant 0 : i32
    %c8_i32 = arith.constant 8 : i32
    %74 = arith.addi %c0_i32, %c8_i32 : i32
    %c1_i32 = arith.constant 1 : i32
    scf.for %arg17 = %c0_i32 to %74 step %c1_i32  : i32 {
      %c2_i32 = arith.constant 2 : i32
      %129 = arith.muli %c2_i32, %arg17 : i32
      %c1_i32_128 = arith.constant 1 : i32
      %130 = arith.addi %c1_i32_128, %129 : i32
      %c18_i32 = arith.constant 18 : i32
      %131 = arith.muli %130, %c18_i32 : i32
      %132 = arith.index_cast %131 : i32 to index
      %c0_129 = arith.constant 0 : index
      %133 = vector.load %arg15[%132, %c0_129] : memref<324x128xf32, #tpu.memory_space<vmem>>, vector<18x128xf32>
      %cst_130 = arith.constant dense<0.000000e+00> : vector<8x128xf32>
      %134 = tpu.matmul %73, %133, %cst_130 {dimension_numbers = #tpu.dot_dimension_numbers<[1], [0], [0], [1], [0, 0, 1, 1], [], []>} : vector<8x18xf32>, vector<18x128xf32>, vector<8x128xf32> -> vector<8x128xf32>
      %c1_i32_131 = arith.constant 1 : i32
      %135 = arith.addi %c1_i32_131, %arg17 : i32
      %c10_i32 = arith.constant 10 : i32
      %136 = arith.muli %135, %c10_i32 : i32
      %c16_i32 = arith.constant 16 : i32
      %137 = arith.addi %c16_i32, %136 : i32
      %c1_i32_132 = arith.constant 1 : i32
      %138 = arith.addi %137, %c1_i32_132 : i32
      %139 = arith.index_cast %138 : i32 to index
      %c0_133 = arith.constant 0 : index
      %140 = vector.load %arg14[%139, %c0_133] : memref<132x128xf32, #tpu.memory_space<vmem>>, vector<8x128xf32>
      tpu.vector_store %arg14[%139, %c0_133], %134 {strides = array<i32>} : memref<132x128xf32, #tpu.memory_space<vmem>>, vector<8x128xf32>,
      %c0_134 = arith.constant 0 : index
      %141 = arith.index_cast %131 : i32 to index
      %c0_135 = arith.constant 0 : index
      %142 = vector.load %arg1[%c0_134, %141, %c0_135] : memref<1x324x4xf32, #tpu.memory_space<vmem>>, vector<1x18x4xf32>
      %143 = vector.shape_cast %142 : vector<1x18x4xf32> to vector<18x4xf32>
      %cst_136 = arith.constant dense<0.000000e+00> : vector<8x4xf32>
      %144 = tpu.matmul %73, %143, %cst_136 {dimension_numbers = #tpu.dot_dimension_numbers<[1], [0], [0], [1], [0, 0, 1, 1], [], []>} : vector<8x18xf32>, vector<18x4xf32>, vector<8x4xf32> -> vector<8x4xf32>
      %c1_i32_137 = arith.constant 1 : i32
      %145 = arith.addi %c1_i32_137, %arg17 : i32
      %c10_i32_138 = arith.constant 10 : i32
      %146 = arith.muli %145, %c10_i32_138 : i32
      %c1_i32_139 = arith.constant 1 : i32
      %147 = arith.addi %146, %c1_i32_139 : i32
      %148 = arith.index_cast %147 : i32 to index
      %c0_140 = arith.constant 0 : index
      %149 = vector.load %arg16[%148, %c0_140] : memref<100x4xf32, #tpu.memory_space<vmem>>, vector<8x4xf32>
      tpu.vector_store %arg16[%148, %c0_140], %144 {strides = array<i32>} : memref<100x4xf32, #tpu.memory_space<vmem>>, vector<8x4xf32>,
    }
    %c8_i32_68 = arith.constant 8 : i32
    %c5_69 = arith.constant 5 : index
    %c0_70 = arith.constant 0 : index
    %75 = vector.load %arg14[%c5_69, %c0_70] : memref<132x128xf32, #tpu.memory_space<vmem>>, vector<100x128xf32>
    %c0_71 = arith.constant 0 : index
    %c0_72 = arith.constant 0 : index
    %c0_73 = arith.constant 0 : index
    %76 = vector.load %arg8[%c0_71, %c0_72, %c0_73] : memref<9x128x128xf32, #tpu.memory_space<vmem>>, vector<1x128x128xf32>
    %77 = vector.shape_cast %76 : vector<1x128x128xf32> to vector<128x128xf32>
    %cst_74 = arith.constant dense<0.000000e+00> : vector<100x128xf32>
    %78 = tpu.matmul %75, %77, %cst_74 {dimension_numbers = #tpu.dot_dimension_numbers<[1], [0], [0], [1], [0, 0, 1, 1], [], []>} : vector<100x128xf32>, vector<128x128xf32>, vector<100x128xf32> -> vector<100x128xf32>
    %c6_75 = arith.constant 6 : index
    %c0_76 = arith.constant 0 : index
    %79 = vector.load %arg14[%c6_75, %c0_76] : memref<132x128xf32, #tpu.memory_space<vmem>>, vector<100x128xf32>
    %c1_77 = arith.constant 1 : index
    %c0_78 = arith.constant 0 : index
    %c0_79 = arith.constant 0 : index
    %80 = vector.load %arg8[%c1_77, %c0_78, %c0_79] : memref<9x128x128xf32, #tpu.memory_space<vmem>>, vector<1x128x128xf32>
    %81 = vector.shape_cast %80 : vector<1x128x128xf32> to vector<128x128xf32>
    %cst_80 = arith.constant dense<0.000000e+00> : vector<100x128xf32>
    %82 = tpu.matmul %79, %81, %cst_80 {dimension_numbers = #tpu.dot_dimension_numbers<[1], [0], [0], [1], [0, 0, 1, 1], [], []>} : vector<100x128xf32>, vector<128x128xf32>, vector<100x128xf32> -> vector<100x128xf32>
    %83 = arith.addf %78, %82 : vector<100x128xf32>
    %c7_81 = arith.constant 7 : index
    %c0_82 = arith.constant 0 : index
    %84 = vector.load %arg14[%c7_81, %c0_82] : memref<132x128xf32, #tpu.memory_space<vmem>>, vector<100x128xf32>
    %c2_83 = arith.constant 2 : index
    %c0_84 = arith.constant 0 : index
    %c0_85 = arith.constant 0 : index
    %85 = vector.load %arg8[%c2_83, %c0_84, %c0_85] : memref<9x128x128xf32, #tpu.memory_space<vmem>>, vector<1x128x128xf32>
    %86 = vector.shape_cast %85 : vector<1x128x128xf32> to vector<128x128xf32>
    %cst_86 = arith.constant dense<0.000000e+00> : vector<100x128xf32>
    %87 = tpu.matmul %84, %86, %cst_86 {dimension_numbers = #tpu.dot_dimension_numbers<[1], [0], [0], [1], [0, 0, 1, 1], [], []>} : vector<100x128xf32>, vector<128x128xf32>, vector<100x128xf32> -> vector<100x128xf32>
    %88 = arith.addf %83, %87 : vector<100x128xf32>
    %c15 = arith.constant 15 : index
    %c0_87 = arith.constant 0 : index
    %89 = vector.load %arg14[%c15, %c0_87] : memref<132x128xf32, #tpu.memory_space<vmem>>, vector<100x128xf32>
    %c3_88 = arith.constant 3 : index
    %c0_89 = arith.constant 0 : index
    %c0_90 = arith.constant 0 : index
    %90 = vector.load %arg8[%c3_88, %c0_89, %c0_90] : memref<9x128x128xf32, #tpu.memory_space<vmem>>, vector<1x128x128xf32>
    %91 = vector.shape_cast %90 : vector<1x128x128xf32> to vector<128x128xf32>
    %cst_91 = arith.constant dense<0.000000e+00> : vector<100x128xf32>
    %92 = tpu.matmul %89, %91, %cst_91 {dimension_numbers = #tpu.dot_dimension_numbers<[1], [0], [0], [1], [0, 0, 1, 1], [], []>} : vector<100x128xf32>, vector<128x128xf32>, vector<100x128xf32> -> vector<100x128xf32>
    %93 = arith.addf %88, %92 : vector<100x128xf32>
    %c16 = arith.constant 16 : index
    %c0_92 = arith.constant 0 : index
    %94 = vector.load %arg14[%c16, %c0_92] : memref<132x128xf32, #tpu.memory_space<vmem>>, vector<100x128xf32>
    %c4_93 = arith.constant 4 : index
    %c0_94 = arith.constant 0 : index
    %c0_95 = arith.constant 0 : index
    %95 = vector.load %arg8[%c4_93, %c0_94, %c0_95] : memref<9x128x128xf32, #tpu.memory_space<vmem>>, vector<1x128x128xf32>
    %96 = vector.shape_cast %95 : vector<1x128x128xf32> to vector<128x128xf32>
    %cst_96 = arith.constant dense<0.000000e+00> : vector<100x128xf32>
    %97 = tpu.matmul %94, %96, %cst_96 {dimension_numbers = #tpu.dot_dimension_numbers<[1], [0], [0], [1], [0, 0, 1, 1], [], []>} : vector<100x128xf32>, vector<128x128xf32>, vector<100x128xf32> -> vector<100x128xf32>
    %98 = arith.addf %93, %97 : vector<100x128xf32>
    %c17 = arith.constant 17 : index
    %c0_97 = arith.constant 0 : index
    %99 = vector.load %arg14[%c17, %c0_97] : memref<132x128xf32, #tpu.memory_space<vmem>>, vector<100x128xf32>
    %c5_98 = arith.constant 5 : index
    %c0_99 = arith.constant 0 : index
    %c0_100 = arith.constant 0 : index
    %100 = vector.load %arg8[%c5_98, %c0_99, %c0_100] : memref<9x128x128xf32, #tpu.memory_space<vmem>>, vector<1x128x128xf32>
    %101 = vector.shape_cast %100 : vector<1x128x128xf32> to vector<128x128xf32>
    %cst_101 = arith.constant dense<0.000000e+00> : vector<100x128xf32>
    %102 = tpu.matmul %99, %101, %cst_101 {dimension_numbers = #tpu.dot_dimension_numbers<[1], [0], [0], [1], [0, 0, 1, 1], [], []>} : vector<100x128xf32>, vector<128x128xf32>, vector<100x128xf32> -> vector<100x128xf32>
    %103 = arith.addf %98, %102 : vector<100x128xf32>
    %c25_102 = arith.constant 25 : index
    %c0_103 = arith.constant 0 : index
    %104 = vector.load %arg14[%c25_102, %c0_103] : memref<132x128xf32, #tpu.memory_space<vmem>>, vector<100x128xf32>
    %c6_104 = arith.constant 6 : index
    %c0_105 = arith.constant 0 : index
    %c0_106 = arith.constant 0 : index
    %105 = vector.load %arg8[%c6_104, %c0_105, %c0_106] : memref<9x128x128xf32, #tpu.memory_space<vmem>>, vector<1x128x128xf32>
    %106 = vector.shape_cast %105 : vector<1x128x128xf32> to vector<128x128xf32>
    %cst_107 = arith.constant dense<0.000000e+00> : vector<100x128xf32>
    %107 = tpu.matmul %104, %106, %cst_107 {dimension_numbers = #tpu.dot_dimension_numbers<[1], [0], [0], [1], [0, 0, 1, 1], [], []>} : vector<100x128xf32>, vector<128x128xf32>, vector<100x128xf32> -> vector<100x128xf32>
    %108 = arith.addf %103, %107 : vector<100x128xf32>
    %c26 = arith.constant 26 : index
    %c0_108 = arith.constant 0 : index
    %109 = vector.load %arg14[%c26, %c0_108] : memref<132x128xf32, #tpu.memory_space<vmem>>, vector<100x128xf32>
    %c7_109 = arith.constant 7 : index
    %c0_110 = arith.constant 0 : index
    %c0_111 = arith.constant 0 : index
    %110 = vector.load %arg8[%c7_109, %c0_110, %c0_111] : memref<9x128x128xf32, #tpu.memory_space<vmem>>, vector<1x128x128xf32>
    %111 = vector.shape_cast %110 : vector<1x128x128xf32> to vector<128x128xf32>
    %cst_112 = arith.constant dense<0.000000e+00> : vector<100x128xf32>
    %112 = tpu.matmul %109, %111, %cst_112 {dimension_numbers = #tpu.dot_dimension_numbers<[1], [0], [0], [1], [0, 0, 1, 1], [], []>} : vector<100x128xf32>, vector<128x128xf32>, vector<100x128xf32> -> vector<100x128xf32>
    %113 = arith.addf %108, %112 : vector<100x128xf32>
    %c27 = arith.constant 27 : index
    %c0_113 = arith.constant 0 : index
    %114 = vector.load %arg14[%c27, %c0_113] : memref<132x128xf32, #tpu.memory_space<vmem>>, vector<100x128xf32>
    %c8_114 = arith.constant 8 : index
    %c0_115 = arith.constant 0 : index
    %c0_116 = arith.constant 0 : index
    %115 = vector.load %arg8[%c8_114, %c0_115, %c0_116] : memref<9x128x128xf32, #tpu.memory_space<vmem>>, vector<1x128x128xf32>
    %116 = vector.shape_cast %115 : vector<1x128x128xf32> to vector<128x128xf32>
    %cst_117 = arith.constant dense<0.000000e+00> : vector<100x128xf32>
    %117 = tpu.matmul %114, %116, %cst_117 {dimension_numbers = #tpu.dot_dimension_numbers<[1], [0], [0], [1], [0, 0, 1, 1], [], []>} : vector<100x128xf32>, vector<128x128xf32>, vector<100x128xf32> -> vector<100x128xf32>
    %118 = arith.addf %113, %117 : vector<100x128xf32>
    %c0_118 = arith.constant 0 : index
    %c0_119 = arith.constant 0 : index
    %119 = vector.load %arg16[%c0_118, %c0_119] : memref<100x4xf32, #tpu.memory_space<vmem>>, vector<100x4xf32>
    %c0_120 = arith.constant 0 : index
    %c0_121 = arith.constant 0 : index
    %120 = vector.load %arg9[%c0_120, %c0_121] : memref<4x128xf32, #tpu.memory_space<vmem>>, vector<4x128xf32>
    %cst_122 = arith.constant dense<0.000000e+00> : vector<100x128xf32>
    %121 = tpu.matmul %119, %120, %cst_122 {dimension_numbers = #tpu.dot_dimension_numbers<[1], [0], [0], [1], [0, 0, 1, 1], [], []>} : vector<100x4xf32>, vector<4x128xf32>, vector<100x128xf32> -> vector<100x128xf32>
    %122 = arith.addf %118, %121 : vector<100x128xf32>
    %c0_123 = arith.constant 0 : index
    %c0_124 = arith.constant 0 : index
    %123 = vector.load %arg10[%c0_123, %c0_124] : memref<1x128xf32, #tpu.memory_space<vmem>>, vector<1x128xf32>
    %124 = vector.broadcast %123 : vector<1x128xf32> to vector<100x128xf32>
    %125 = arith.addf %122, %124 : vector<100x128xf32>
    %c0_125 = arith.constant 0 : index
    %c0_126 = arith.constant 0 : index
    %c0_127 = arith.constant 0 : index
    %126 = vector.load %arg12[%c0_125, %c0_126, %c0_127] : memref<1x100x128xf32, #tpu.memory_space<vmem>>, vector<1x100x128xf32>
    %127 = vector.shape_cast %126 : vector<1x100x128xf32> to vector<100x128xf32>
    %128 = vector.shape_cast %125 : vector<100x128xf32> to vector<1x100x128xf32>
    tpu.vector_store %arg12[%c0_125, %c0_126, %c0_127], %128 {strides = array<i32>} : memref<1x100x128xf32, #tpu.memory_space<vmem>>, vector<1x100x128xf32>,
    return
  }
  func.func @transform_0(%arg0: i32) -> (i32, i32, i32) {
    %c0_i32 = arith.constant 0 : i32
    %c0_i32_0 = arith.constant 0 : i32
    %c0_i32_1 = arith.constant 0 : i32
    return %arg0, %c0_i32, %c0_i32_0 : i32, i32, i32
  }
  func.func @transform_1(%arg0: i32) -> (i32, i32) {
    %c0_i32 = arith.constant 0 : i32
    %c0_i32_0 = arith.constant 0 : i32
    %c0_i32_1 = arith.constant 0 : i32
    return %c0_i32, %c0_i32_0 : i32, i32
  }
  func.func @transform_2(%arg0: i32) -> (i32, i32) {
    %c0_i32 = arith.constant 0 : i32
    %c0_i32_0 = arith.constant 0 : i32
    %c0_i32_1 = arith.constant 0 : i32
    return %c0_i32, %c0_i32_0 : i32, i32
  }
  func.func @transform_3(%arg0: i32) -> (i32, i32) {
    %c0_i32 = arith.constant 0 : i32
    %c0_i32_0 = arith.constant 0 : i32
    %c0_i32_1 = arith.constant 0 : i32
    return %c0_i32, %c0_i32_0 : i32, i32
  }
  func.func @transform_4(%arg0: i32) -> (i32, i32, i32) {
    %c0_i32 = arith.constant 0 : i32
    %c0_i32_0 = arith.constant 0 : i32
    %c0_i32_1 = arith.constant 0 : i32
    %c0_i32_2 = arith.constant 0 : i32
    return %c0_i32, %c0_i32_0, %c0_i32_1 : i32, i32, i32
  }
  func.func @transform_5(%arg0: i32) -> (i32, i32) {
    %c0_i32 = arith.constant 0 : i32
    %c0_i32_0 = arith.constant 0 : i32
    %c0_i32_1 = arith.constant 0 : i32
    return %c0_i32, %c0_i32_0 : i32, i32
  }
  func.func @transform_6(%arg0: i32) -> (i32, i32) {
    %c0_i32 = arith.constant 0 : i32
    %c0_i32_0 = arith.constant 0 : i32
    %c0_i32_1 = arith.constant 0 : i32
    return %c0_i32, %c0_i32_0 : i32, i32
  }
  func.func @transform_7(%arg0: i32) -> (i32, i32, i32) {
    %c0_i32 = arith.constant 0 : i32
    %c0_i32_0 = arith.constant 0 : i32
    %c0_i32_1 = arith.constant 0 : i32
    %c0_i32_2 = arith.constant 0 : i32
    return %c0_i32, %c0_i32_0, %c0_i32_1 : i32, i32, i32
  }
  func.func @transform_8(%arg0: i32) -> (i32, i32) {
    %c0_i32 = arith.constant 0 : i32
    %c0_i32_0 = arith.constant 0 : i32
    %c0_i32_1 = arith.constant 0 : i32
    return %c0_i32, %c0_i32_0 : i32, i32
  }
  func.func @transform_9(%arg0: i32) -> (i32, i32) {
    %c0_i32 = arith.constant 0 : i32
    %c0_i32_0 = arith.constant 0 : i32
    %c0_i32_1 = arith.constant 0 : i32
    return %c0_i32, %c0_i32_0 : i32, i32
  }
  func.func @transform_10(%arg0: i32) -> (i32, i32) {
    %c0_i32 = arith.constant 0 : i32
    %c0_i32_0 = arith.constant 0 : i32
    %c0_i32_1 = arith.constant 0 : i32
    return %c0_i32, %c0_i32_0 : i32, i32
  }
  func.func @transform_11(%arg0: i32) -> (i32, i32, i32) {
    %c0_i32 = arith.constant 0 : i32
    %c0_i32_0 = arith.constant 0 : i32
    %c0_i32_1 = arith.constant 0 : i32
    return %arg0, %c0_i32, %c0_i32_0 : i32, i32, i32
  }
}

</mosaic_0001>

<bundles_post_ra>
// kernel: tpu_custom_call.1
= control target key start
LH: loop header
LB: loop body
LE: loop exit
PB: predicated region body
PF: predicated region fallthrough
CT: control target
= control target key end

     0   :  { %16 = vsyncpa [#allocation7], 0  ;;  %s11344_s17 = smov 0   ;;  %s14086_s0 = inlined_call_operand.vmem [shape: f32[2,324,4], index: 0, kind: input, shape index: {}]   ;;  %s14087_s1 = inlined_call_operand.vmem [shape: f32[324,1], index: 1, kind: input, shape index: {}]   ;;  %s14088_s2 = inlined_call_operand.vmem [shape: f32[1,4], index: 2, kind: input, shape index: {}]   ;;  %s14089_s3 = inlined_call_operand.vmem [shape: f32[1,4], index: 3, kind: input, shape index: {}]   ;;  %s14090_s4 = inlined_call_operand.vmem [shape: f32[9,4,128], index: 4, kind: input, shape index: {}]   ;;  %s14091_s5 = inlined_call_operand.vmem [shape: f32[1,128], index: 5, kind: input, shape index: {}]   ;;  %s14092_s6 = inlined_call_operand.vmem [shape: f32[1,128], index: 6, kind: input, shape index: {}]   ;;  %s14093_s7 = inlined_call_operand.hbm [shape: f32[9,128,128], index: 7, kind: input, shape index: {}]   ;;  %s14094_s8 = inlined_call_operand.vmem [shape: f32[4,128], index: 8, kind: input, shape index: {}]   ;;  %s14095_s9 = inlined_call_operand.vmem [shape: f32[1,128], index: 9, kind: input, shape index: {}]   ;;  %s14096_s10 = inlined_call_operand.vmem [shape: f32[8,18], index: 10, kind: input, shape index: {}]   ;;  %s14097_s11 = inlined_call_operand.vmem [shape: f32[2,100,128], index: 11, kind: output, shape index: {}]  }
   0x1 LB: > { %s11350_s18 = sadd.s32 4294967295, %s11268_s17   ;;  %p7430_p0 = scmp.ge.s32.totalorder %s11268_s17, 1  ;;  %s11268_s17 = sphi %s11344_s17, %s22_s17  }
   0x2   : > { %p289_p1 = scmp.lt.s32.totalorder %s11268_s17, 3  ;;  %s11274_s19 = smov [#allocation6]  }
   0x3   : > { %s319_s20 = sshll.u32 %s11274_s19, 4  ;;  %p14098_p3 = scmp.eq.s32.totalorder %s11350_s18, 0  ;;  %s320_s20 = int_to_ptr.vmem [resolvable:$true] %s319_s20 }
   0x4   : > { %p11354_p2 = pnand %p7430_p0, %p289_p1  ;;  %s11226_s25 = scalar_lea.hbm %s14093_s7, 18432 }
   0x5   : > { %p11227_p6 = scmp.ne.s32.totalorder %s14093_s7, %s11226_s25  ;;  %p11233_p10 = scmp.lt.u32.totalorder %s11226_s25, %s14093_s7 }
   0x6   : > { %s14100_s21 = scalar_select %p11354_p2, 1, 0 }
   0x7   : > { %p11189_p4 = pneg %p11354_p2 }
   0x9   : > { %p11363_p5 = pnand %p14098_p3, %p11189_p4 }
   0xb   : > { %p11228_p7 = pneg %p11363_p5 }
   0xd   : > { %p11229_p8 = pnand %p11228_p7, %p11227_p6 }
   0xf   : > { %p11230_p9 = pneg %p11229_p8 }
  0x11   : > { %p11235_p11 = pnand %p11233_p10, %p11230_p9 }
  0x13   : > { %11238 = shalt.err (!%p11235_p11)
}
  0x14   : > { %s11239_s30 = scalar_lea.vmem %s320_s20, 18432  ;;  %p11247_p1 = scmp.lt.s32.totalorder %s320_s20, %s320_s20 }
  0x15   : > { %p11240_p12 = scmp.ne.s32.totalorder %s320_s20, %s11239_s30  ;;  %p11248_p4 = scmp.lt.s32.totalorder %s11239_s30, %s11239_s30 }
  0x17   : > { %p11242_p13 = pnand %p11240_p12, %p11228_p7  ;;  %p11249_p3 = por %p11248_p4, %p11247_p1 }
  0x19   : > { %p11243_p0 = pneg %p11242_p13 }
  0x1b   : > { %p11250_p2 = pnand %p11249_p3, %p11243_p0 }
  0x1d   : > { %11253 = shalt.err (!%p11250_p2)
}
  0x1e   : > { %s11275_s12 = smov 128   ;;  %s11276_s13 = smov 8  }
  0x1f   : > { %11192 = dma.hbm_to_vmem [thread:$0]  (!%p11363_p5), %s14093_s7, 18432, %s320_s20, [#allocation7], %s11275_s12, %s11275_s12, %s11276_s13  }
  0x20   : > { %p14102_p6 = scmp.ne.s32.totalorder %s14100_s21, 0 }
  0x21   : > { %p14103_p8 = scmp.eq.s32.totalorder (!%p14102_p6), %s11350_s18, 0 }
  0x22   : > { %352 = sbr.rel (%p14102_p6) target bundleno = 1850 (0x73a), region = 64 }
  0x29   : > { %11263 = dma.done.wait (%p14103_p8), [#allocation7], 18432   ;;  %p14104_p7 = pmov %p14103_p8 }
  0x2a   : > { %vm867_vm0 = vcmask 31744   ;;  %v11277_v0 = vmov 0.0   ;;  %v11278_v1 = vmov 0   ;;  %v11526_v2 = vld [vmem:[%s14096_s10] sm:$0xff]  ;;  %v582_v3 = vld [vmem:[%s14087_s1 + $0x10] sm:$0xff]  ;;  %v583_v5 = vld [vmem:[%s14087_s1 + $0x18] sm:$0xff] }
  0x2b   : > { %11265 = vsyncadd (%p14104_p7), [#allocation7], 4294948864  ;;  %5332 = vst [vmem:[#allocation3] sm:$0xff] %v11277_v0  ;;  %11222 = vset.pattern.permute.xlu1 %v11278_v1  ;;  %11221 = vset.pattern.permute.xlu0 %v11278_v1  ;;  %v580_v4 = vld [vmem:[%s14087_s1] sm:$0xff]  ;;  %v581_v6 = vld [vmem:[%s14087_s1 + $0x8] sm:$0xff]  ;;  %vm11279_vm1 = vmmov 0  }
  0x2c   : > { %5333 = vst [vmem:[#allocation3 + $0x8] sm:$0xff] %v11277_v0  ;;  %5334 = vst [vmem:[#allocation3 + $0x10] sm:$0xff] %v11277_v0  ;;  %8521 = vmatprep.subr.mxu1 %v11277_v0  ;;  %9021 = vmatprep.subr.mxu0 %v11277_v0  ;;  %p392_p2 = scmp.lt.s32.totalorder %s11350_s18, 1  ;;  %v585_v7 = vld [vmem:[%s14087_s1 + $0x28] sm:$0xff]  ;;  %v584_v8 = vld [vmem:[%s14087_s1 + $0x20] sm:$0xff]  ;;  %vm1165_vm2 = vcmask 1043456  }
  0x2d   : > { %5335 = vst [vmem:[#allocation3 + $0x18] sm:$0xff] %v11277_v0  ;;  %5336 = vst [vmem:[#allocation3 + $0x20] sm:$0xff] %v11277_v0  ;;  %633 = vperm.xlu1 %11222, %v582_v3   ;;  %623 = vperm.xlu0 %11221, %v580_v4   ;;  %v587_v9 = vld [vmem:[%s14087_s1 + $0x38] sm:$0xff]  ;;  %v586_v10 = vld [vmem:[%s14087_s1 + $0x30] sm:$0xff]  ;;  %vm914_vm3 = vcmask 27648   ;;  %s13488_s24 = smov 0  }
  0x2e   : > { %5337 = vst [vmem:[#allocation3 + $0x28] sm:$0xff] %v11277_v0  ;;  %5338 = vst [vmem:[#allocation3 + $0x30] sm:$0xff] %v11277_v0  ;;  %8523 = vmatprep.mubr.msk.f32.mxu1 %vm11279_vm1, %v11277_v0  ;;  %9023 = vmatprep.mubr.msk.f32.mxu0 %vm11279_vm1, %v11277_v0  ;;  %s14106_s18 = smov (!%p392_p2, %s11350_s18), 1  ;;  %v589_v11 = vld [vmem:[%s14087_s1 + $0x48] sm:$0xff]  ;;  %v588_v12 = vld [vmem:[%s14087_s1 + $0x40] sm:$0xff] }
  0x2f   : > { %5339 = vst [vmem:[#allocation3 + $0x38] sm:$0xff] %v11277_v0  ;;  %5340 = vst [vmem:[#allocation3 + $0x40] sm:$0xff] %v11277_v0  ;;  %s11184_s19 = smul.u32 104, %s14106_s18  ;;  %v7439_v13 = vld [vmem:[%s14090_s4 + $0x4] sm:$0xf]  ;;  %v591_v16 = vld [vmem:[%s14087_s1 + $0x58] sm:$0xff] }
  0x30   : > { %5341 = vst [vmem:[#allocation3 + $0x48] sm:$0xff] %v11277_v0  ;;  %5342 = vst [vmem:[#allocation3 + $0x50] sm:$0xff] %v11277_v0  ;;  %8522 = vmatpush3.msk.msra.mxu1 %vm1165_vm2, %v7439_v13  ;;  %v7610_v15 = vld [vmem:[%s14090_s4 + $0x10] sm:$0xf]  ;;  %v998_v19 = vld [vmem:[%s14090_s4] sm:$0xf] }
  0x31   : > { %5343 = vst [vmem:[#allocation3 + $0x58] sm:$0xff] %v11277_v0  ;;  %5344 = vst [vmem:[#allocation3 + $0x60] sm:$0xff] %v11277_v0  ;;  %638 = vperm.xlu1 %11222, %v583_v5   ;;  %628 = vperm.xlu0 %11221, %v581_v6   ;;  %s11564_s22 = scalar_lea.vmem %s14097_s11, %s11184_s19  ;;  %v590_v17 = vld [vmem:[%s14087_s1 + $0x50] sm:$0xff]  ;;  %v593_v20 = vld [vmem:[%s14087_s1 + $0x68] sm:$0xff]  ;;  %s11183_s25 = smul.u32 328, %s14106_s18 }
  0x32   : > { %5345 = vst [vmem:[#allocation3 + $0x68] sm:$0xff] %v11277_v0  ;;  %5346 = vst [vmem:[#allocation3 + $0x70] sm:$0xff] %v11277_v0  ;;  %9022 = vmatpush3.msk.msra.mxu0 %vm1165_vm2, %v7610_v15  ;;  %8646 = vmatprep.subr.mxu1 %v11277_v0  ;;  %v592_v21 = vld [vmem:[%s14087_s1 + $0x60] sm:$0xff]  ;;  %v595_v22 = vld [vmem:[%s14087_s1 + $0x78] sm:$0xff] }
  0x33   : > { %5347 = vst [vmem:[#allocation3 + $0x78] sm:$0xff] %v11277_v0  ;;  %5390 = vst.msk [vmem:[#allocation5] sm:$0xff] %vm867_vm0, %v11277_v0  ;;  %9146 = vmatprep.subr.mxu0 %v11277_v0  ;;  %v594_v23 = vld [vmem:[%s14087_s1 + $0x70] sm:$0xff]  ;;  %v597_v24 = vld [vmem:[%s14087_s1 + $0x88] sm:$0xff]  ;;  %s11663_s13 = scalar_lea.vmem %s14086_s0, %s11183_s25 }
  0x34   : > { %5391 = vst.msk [vmem:[#allocation5 + $0x8] sm:$0xff] %vm867_vm0, %v11277_v0  ;;  %5392 = vst.msk [vmem:[#allocation5 + $0x10] sm:$0xff] %vm867_vm0, %v11277_v0  ;;  %v596_v25 = vld [vmem:[%s14087_s1 + $0x80] sm:$0xff]  ;;  %v599_v26 = vld [vmem:[%s14087_s1 + $0x98] sm:$0xff] }
  0x35   : > { %5393 = vst.msk [vmem:[#allocation5 + $0x18] sm:$0xff] %vm867_vm0, %v11277_v0  ;;  %5394 = vst.msk [vmem:[#allocation5 + $0x20] sm:$0xff] %vm867_vm0, %v11277_v0  ;;  %648 = vperm.xlu1 %11222, %v585_v7   ;;  %643 = vperm.xlu0 %11221, %v584_v8   ;;  %v598_v27 = vld [vmem:[%s14087_s1 + $0x90] sm:$0xff]  ;;  %v601_v28 = vld [vmem:[%s14087_s1 + $0xa8] sm:$0xff] }
  0x36   : > { %5395 = vst.msk [vmem:[#allocation5 + $0x28] sm:$0xff] %vm867_vm0, %v11277_v0  ;;  %5396 = vst.msk [vmem:[#allocation5 + $0x30] sm:$0xff] %vm867_vm0, %v11277_v0  ;;  %v600_v29 = vld [vmem:[%s14087_s1 + $0xa0] sm:$0xff]  ;;  %v603_v30 = vld [vmem:[%s14087_s1 + $0xb8] sm:$0xff] }
  0x37   : > { %5397 = vst.msk [vmem:[#allocation5 + $0x38] sm:$0xff] %vm867_vm0, %v11277_v0  ;;  %5398 = vst.msk [vmem:[#allocation5 + $0x40] sm:$0xff] %vm867_vm0, %v11277_v0  ;;  %v602_v31 = vld [vmem:[%s14087_s1 + $0xb0] sm:$0xff]  ;;  %v605_v32 = vld [vmem:[%s14087_s1 + $0xc8] sm:$0xff] }
  0x38   : > { %5399 = vst.msk [vmem:[#allocation5 + $0x48] sm:$0xff] %vm867_vm0, %v11277_v0  ;;  %5400 = vst.msk [vmem:[#allocation5 + $0x50] sm:$0xff] %vm867_vm0, %v11277_v0  ;;  %v604_v33 = vld [vmem:[%s14087_s1 + $0xc0] sm:$0xff]  ;;  %v607_v34 = vld [vmem:[%s14087_s1 + $0xd8] sm:$0xff] }
  0x39   : > { %5401 = vst.msk [vmem:[#allocation5 + $0x58] sm:$0xff] %vm867_vm0, %v11277_v0  ;;  %868 = vst.msk [vmem:[#allocation2] sm:$0xff] %vm867_vm0, %v11277_v0  ;;  %658 = vperm.xlu1 %11222, %v587_v9   ;;  %653 = vperm.xlu0 %11221, %v586_v10   ;;  %v606_v35 = vld [vmem:[%s14087_s1 + $0xd0] sm:$0xff]  ;;  %v609_v36 = vld [vmem:[%s14087_s1 + $0xe8] sm:$0xff] }
  0x3a   : > { %869 = vst.msk [vmem:[#allocation2 + $0x8] sm:$0xff] %vm867_vm0, %v11277_v0  ;;  %870 = vst.msk [vmem:[#allocation2 + $0x10] sm:$0xff] %vm867_vm0, %v11277_v0  ;;  %v608_v37 = vld [vmem:[%s14087_s1 + $0xe0] sm:$0xff]  ;;  %v611_v38 = vld [vmem:[%s14087_s1 + $0xf8] sm:$0xff] }
  0x3b   : > { %871 = vst.msk [vmem:[#allocation2 + $0x18] sm:$0xff] %vm867_vm0, %v11277_v0  ;;  %872 = vst.msk [vmem:[#allocation2 + $0x20] sm:$0xff] %vm867_vm0, %v11277_v0  ;;  %v610_v39 = vld [vmem:[%s14087_s1 + $0xf0] sm:$0xff]  ;;  %v11668_v40 = vld [vmem:[%s14088_s2] ss:$0 sm:$0xff] }
  0x3c   : > { %873 = vst.msk [vmem:[#allocation2 + $0x28] sm:$0xff] %vm867_vm0, %v11277_v0  ;;  %874 = vst.msk [vmem:[#allocation2 + $0x30] sm:$0xff] %vm867_vm0, %v11277_v0  ;;  %v435_v41 = vld [vmem:[%s11663_s13 + $0x108] sm:$0xff]  ;;  %v434_v42 = vld [vmem:[%s11663_s13 + $0x100] sm:$0xff] }
  0x3d   : > { %875 = vst.msk [vmem:[#allocation2 + $0x38] sm:$0xff] %vm867_vm0, %v11277_v0  ;;  %876 = vst.msk [vmem:[#allocation2 + $0x40] sm:$0xff] %vm867_vm0, %v11277_v0  ;;  %668 = vperm.xlu1 %11222, %v589_v11   ;;  %663 = vperm.xlu0 %11221, %v588_v12   ;;  %v483_v43 = vmul.f32 %v11668_v40, %v435_v41  ;;  %v482_v44 = vmul.f32 %v11668_v40, %v434_v42  ;;  %v11677_v45 = vld [vmem:[%s14089_s3] ss:$0 sm:$0xff]  ;;  %v613_v46 = vld [vmem:[%s14087_s1 + $0x108] sm:$0xff] }
  0x3e   : > { %877 = vst.msk [vmem:[#allocation2 + $0x48] sm:$0xff] %vm867_vm0, %v11277_v0  ;;  %878 = vst.msk [vmem:[#allocation2 + $0x50] sm:$0xff] %vm867_vm0, %v11277_v0  ;;  %v612_v47 = vld [vmem:[%s14087_s1 + $0x100] sm:$0xff]  ;;  %v437_v50 = vld [vmem:[%s11663_s13 + $0x118] sm:$0xff] }
  0x3f   : > { %879 = vst.msk [vmem:[#allocation2 + $0x58] sm:$0xff] %vm867_vm0, %v11277_v0  ;;  %880 = vst.msk [vmem:[#allocation2 + $0x60] sm:$0xff] %vm867_vm0, %v11277_v0  ;;  %v11686_v48 = vadd.f32 %v11677_v45, %v483_v43  ;;  %v11689_v49 = vadd.f32 %v11677_v45, %v482_v44  ;;  %v436_v51 = vld [vmem:[%s11663_s13 + $0x110] sm:$0xff]  ;;  %v485_v52 = vmul.f32 %v11668_v40, %v437_v50  ;;  %v615_v54 = vld [vmem:[%s14087_s1 + $0x118] sm:$0xff] }
  0x40   : > { %881 = vst.msk [vmem:[#allocation2 + $0x68] sm:$0xff] %vm867_vm0, %v11277_v0  ;;  %882 = vst.msk [vmem:[#allocation2 + $0x70] sm:$0xff] %vm867_vm0, %v11277_v0  ;;  %v484_v53 = vmul.f32 %v11668_v40, %v436_v51  ;;  %v614_v55 = vld [vmem:[%s14087_s1 + $0x110] sm:$0xff]  ;;  %v439_v58 = vld [vmem:[%s11663_s13 + $0x128] sm:$0xff] }
  0x41   : > { %883 = vst.msk [vmem:[#allocation2 + $0x78] sm:$0xff] %vm867_vm0, %v11277_v0  ;;  %884 = vst.msk [vmem:[#allocation2 + $0x80] sm:$0xff] %vm867_vm0, %v11277_v0  ;;  %v999_v14 = vld [vmem:[#allocation2 + $0x6] sm:$0xff]  ;;  %v1000_v18 = vld [vmem:[#allocation2 + $0xe] sm:$0xff]  ;;  %678 = vperm.xlu1 %11222, %v591_v16   ;;  %673 = vperm.xlu0 %11221, %v590_v17   ;;  %v11702_v56 = vadd.f32 %v11677_v45, %v485_v52  ;;  %v487_v60 = vmul.f32 %v11668_v40, %v439_v58 }
  0x42   : > { %885 = vst.msk [vmem:[#allocation2 + $0x88] sm:$0xff] %vm867_vm0, %v11277_v0  ;;  %886 = vst.msk [vmem:[#allocation2 + $0x90] sm:$0xff] %vm867_vm0, %v11277_v0  ;;  %8524 = vmatmul.mubr.msk.f32.vlgmr.msra.gmra.mrb[0].mxu1 %vm867_vm0, %v999_v14  ;;  %v11705_v57 = vadd.f32 %v11677_v45, %v484_v53  ;;  %v438_v59 = vld [vmem:[%s11663_s13 + $0x120] sm:$0xff]  ;;  %v617_v62 = vld [vmem:[%s14087_s1 + $0x128] sm:$0xff] }
  0x43   : > { %887 = vst.msk [vmem:[#allocation2 + $0x98] sm:$0xff] %vm867_vm0, %v11277_v0  ;;  %888 = vst.msk [vmem:[#allocation2 + $0xa0] sm:$0xff] %vm867_vm0, %v11277_v0  ;;  %8526 = vmatprep.mubr.msk.f32.mxu1 %vm11279_vm1, %v11277_v0  ;;  %8647 = vmatpush3.msk.msra.mxu1 %vm1165_vm2, %v998_v19  ;;  %v486_v61 = vmul.f32 %v11668_v40, %v438_v59  ;;  %v616_v63 = vld [vmem:[%s14087_s1 + $0x120] sm:$0xff]  ;;  %v11718_v1 = vadd.f32 %v11677_v45, %v487_v60  ;;  %v441_v4 = vld [vmem:[%s11663_s13 + $0x138] sm:$0xff] }
  0x44   : > { %889 = vst.msk [vmem:[#allocation2 + $0xa8] sm:$0xff] %vm867_vm0, %v11277_v0  ;;  %890 = vst.msk [vmem:[#allocation2 + $0xb0] sm:$0xff] %vm867_vm0, %v11277_v0  ;;  %8771 = vmatprep.subr.mxu1 %v11277_v0  ;;  %v440_v5 = vld [vmem:[%s11663_s13 + $0x130] sm:$0xff]  ;;  %v489_v6 = vmul.f32 %v11668_v40, %v441_v4  ;;  %v619_v8 = vld [vmem:[%s14087_s1 + $0x138] sm:$0xff] }
  0x45   : > { %891 = vst.msk [vmem:[#allocation2 + $0xb8] sm:$0xff] %vm867_vm0, %v11277_v0  ;;  %892 = vst.msk [vmem:[#allocation2 + $0xc0] sm:$0xff] %vm867_vm0, %v11277_v0  ;;  %688 = vperm.xlu1 %11222, %v593_v20   ;;  %683 = vperm.xlu0 %11221, %v592_v21   ;;  %v11721_v3 = vadd.f32 %v11677_v45, %v486_v61  ;;  %v488_v7 = vmul.f32 %v11668_v40, %v440_v5  ;;  %v618_v9 = vld [vmem:[%s14087_s1 + $0x130] sm:$0xff]  ;;  %v442_v12 = vld [vmem:[%s11663_s13 + $0x140] sm:$0xf] }
  0x46   : > { %893 = vst.msk [vmem:[#allocation2 + $0xc8] sm:$0xff] %vm867_vm0, %v11277_v0  ;;  %894 = vst.msk [vmem:[#allocation2 + $0xd0] sm:$0xff] %vm867_vm0, %v11277_v0  ;;  %8527 = vmatmul.mubr.msk.f32.gmra.mrb[2].mxu1 %vm867_vm0, %v1000_v18  ;;  %v11734_v10 = vadd.f32 %v11677_v45, %v489_v6  ;;  %v490_v13 = vmul.f32 %v11668_v40, %v442_v12  ;;  %v620_v14 = vld [vmem:[%s14087_s1 + $0x140] sm:$0xf]  ;;  %v404_v16 = vld [vmem:[%s11663_s13 + $0x10] sm:$0xff] }
  0x47   : > { %895 = vst.msk [vmem:[#allocation2 + $0xd8] sm:$0xff] %vm867_vm0, %v11277_v0  ;;  %896 = vst.msk [vmem:[#allocation2 + $0xe0] sm:$0xff] %vm867_vm0, %v11277_v0  ;;  %8529 = vmatprep.mubr.msk.f32.mxu1 %vm11279_vm1, %v11277_v0  ;;  %v11737_v11 = vadd.f32 %v11677_v45, %v488_v7  ;;  %v402_v17 = vld [vmem:[%s11663_s13] sm:$0xff]  ;;  %v452_v18 = vmul.f32 %v11668_v40, %v404_v16  ;;  %v405_v20 = vld [vmem:[%s11663_s13 + $0x18] sm:$0xff] }
  0x48   : > { %897 = vst.msk [vmem:[#allocation2 + $0xe8] sm:$0xff] %vm867_vm0, %v11277_v0  ;;  %898 = vst.msk [vmem:[#allocation2 + $0xf0] sm:$0xff] %vm867_vm0, %v11277_v0  ;;  %v11745_v15 = vadd.f32 %v11677_v45, %v490_v13  ;;  %v450_v19 = vmul.f32 %v11668_v40, %v402_v17  ;;  %v403_v21 = vld [vmem:[%s11663_s13 + $0x8] sm:$0xff]  ;;  %v410_v51 = vld [vmem:[%s11663_s13 + $0x40] sm:$0xff] }
  0x49   : > { %899 = vst.msk [vmem:[#allocation2 + $0xf8] sm:$0xff] %vm867_vm0, %v11277_v0  ;;  %900 = vst.msk [vmem:[#allocation2 + $0x100] sm:$0xff] %vm867_vm0, %v11277_v0  ;;  %698 = vperm.xlu1 %11222, %v595_v22   ;;  %693 = vperm.xlu0 %11221, %v594_v23   ;;  %v500_v22 = vadd.f32 %v11677_v45, %v452_v18  ;;  %v411_v50 = vld [vmem:[%s11663_s13 + $0x48] sm:$0xff]  ;;  %v413_v4 = vld [vmem:[%s11663_s13 + $0x58] sm:$0xff] }
  0x4a   : > { %901 = vst.msk [vmem:[#allocation2 + $0x108] sm:$0xff] %vm867_vm0, %v11277_v0  ;;  %902 = vst.msk [vmem:[#allocation2 + $0x110] sm:$0xff] %vm867_vm0, %v11277_v0  ;;  %v498_v23 = vadd.f32 %v11677_v45, %v450_v19  ;;  %v459_v59 = vmul.f32 %v11668_v40, %v411_v50  ;;  %v412_v5 = vld [vmem:[%s11663_s13 + $0x50] sm:$0xff]  ;;  %v461_v12 = vmul.f32 %v11668_v40, %v413_v4 }
  0x4b   : > { %903 = vst.msk [vmem:[#allocation2 + $0x118] sm:$0xff] %vm867_vm0, %v11277_v0  ;;  %904 = vst.msk [vmem:[#allocation2 + $0x120] sm:$0xff] %vm867_vm0, %v11277_v0  ;;  %v460_v13 = vmul.f32 %v11668_v40, %v412_v5  ;;  %v7653_v17 = vld [vmem:[%s14090_s4 + $0x14] sm:$0xf] }
  0x4c   : > { %905 = vst.msk [vmem:[#allocation2 + $0x128] sm:$0xff] %vm867_vm0, %v11277_v0  ;;  %906 = vst.msk [vmem:[#allocation2 + $0x130] sm:$0xff] %vm867_vm0, %v11277_v0 }
  0x4d   : > { %907 = vst.msk [vmem:[#allocation2 + $0x138] sm:$0xff] %vm867_vm0, %v11277_v0  ;;  %908 = vst.msk [vmem:[#allocation2 + $0x140] sm:$0xff] %vm867_vm0, %v11277_v0  ;;  %708 = vperm.xlu1 %11222, %v597_v24   ;;  %703 = vperm.xlu0 %11221, %v596_v25   ;;  %v453_v24 = vmul.f32 %v11668_v40, %v405_v20  ;;  %v451_v25 = vmul.f32 %v11668_v40, %v403_v21  ;;  %v415_v20 = vld [vmem:[%s11663_s13 + $0x68] sm:$0xff]  ;;  %v414_v21 = vld [vmem:[%s11663_s13 + $0x60] sm:$0xff] }
  0x4e   : > { %909 = vst.msk [vmem:[#allocation2 + $0x148] sm:$0xff] %vm867_vm0, %v11277_v0  ;;  %910 = vst.msk [vmem:[#allocation2 + $0x150] sm:$0xff] %vm867_vm0, %v11277_v0 }
  0x4f   : > { %911 = vst.msk [vmem:[#allocation2 + $0x158] sm:$0xff] %vm867_vm0, %v11277_v0  ;;  %912 = vst.msk [vmem:[#allocation2 + $0x160] sm:$0xff] %vm867_vm0, %v11277_v0 }
  0x50   : > { %913 = vst.msk [vmem:[#allocation2 + $0x168] sm:$0xff] %vm867_vm0, %v11277_v0 }
  0x51   : > { %718 = vperm.xlu1 %11222, %v599_v26   ;;  %713 = vperm.xlu0 %11221, %v598_v27   ;;  %5402 = vst.msk [vmem:[#allocation5 + $0x60] sm:$0xf] %vm914_vm3, %v11277_v0  ;;  %v407_v26 = vld [vmem:[%s11663_s13 + $0x28] sm:$0xff]  ;;  %v406_v27 = vld [vmem:[%s11663_s13 + $0x20] sm:$0xff] }
  0x55   : > { %728 = vperm.xlu1 %11222, %v601_v28   ;;  %723 = vperm.xlu0 %11221, %v600_v29   ;;  %v455_v28 = vmul.f32 %v11668_v40, %v407_v26  ;;  %v454_v29 = vmul.f32 %v11668_v40, %v406_v27  ;;  %v509_v27 = vadd.f32 %v11677_v45, %v461_v12 }
  0x59   : > { %738 = vperm.xlu1 %11222, %v603_v30   ;;  %733 = vperm.xlu0 %11221, %v602_v31   ;;  %v541_v30 = vmax.f32 %v500_v22, 0.0  ;;  %v539_v31 = vmax.f32 %v498_v23, 0.0 }
  0x5d   : > { %748 = vperm.xlu1 %11222, %v605_v32   ;;  %743 = vperm.xlu0 %11221, %v604_v33   ;;  %v501_v32 = vadd.f32 %v11677_v45, %v453_v24  ;;  %v499_v33 = vadd.f32 %v11677_v45, %v451_v25 }
  0x61   : > { %758 = vperm.xlu1 %11222, %v607_v34   ;;  %753 = vperm.xlu0 %11221, %v606_v35   ;;  %v409_v34 = vld [vmem:[%s11663_s13 + $0x38] sm:$0xff]  ;;  %v408_v35 = vld [vmem:[%s11663_s13 + $0x30] sm:$0xff] }
  0x62   : > { %v457_v41 = vmul.f32 %v11668_v40, %v409_v34  ;;  %v456_v42 = vmul.f32 %v11668_v40, %v408_v35  ;;  %v508_v34 = vadd.f32 %v11677_v45, %v460_v13  ;;  %v416_v35 = vld [vmem:[%s11663_s13 + $0x70] sm:$0xff] }
  0x63   : > { %v420_v13 = vld [vmem:[%s11663_s13 + $0x90] sm:$0xff] }
  0x64   : > { %v505_v58 = vadd.f32 %v11677_v45, %v457_v41 }
  0x65   : > { %768 = vperm.xlu1 %11222, %v609_v36   ;;  %763 = vperm.xlu0 %11221, %v608_v37  }
  0x69   : > { %778 = vperm.xlu1 %11222, %v611_v38   ;;  %773 = vperm.xlu0 %11221, %v610_v39   ;;  %v503_v38 = vadd.f32 %v11677_v45, %v455_v28  ;;  %v502_v39 = vadd.f32 %v11677_v45, %v454_v29  ;;  %v463_v28 = vmul.f32 %v11668_v40, %v415_v20 }
  0x6a   : > { %v462_v29 = vmul.f32 %v11668_v40, %v414_v21  ;;  %v423_v21 = vld [vmem:[%s11663_s13 + $0xa8] sm:$0xff] }
  0x6d   : > { %788 = vperm.xlu1 %11222, %v613_v46   ;;  %783 = vperm.xlu0 %11221, %v612_v47   ;;  %v542_v46 = vmax.f32 %v501_v32, 0.0  ;;  %v540_v47 = vmax.f32 %v499_v33, 0.0 }
  0x71   : > { %798 = vperm.xlu1 %11222, %v615_v54   ;;  %793 = vperm.xlu0 %11221, %v614_v55   ;;  %v544_v54 = vmax.f32 %v503_v38, 0.0  ;;  %v543_v55 = vmax.f32 %v502_v39, 0.0 }
  0x75   : > { %808 = vperm.xlu1 %11222, %v617_v62   ;;  %803 = vperm.xlu0 %11221, %v616_v63   ;;  %v504_v62 = vadd.f32 %v11677_v45, %v456_v42  ;;  %v458_v63 = vmul.f32 %v11668_v40, %v410_v51  ;;  %v550_v51 = vmax.f32 %v509_v27, 0.0 }
  0x77   : > { %v545_v18 = vmax.f32 %v504_v62, 0.0  ;;  %v506_v19 = vadd.f32 %v11677_v45, %v458_v63 }
  0x79   : > { %818 = vperm.xlu1 %11222, %v619_v8   ;;  %813 = vperm.xlu0 %11221, %v618_v9   ;;  %v546_v8 = vmax.f32 %v505_v58, 0.0  ;;  %v507_v9 = vadd.f32 %v11677_v45, %v459_v59  ;;  %v547_v33 = vmax.f32 %v506_v19, 0.0 }
  0x7b   : > { %v548_v26 = vmax.f32 %v507_v9, 0.0 }
  0x7d   : > { %823 = vperm.xlu0 %11221, %v620_v14  }
  0xac   : > { %v634_v36 = vpop.permute.xlu1 %633  ;;  %v624_v37 = vpop.permute.xlu0 %623 }
  0xad   : > { %v828_v43 = vmul.f32 %v634_v36, %v541_v30  ;;  %v826_v44 = vmul.f32 %v624_v37, %v539_v31  ;;  %v417_v30 = vld [vmem:[%s11663_s13 + $0x78] sm:$0xff] }
  0xae   : > { %v465_v38 = vmul.f32 %v11668_v40, %v417_v30 }
  0xaf   : > { %918 = vst.msk [vmem:[#allocation2 + $0x28] sm:$0xff] %vm867_vm0, %v828_v43  ;;  %916 = vst.msk [vmem:[#allocation2 + $0x18] sm:$0xff] %vm867_vm0, %v826_v44  ;;  %v511_v43 = vadd.f32 %v11677_v45, %v463_v28  ;;  %v510_v44 = vadd.f32 %v11677_v45, %v462_v29  ;;  %v471_v29 = vmul.f32 %v11668_v40, %v423_v21 }
  0xb0   : > { %v639_v52 = vpop.permute.xlu1 %638  ;;  %v629_v53 = vpop.permute.xlu0 %628  ;;  %v513_v58 = vadd.f32 %v11677_v45, %v465_v38 }
  0xb1   : > { %v829_v60 = vmul.f32 %v639_v52, %v542_v46  ;;  %v827_v61 = vmul.f32 %v629_v53, %v540_v47  ;;  %v464_v46 = vmul.f32 %v11668_v40, %v416_v35  ;;  %v549_v52 = vmax.f32 %v508_v34, 0.0  ;;  %v419_v53 = vld [vmem:[%s11663_s13 + $0x88] sm:$0xff] }
  0xb2   : > { %v467_v62 = vmul.f32 %v11668_v40, %v419_v53 }
  0xb3   : > { %919 = vst.msk [vmem:[#allocation2 + $0x30] sm:$0xff] %vm867_vm0, %v829_v60  ;;  %917 = vst.msk [vmem:[#allocation2 + $0x20] sm:$0xff] %vm867_vm0, %v827_v61  ;;  %v512_v61 = vadd.f32 %v11677_v45, %v464_v46 }
  0xb4   : > { %v649_v6 = vpop.permute.xlu1 %648  ;;  %v644_v7 = vpop.permute.xlu0 %643  ;;  %v515_v19 = vadd.f32 %v11677_v45, %v467_v62  ;;  %v426_v62 = vld [vmem:[%s11663_s13 + $0xc0] sm:$0xff] }
  0xb5   : > { %v831_v14 = vmul.f32 %v649_v6, %v544_v54  ;;  %v830_v16 = vmul.f32 %v644_v7, %v543_v55  ;;  %v418_v54 = vld [vmem:[%s11663_s13 + $0x80] sm:$0xff]  ;;  %v552_v6 = vmax.f32 %v511_v43, 0.0  ;;  %v551_v7 = vmax.f32 %v510_v44, 0.0 }
  0xb6   : > { %v1001_v22 = vld [vmem:[#allocation2 + $0x16] sm:$0xff]  ;;  %v2797_v42 = vld [vmem:[#allocation2 + $0x28] sm:$0xff]  ;;  %v466_v63 = vmul.f32 %v11668_v40, %v418_v54  ;;  %v519_v44 = vadd.f32 %v11677_v45, %v471_v29 }
  0xb7   : > { %v2795_v23 = vld [vmem:[#allocation2 + $0x18] sm:$0xff]  ;;  %921 = vst.msk [vmem:[#allocation2 + $0x40] sm:$0xff] %vm867_vm0, %v831_v14  ;;  %920 = vst.msk [vmem:[#allocation2 + $0x38] sm:$0xff] %vm867_vm0, %v830_v16  ;;  %8530 = vmatmul.mubr.msk.f32.gmra.mrb[4].mxu1 %vm867_vm0, %v1001_v22 }
  0xb8   : > { %9024 = vmatmul.mubr.msk.f32.vlgmr.msra.gmra.mrb[0].mxu0 %vm867_vm0, %v2795_v23  ;;  %v659_v24 = vpop.permute.xlu1 %658  ;;  %v654_v25 = vpop.permute.xlu0 %653  ;;  %8532 = vmatprep.mubr.msk.f32.mxu1 %vm11279_vm1, %v11277_v0  ;;  %v514_v20 = vadd.f32 %v11677_v45, %v466_v63 }
  0xb9   : > { %9147 = vmatpush3.msk.msra.mxu0 %vm1165_vm2, %v7653_v17  ;;  %v833_v31 = vmul.f32 %v659_v24, %v546_v8  ;;  %v832_v32 = vmul.f32 %v654_v25, %v545_v18  ;;  %9026 = vmatprep.mubr.msk.f32.mxu0 %vm11279_vm1, %v11277_v0  ;;  %v421_v8 = vld [vmem:[%s11663_s13 + $0x98] sm:$0xff]  ;;  %v554_v17 = vmax.f32 %v513_v58, 0.0  ;;  %v553_v18 = vmax.f32 %v512_v61, 0.0 }
  0xba   : > { %9271 = vmatprep.subr.mxu0 %v11277_v0  ;;  %v1002_v36 = vld [vmem:[#allocation2 + $0x1e] sm:$0xff]  ;;  %v1003_v55 = vld [vmem:[#allocation2 + $0x26] sm:$0xff]  ;;  %v1004_v9 = vld [vmem:[#allocation2 + $0x2e] sm:$0xff]  ;;  %v469_v24 = vmul.f32 %v11668_v40, %v421_v8  ;;  %v468_v25 = vmul.f32 %v11668_v40, %v420_v13 }
  0xbb   : > { %v2796_v37 = vld [vmem:[#allocation2 + $0x20] sm:$0xff]  ;;  %923 = vst.msk [vmem:[#allocation2 + $0x50] sm:$0xff] %vm867_vm0, %v833_v31  ;;  %922 = vst.msk [vmem:[#allocation2 + $0x48] sm:$0xff] %vm867_vm0, %v832_v32  ;;  %8533 = vmatmul.mubr.msk.f32.gmra.mrb[6].mxu1 %vm867_vm0, %v1002_v36  ;;  %v2798_v12 = vld [vmem:[#allocation2 + $0x30] sm:$0xff]  ;;  %v556_v32 = vmax.f32 %v515_v19, 0.0 }
  0xbc   : > { %9027 = vmatmul.mubr.msk.f32.gmra.mrb[2].mxu0 %vm867_vm0, %v2796_v37  ;;  %v669_v39 = vpop.permute.xlu1 %668  ;;  %v664_v41 = vpop.permute.xlu0 %663  ;;  %8535 = vmatprep.mubr.msk.f32.mxu1 %vm11279_vm1, %v11277_v0  ;;  %v517_v37 = vadd.f32 %v11677_v45, %v469_v24  ;;  %v516_v38 = vadd.f32 %v11677_v45, %v468_v25 }
  0xbd   : > { %9029 = vmatprep.mubr.msk.f32.mxu0 %vm11279_vm1, %v11277_v0  ;;  %v835_v47 = vmul.f32 %v669_v39, %v548_v26  ;;  %v834_v50 = vmul.f32 %v664_v41, %v547_v33  ;;  %v422_v26 = vld [vmem:[%s11663_s13 + $0xa0] sm:$0xff]  ;;  %v555_v33 = vmax.f32 %v514_v20, 0.0  ;;  %v425_v39 = vld [vmem:[%s11663_s13 + $0xb8] sm:$0xff]  ;;  %v424_v41 = vld [vmem:[%s11663_s13 + $0xb0] sm:$0xff] }
  0xbe   : > { %v1005_v27 = vld [vmem:[#allocation2 + $0x36] sm:$0xff]  ;;  %v470_v34 = vmul.f32 %v11668_v40, %v422_v26  ;;  %v2800_v43 = vld [vmem:[#allocation2 + $0x40] sm:$0xff]  ;;  %v557_v58 = vmax.f32 %v516_v38, 0.0 }
  0xbf   : > { %925 = vst.msk [vmem:[#allocation2 + $0x60] sm:$0xff] %vm867_vm0, %v835_v47  ;;  %924 = vst.msk [vmem:[#allocation2 + $0x58] sm:$0xff] %vm867_vm0, %v834_v50  ;;  %8536 = vmatmul.mubr.msk.f32.gmra.mrb[8].mxu1 %vm867_vm0, %v1003_v55  ;;  %v2799_v28 = vld [vmem:[#allocation2 + $0x38] sm:$0xff]  ;;  %v558_v55 = vmax.f32 %v517_v37, 0.0 }
  0xc0   : > { %9030 = vmatmul.mubr.msk.f32.gmra.mrb[4].mxu0 %vm867_vm0, %v2797_v42  ;;  %v679_v59 = vpop.permute.xlu1 %678  ;;  %v674_v60 = vpop.permute.xlu0 %673  ;;  %8538 = vmatprep.mubr.msk.f32.mxu1 %vm11279_vm1, %v11277_v0  ;;  %v1006_v42 = vld [vmem:[#allocation2 + $0x3e] sm:$0xff]  ;;  %v518_v50 = vadd.f32 %v11677_v45, %v470_v34 }
  0xc1   : > { %9032 = vmatprep.mubr.msk.f32.mxu0 %vm11279_vm1, %v11277_v0  ;;  %v837_v4 = vmul.f32 %v679_v59, %v550_v51  ;;  %v836_v5 = vmul.f32 %v674_v60, %v549_v52  ;;  %v473_v51 = vmul.f32 %v11668_v40, %v425_v39  ;;  %v472_v52 = vmul.f32 %v11668_v40, %v424_v41  ;;  %v427_v59 = vld [vmem:[%s11663_s13 + $0xc8] sm:$0xff] }
  0xc2   : > { %v1007_v60 = vld [vmem:[#allocation2 + $0x46] sm:$0xff]  ;;  %v2802_v19 = vld [vmem:[#allocation2 + $0x50] sm:$0xff] }
  0xc3   : > { %927 = vst.msk [vmem:[#allocation2 + $0x70] sm:$0xff] %vm867_vm0, %v837_v4  ;;  %926 = vst.msk [vmem:[#allocation2 + $0x68] sm:$0xff] %vm867_vm0, %v836_v5  ;;  %8539 = vmatmul.mubr.msk.f32.gmra.mrb[10].mxu1 %vm867_vm0, %v1004_v9  ;;  %v2801_v61 = vld [vmem:[#allocation2 + $0x48] sm:$0xff]  ;;  %v560_v5 = vmax.f32 %v519_v44, 0.0  ;;  %v520_v8 = vadd.f32 %v11677_v45, %v472_v52  ;;  %v429_v9 = vld [vmem:[%s11663_s13 + $0xd8] sm:$0xff] }
  0xc4   : > { %9033 = vmatmul.mubr.msk.f32.gmra.mrb[6].mxu0 %vm867_vm0, %v2798_v12  ;;  %v689_v14 = vpop.permute.xlu1 %688  ;;  %v684_v16 = vpop.permute.xlu0 %683  ;;  %8541 = vmatprep.mubr.msk.f32.mxu1 %vm11279_vm1, %v11277_v0  ;;  %v477_v20 = vmul.f32 %v11668_v40, %v429_v9 }
  0xc5   : > { %9035 = vmatprep.mubr.msk.f32.mxu0 %vm11279_vm1, %v11277_v0  ;;  %v839_v22 = vmul.f32 %v689_v14, %v552_v6  ;;  %v838_v23 = vmul.f32 %v684_v16, %v551_v7  ;;  %v559_v6 = vmax.f32 %v518_v50, 0.0  ;;  %v521_v7 = vadd.f32 %v11677_v45, %v473_v51  ;;  %v432_v51 = vld [vmem:[%s11663_s13 + $0xf0] sm:$0xff] }
  0xc6   : > { %v475_v14 = vmul.f32 %v11668_v40, %v427_v59  ;;  %v474_v16 = vmul.f32 %v11668_v40, %v426_v62  ;;  %v561_v24 = vmax.f32 %v520_v8, 0.0  ;;  %v525_v34 = vadd.f32 %v11677_v45, %v477_v20  ;;  %v2804_v50 = vld [vmem:[#allocation2 + $0x60] sm:$0xff] }
  0xc7   : > { %929 = vst.msk [vmem:[#allocation2 + $0x80] sm:$0xff] %vm867_vm0, %v839_v22  ;;  %928 = vst.msk [vmem:[#allocation2 + $0x78] sm:$0xff] %vm867_vm0, %v838_v23  ;;  %8542 = vmatmul.mubr.msk.f32.gmra.mrb[12].mxu1 %vm867_vm0, %v1005_v27  ;;  %v562_v23 = vmax.f32 %v521_v7, 0.0 }
  0xc8   : > { %9036 = vmatmul.mubr.msk.f32.gmra.mrb[8].mxu0 %vm867_vm0, %v2799_v28  ;;  %v699_v30 = vpop.permute.xlu1 %698  ;;  %v694_v31 = vpop.permute.xlu0 %693  ;;  %8544 = vmatprep.mubr.msk.f32.mxu1 %vm11279_vm1, %v11277_v0  ;;  %v523_v28 = vadd.f32 %v11677_v45, %v475_v14  ;;  %v522_v29 = vadd.f32 %v11677_v45, %v474_v16 }
  0xc9   : > { %9038 = vmatprep.mubr.msk.f32.mxu0 %vm11279_vm1, %v11277_v0  ;;  %v841_v35 = vmul.f32 %v699_v30, %v554_v17  ;;  %v840_v36 = vmul.f32 %v694_v31, %v553_v18  ;;  %v428_v17 = vld [vmem:[%s11663_s13 + $0xd0] sm:$0xff]  ;;  %v431_v30 = vld [vmem:[%s11663_s13 + $0xe8] sm:$0xff]  ;;  %v430_v31 = vld [vmem:[%s11663_s13 + $0xe0] sm:$0xff] }
  0xca   : > { %v1008_v18 = vld [vmem:[#allocation2 + $0x4e] sm:$0xff]  ;;  %v476_v25 = vmul.f32 %v11668_v40, %v428_v17  ;;  %v479_v38 = vmul.f32 %v11668_v40, %v431_v30  ;;  %v478_v39 = vmul.f32 %v11668_v40, %v430_v31  ;;  %v563_v44 = vmax.f32 %v522_v29, 0.0 }
  0xcb   : > { %931 = vst.msk [vmem:[#allocation2 + $0x90] sm:$0xff] %vm867_vm0, %v841_v35  ;;  %930 = vst.msk [vmem:[#allocation2 + $0x88] sm:$0xff] %vm867_vm0, %v840_v36  ;;  %8545 = vmatmul.mubr.msk.f32.gmra.mrb[14].mxu1 %vm867_vm0, %v1006_v42  ;;  %v1012_v16 = vld [vmem:[#allocation2 + $0x6e] sm:$0xff]  ;;  %v572_v30 = vmax.f32 %v11686_v48, 0.0  ;;  %v571_v31 = vmax.f32 %v11689_v49, 0.0 }
  0xcc   : > { %9039 = vmatmul.mubr.msk.f32.gmra.mrb[10].mxu0 %vm867_vm0, %v2800_v43  ;;  %v709_v46 = vpop.permute.xlu1 %708  ;;  %v704_v47 = vpop.permute.xlu0 %703  ;;  %8547 = vmatprep.mubr.msk.f32.mxu1 %vm11279_vm1, %v11277_v0  ;;  %v524_v37 = vadd.f32 %v11677_v45, %v476_v25  ;;  %v564_v43 = vmax.f32 %v523_v28, 0.0  ;;  %v526_v59 = vadd.f32 %v11677_v45, %v478_v39  ;;  %v2806_v17 = vld [vmem:[#allocation2 + $0x70] sm:$0xff] }
  0xcd   : > { %9041 = vmatprep.mubr.msk.f32.mxu0 %vm11279_vm1, %v11277_v0  ;;  %v843_v53 = vmul.f32 %v709_v46, %v556_v32  ;;  %v842_v54 = vmul.f32 %v704_v47, %v555_v33  ;;  %v1009_v32 = vld [vmem:[#allocation2 + $0x56] sm:$0xff]  ;;  %v1010_v47 = vld [vmem:[#allocation2 + $0x5e] sm:$0xff] }
  0xce   : > { %v2803_v33 = vld [vmem:[#allocation2 + $0x58] sm:$0xff] }
  0xcf   : > { %933 = vst.msk [vmem:[#allocation2 + $0xa0] sm:$0xff] %vm867_vm0, %v843_v53  ;;  %932 = vst.msk [vmem:[#allocation2 + $0x98] sm:$0xff] %vm867_vm0, %v842_v54  ;;  %8548 = vmatmul.mubr.msk.f32.gmra.mrb[16].mxu1 %vm867_vm0, %v1007_v60  ;;  %v433_v46 = vld [vmem:[%s11663_s13 + $0xf8] sm:$0xff]  ;;  %v566_v54 = vmax.f32 %v525_v34, 0.0 }
  0xd0   : > { %9042 = vmatmul.mubr.msk.f32.gmra.mrb[12].mxu0 %vm867_vm0, %v2801_v61  ;;  %v719_v63 = vpop.permute.xlu1 %718  ;;  %v714_v4 = vpop.permute.xlu0 %713  ;;  %8550 = vmatprep.mubr.msk.f32.mxu1 %vm11279_vm1, %v11277_v0  ;;  %v481_v62 = vmul.f32 %v11668_v40, %v433_v46 }
  0xd1   : > { %9044 = vmatprep.mubr.msk.f32.mxu0 %vm11279_vm1, %v11277_v0  ;;  %v845_v12 = vmul.f32 %v719_v63, %v558_v55  ;;  %v844_v13 = vmul.f32 %v714_v4, %v557_v58  ;;  %v565_v55 = vmax.f32 %v524_v37, 0.0  ;;  %v527_v58 = vadd.f32 %v11677_v45, %v479_v38  ;;  %v1011_v4 = vld [vmem:[#allocation2 + $0x66] sm:$0xff] }
  0xd2   : > { %v480_v63 = vmul.f32 %v11668_v40, %v432_v51  ;;  %v567_v40 = vmax.f32 %v526_v59, 0.0  ;;  %v573_v37 = vmax.f32 %v11705_v57, 0.0  ;;  %v1015_v38 = vld [vmem:[#allocation2 + $0x86] sm:$0xff]  ;;  %v1016_v46 = vld [vmem:[#allocation2 + $0x8e] sm:$0xff] }
  0xd3   : > { %935 = vst.msk [vmem:[#allocation2 + $0xb0] sm:$0xff] %vm867_vm0, %v845_v12  ;;  %934 = vst.msk [vmem:[#allocation2 + $0xa8] sm:$0xff] %vm867_vm0, %v844_v13  ;;  %8551 = vmatmul.mubr.msk.f32.gmra.mrb[18].mxu1 %vm867_vm0, %v1008_v18  ;;  %v568_v8 = vmax.f32 %v527_v58, 0.0  ;;  %v529_v13 = vadd.f32 %v11677_v45, %v481_v62  ;;  %v2809_v39 = vld [vmem:[#allocation2 + $0x88] sm:$0xff] }
  0xd4   : > { %9045 = vmatmul.mubr.msk.f32.gmra.mrb[14].mxu0 %vm867_vm0, %v2802_v19  ;;  %v729_v21 = vpop.permute.xlu1 %728  ;;  %v724_v22 = vpop.permute.xlu0 %723  ;;  %8553 = vmatprep.mubr.msk.f32.mxu1 %vm11279_vm1, %v11277_v0  ;;  %v528_v14 = vadd.f32 %v11677_v45, %v480_v63 }
  0xd5   : > { %9047 = vmatprep.mubr.msk.f32.mxu0 %vm11279_vm1, %v11277_v0  ;;  %v847_v26 = vmul.f32 %v729_v21, %v560_v5  ;;  %v846_v27 = vmul.f32 %v724_v22, %v559_v6  ;;  %v2805_v5 = vld [vmem:[#allocation2 + $0x68] sm:$0xff]  ;;  %v570_v21 = vmax.f32 %v529_v13, 0.0  ;;  %v3275_v13 = vld [vmem:[#allocation2 + $0x19] sm:$0xff] }
  0xd6   : > { %v569_v22 = vmax.f32 %v528_v14, 0.0  ;;  %v2812_v62 = vld [vmem:[#allocation2 + $0xa0] sm:$0xff] }
  0xd7   : > { %937 = vst.msk [vmem:[#allocation2 + $0xc0] sm:$0xff] %vm867_vm0, %v847_v26  ;;  %936 = vst.msk [vmem:[#allocation2 + $0xb8] sm:$0xff] %vm867_vm0, %v846_v27  ;;  %8554 = vmatmul.mubr.msk.f32.gmra.mrb[20].mxu1 %vm867_vm0, %v1009_v32  ;;  %v11954_v27 = vld [vmem:[#allocation3] sm:$0xff] }
  0xd8   : > { %9048 = vmatmul.mubr.msk.f32.gmra.mrb[16].mxu0 %vm867_vm0, %v2803_v33  ;;  %v739_v35 = vpop.permute.xlu1 %738  ;;  %v734_v36 = vpop.permute.xlu0 %733  ;;  %8556 = vmatprep.mubr.msk.f32.mxu1 %vm11279_vm1, %v11277_v0  ;;  %v1014_v32 = vld [vmem:[#allocation2 + $0x7e] sm:$0xff] }
  0xd9   : > { %9050 = vmatprep.mubr.msk.f32.mxu0 %vm11279_vm1, %v11277_v0  ;;  %v849_v41 = vmul.f32 %v739_v35, %v562_v23  ;;  %v848_v42 = vmul.f32 %v734_v36, %v561_v24  ;;  %v1013_v23 = vld [vmem:[#allocation2 + $0x76] sm:$0xff]  ;;  %v2808_v33 = vld [vmem:[#allocation2 + $0x80] sm:$0xff]  ;;  %v574_v36 = vmax.f32 %v11702_v56, 0.0 }
  0xda   : > { %v2807_v24 = vld [vmem:[#allocation2 + $0x78] sm:$0xff] }
  0xdb   : > { %939 = vst.msk [vmem:[#allocation2 + $0xd0] sm:$0xff] %vm867_vm0, %v849_v41  ;;  %938 = vst.msk [vmem:[#allocation2 + $0xc8] sm:$0xff] %vm867_vm0, %v848_v42  ;;  %8557 = vmatmul.mubr.msk.f32.gmra.mrb[22].mxu1 %vm867_vm0, %v1010_v47  ;;  %v2810_v47 = vld [vmem:[#allocation2 + $0x90] sm:$0xff] }
  0xdc   : > { %9051 = vmatmul.mubr.msk.f32.gmra.mrb[18].mxu0 %vm867_vm0, %v2804_v50  ;;  %v749_v52 = vpop.permute.xlu1 %748  ;;  %v744_v53 = vpop.permute.xlu0 %743  ;;  %8559 = vmatprep.mubr.msk.f32.mxu1 %vm11279_vm1, %v11277_v0 }
  0xdd   : > { %9053 = vmatprep.mubr.msk.f32.mxu0 %vm11279_vm1, %v11277_v0  ;;  %v851_v60 = vmul.f32 %v749_v52, %v564_v43  ;;  %v850_v61 = vmul.f32 %v744_v53, %v563_v44  ;;  %v576_v43 = vmax.f32 %v11718_v1, 0.0  ;;  %v575_v44 = vmax.f32 %v11721_v3, 0.0 }
  0xde   : > { %v578_v52 = vmax.f32 %v11734_v10, 0.0  ;;  %v577_v53 = vmax.f32 %v11737_v11, 0.0 }
  0xdf   : > { %941 = vst.msk [vmem:[#allocation2 + $0xe0] sm:$0xff] %vm867_vm0, %v851_v60  ;;  %940 = vst.msk [vmem:[#allocation2 + $0xd8] sm:$0xff] %vm867_vm0, %v850_v61  ;;  %8560 = vmatmul.mubr.msk.f32.gmra.mrb[24].mxu1 %vm867_vm0, %v1011_v4  ;;  %v579_v60 = vmax.f32 %v11745_v15, 0.0  ;;  %v1018_v61 = vld [vmem:[#allocation2 + $0x9e] sm:$0xff]  ;;  %v2813_v15 = vld [vmem:[#allocation2 + $0xa8] sm:$0xff] }
  0xe0   : > { %9054 = vmatmul.mubr.msk.f32.gmra.mrb[20].mxu0 %vm867_vm0, %v2805_v5  ;;  %v759_v6 = vpop.permute.xlu1 %758  ;;  %v754_v7 = vpop.permute.xlu0 %753  ;;  %8562 = vmatprep.mubr.msk.f32.mxu1 %vm11279_vm1, %v11277_v0  ;;  %v1019_v5 = vld [vmem:[#allocation2 + $0xa6] sm:$0xff] }
  0xe1   : > { %9056 = vmatprep.mubr.msk.f32.mxu0 %vm11279_vm1, %v11277_v0  ;;  %v853_v9 = vmul.f32 %v759_v6, %v566_v54  ;;  %v852_v12 = vmul.f32 %v754_v7, %v565_v55  ;;  %v1017_v54 = vld [vmem:[#allocation2 + $0x96] sm:$0xff]  ;;  %v1020_v6 = vld [vmem:[#allocation2 + $0xae] sm:$0xff] }
  0xe2   : > { %v2811_v55 = vld [vmem:[#allocation2 + $0x98] sm:$0xff]  ;;  %v2814_v7 = vld [vmem:[#allocation2 + $0xb0] sm:$0xff]  ;;  %v1023_v14 = vld [vmem:[#allocation2 + $0xc6] sm:$0xff] }
  0xe3   : > { %943 = vst.msk [vmem:[#allocation2 + $0xf0] sm:$0xff] %vm867_vm0, %v853_v9  ;;  %942 = vst.msk [vmem:[#allocation2 + $0xe8] sm:$0xff] %vm867_vm0, %v852_v12  ;;  %8563 = vmatmul.mubr.msk.f32.gmra.mrb[26].mxu1 %vm867_vm0, %v1012_v16  ;;  %v7696_v9 = vld [vmem:[%s14090_s4 + $0x18] sm:$0xf]  ;;  %v1022_v12 = vld [vmem:[#allocation2 + $0xbe] sm:$0xff] }
  0xe4   : > { %9057 = vmatmul.mubr.msk.f32.gmra.mrb[22].mxu0 %vm867_vm0, %v2806_v17  ;;  %v769_v18 = vpop.permute.xlu1 %768  ;;  %v764_v19 = vpop.permute.xlu0 %763  ;;  %8565 = vmatprep.mubr.msk.f32.mxu1 %vm11279_vm1, %v11277_v0  ;;  %v3276_v16 = vld [vmem:[#allocation2 + $0x21] sm:$0xff]  ;;  %v1024_v17 = vld [vmem:[#allocation2 + $0xce] sm:$0xff] }
  0xe5   : > { %9059 = vmatprep.mubr.msk.f32.mxu0 %vm11279_vm1, %v11277_v0  ;;  %v855_v20 = vmul.f32 %v769_v18, %v568_v8  ;;  %v854_v45 = vmul.f32 %v764_v19, %v567_v40  ;;  %v1021_v8 = vld [vmem:[#allocation2 + $0xb6] sm:$0xff]  ;;  %v12045_v18 = vld [vmem:[#allocation2 + $0x29] sm:$0xff] }
  0xe6   : > { %v2815_v40 = vld [vmem:[#allocation2 + $0xb8] sm:$0xff] }
  0xe7   : > { %945 = vst.msk [vmem:[#allocation2 + $0x100] sm:$0xff] %vm867_vm0, %v855_v20  ;;  %944 = vst.msk [vmem:[#allocation2 + $0xf8] sm:$0xff] %vm867_vm0, %v854_v45  ;;  %8566 = vmatmul.mubr.msk.f32.gmra.mrb[28].mxu1 %vm867_vm0, %v1013_v23  ;;  %v1025_v19 = vld [vmem:[#allocation2 + $0xd6] sm:$0xff]  ;;  %v1026_v45 = vld [vmem:[#allocation2 + $0xde] sm:$0xff] }
  0xe8   : > { %9060 = vmatmul.mubr.msk.f32.gmra.mrb[24].mxu0 %vm867_vm0, %v2807_v24  ;;  %v779_v25 = vpop.permute.xlu1 %778  ;;  %v774_v26 = vpop.permute.xlu0 %773  ;;  %8568 = vmatprep.mubr.msk.f32.mxu1 %vm11279_vm1, %v11954_v27  ;;  %v12054_v20 = vld [vmem:[#allocation2 + $0x31] sm:$0xff]  ;;  %v12072_v23 = vld [vmem:[#allocation2 + $0x41] sm:$0xff] }
  0xe9   : > { %9062 = vmatprep.mubr.msk.f32.mxu0 %vm11279_vm1, %v11954_v27  ;;  %v857_v28 = vmul.f32 %v779_v25, %v570_v21  ;;  %v856_v29 = vmul.f32 %v774_v26, %v569_v22  ;;  %v12063_v21 = vld [vmem:[#allocation2 + $0x39] sm:$0xff]  ;;  %v12081_v25 = vld [vmem:[#allocation2 + $0x49] sm:$0xff] }
  0xea   : > { %v1027_v22 = vld [vmem:[#allocation2 + $0xe6] sm:$0xff]  ;;  %v1028_v24 = vld [vmem:[#allocation2 + $0xee] sm:$0xff] }
  0xeb   : > { %947 = vst.msk [vmem:[#allocation2 + $0x110] sm:$0xff] %vm867_vm0, %v857_v28  ;;  %946 = vst.msk [vmem:[#allocation2 + $0x108] sm:$0xff] %vm867_vm0, %v856_v29  ;;  %8569 = vmatmul.mubr.msk.f32.gmra.mrb[30].mxu1 %vm867_vm0, %v1014_v32  ;;  %v12090_v28 = vld [vmem:[#allocation2 + $0x51] sm:$0xff]  ;;  %v12108_v32 = vld [vmem:[#allocation2 + $0x61] sm:$0xff] }
  0xec   : > { %9063 = vmatmul.mubr.msk.f32.gmra.mrb[26].mxu0 %vm867_vm0, %v2808_v33  ;;  %v789_v34 = vpop.permute.xlu1 %788  ;;  %v784_v35 = vpop.permute.xlu0 %783  ;;  %8571 = vmatprep.mubr.msk.f32.mxu1 %vm11279_vm1, %v11954_v27 }
  0xed   : > { %9065 = vmatprep.mubr.msk.f32.mxu0 %vm11279_vm1, %v11954_v27  ;;  %v859_v48 = vmul.f32 %v789_v34, %v572_v30  ;;  %v858_v49 = vmul.f32 %v784_v35, %v571_v31  ;;  %v12099_v30 = vld [vmem:[#allocation2 + $0x59] sm:$0xff]  ;;  %v12117_v34 = vld [vmem:[#allocation2 + $0x69] sm:$0xff] }
  0xee   : > { %v1029_v26 = vld [vmem:[#allocation2 + $0xf6] sm:$0xff]  ;;  %v1030_v29 = vld [vmem:[#allocation2 + $0xfe] sm:$0xff] }
  0xef   : > { %949 = vst.msk [vmem:[#allocation2 + $0x120] sm:$0xff] %vm867_vm0, %v859_v48  ;;  %948 = vst.msk [vmem:[#allocation2 + $0x118] sm:$0xff] %vm867_vm0, %v858_v49  ;;  %8572 = vmatmul.mubr.msk.f32.gmra.mrb[32].mxu1 %vm867_vm0, %v1015_v38  ;;  %v12126_v48 = vld [vmem:[#allocation2 + $0x71] sm:$0xff]  ;;  %v12144_v38 = vld [vmem:[#allocation2 + $0x81] sm:$0xff] }
  0xf0   : > { %9066 = vmatmul.mubr.msk.f32.gmra.mrb[28].mxu0 %vm867_vm0, %v2809_v39  ;;  %v799_v41 = vpop.permute.xlu1 %798  ;;  %v794_v42 = vpop.permute.xlu0 %793  ;;  %8574 = vmatprep.mubr.msk.f32.mxu1 %vm11279_vm1, %v11954_v27 }
  0xf1   : > { %9068 = vmatprep.mubr.msk.f32.mxu0 %vm11279_vm1, %v11954_v27  ;;  %v861_v56 = vmul.f32 %v799_v41, %v574_v36  ;;  %v860_v57 = vmul.f32 %v794_v42, %v573_v37  ;;  %v12135_v36 = vld [vmem:[#allocation2 + $0x79] sm:$0xff]  ;;  %v12153_v41 = vld [vmem:[#allocation2 + $0x89] sm:$0xff] }
  0xf2   : > { %v1031_v31 = vld [vmem:[#allocation2 + $0x106] sm:$0xff]  ;;  %v1032_v33 = vld [vmem:[#allocation2 + $0x10e] sm:$0xff] }
  0xf3   : > { %951 = vst.msk [vmem:[#allocation2 + $0x130] sm:$0xff] %vm867_vm0, %v861_v56  ;;  %950 = vst.msk [vmem:[#allocation2 + $0x128] sm:$0xff] %vm867_vm0, %v860_v57  ;;  %8575 = vmatmul.mubr.msk.f32.gmra.mrb[34].mxu1 %vm867_vm0, %v1016_v46  ;;  %v12162_v56 = vld [vmem:[#allocation2 + $0x91] sm:$0xff]  ;;  %v12180_v46 = vld [vmem:[#allocation2 + $0xa1] sm:$0xff] }
  0xf4   : > { %9069 = vmatmul.mubr.msk.f32.gmra.mrb[30].mxu0 %vm867_vm0, %v2810_v47  ;;  %v809_v50 = vpop.permute.xlu1 %808  ;;  %v804_v51 = vpop.permute.xlu0 %803  ;;  %8577 = vmatprep.mubr.msk.f32.mxu1 %vm11279_vm1, %v11954_v27  ;;  %v957_v47 = vld [vmem:[#allocation2 + $0x5] sm:$0xff] }
  0xf5   : > { %9071 = vmatprep.mubr.msk.f32.mxu0 %vm11279_vm1, %v11954_v27  ;;  %v863_v1 = vmul.f32 %v809_v50, %v576_v43  ;;  %v862_v3 = vmul.f32 %v804_v51, %v575_v44  ;;  %v12171_v43 = vld [vmem:[#allocation2 + $0x99] sm:$0xff]  ;;  %v12189_v50 = vld [vmem:[#allocation2 + $0xa9] sm:$0xff] }
  0xf6   : > { %v1033_v35 = vld [vmem:[#allocation2 + $0x116] sm:$0xff]  ;;  %v1034_v49 = vld [vmem:[#allocation2 + $0x11e] sm:$0xff]  ;;  %v7524_v51 = vld [vmem:[%s14090_s4 + $0x8] sm:$0xf] }
  0xf7   : > { %953 = vst.msk [vmem:[#allocation2 + $0x140] sm:$0xff] %vm867_vm0, %v863_v1  ;;  %952 = vst.msk [vmem:[#allocation2 + $0x138] sm:$0xff] %vm867_vm0, %v862_v3  ;;  %8578 = vmatmul.mubr.msk.f32.gmra.mrb[36].mxu1 %vm867_vm0, %v1017_v54  ;;  %v958_v1 = vld [vmem:[#allocation2 + $0xd] sm:$0xff]  ;;  %v960_v54 = vld [vmem:[#allocation2 + $0x1d] sm:$0xff] }
  0xf8   : > { %9072 = vmatmul.mubr.msk.f32.gmra.mrb[32].mxu0 %vm867_vm0, %v2811_v55  ;;  %v819_v58 = vpop.permute.xlu1 %818  ;;  %v814_v59 = vpop.permute.xlu0 %813  ;;  %8580 = vmatprep.mubr.msk.f32.mxu1 %vm11279_vm1, %v11954_v27  ;;  %v12202_v3 = vld [vmem:[#allocation2 + $0xb1] sm:$0xff]  ;;  %v12221_v55 = vld [vmem:[#allocation2 + $0xc1] sm:$0xff] }
  0xf9   : > { %9074 = vmatprep.mubr.msk.f32.mxu0 %vm11279_vm1, %v11954_v27  ;;  %v865_v10 = vmul.f32 %v819_v58, %v578_v52  ;;  %v864_v11 = vmul.f32 %v814_v59, %v577_v53  ;;  %v959_v52 = vld [vmem:[#allocation2 + $0x15] sm:$0xff]  ;;  %v961_v58 = vld [vmem:[#allocation2 + $0x25] sm:$0xff] }
  0xfa   : > { %v1035_v37 = vld [vmem:[#allocation2 + $0x126] sm:$0xff]  ;;  %v1036_v39 = vld [vmem:[#allocation2 + $0x12e] sm:$0xff]  ;;  %v12212_v53 = vld [vmem:[#allocation2 + $0xb9] sm:$0xff] }
  0xfb   : > { %955 = vst.msk [vmem:[#allocation2 + $0x150] sm:$0xff] %vm867_vm0, %v865_v10  ;;  %954 = vst.msk [vmem:[#allocation2 + $0x148] sm:$0xff] %vm867_vm0, %v864_v11  ;;  %8581 = vmatmul.mubr.msk.f32.gmra.mrb[38].mxu1 %vm867_vm0, %v1018_v61  ;;  %v12230_v59 = vld [vmem:[#allocation2 + $0xc9] sm:$0xff]  ;;  %v12239_v11 = vld [vmem:[#allocation2 + $0xd1] sm:$0xff] }
  0xfc   : > { %9075 = vmatmul.mubr.msk.f32.gmra.mrb[34].mxu0 %vm867_vm0, %v2812_v62  ;;  %v824_v63 = vpop.permute.xlu0 %823  ;;  %8583 = vmatprep.mubr.msk.f32.mxu1 %vm11279_vm1, %v11954_v27  ;;  %v962_v10 = vld [vmem:[#allocation2 + $0x2d] sm:$0xff]  ;;  %v12248_v61 = vld [vmem:[#allocation2 + $0xd9] sm:$0xff] }
  0xfd   : > { %9077 = vmatprep.mubr.msk.f32.mxu0 %vm11279_vm1, %v11954_v27  ;;  %v866_v4 = vmul.f32 %v824_v63, %v579_v60  ;;  %v963_v60 = vld [vmem:[#allocation2 + $0x35] sm:$0xff]  ;;  %v964_v62 = vld [vmem:[#allocation2 + $0x3d] sm:$0xff] }
  0xfe   : > { %v1037_v42 = vld [vmem:[#allocation2 + $0x136] sm:$0xff]  ;;  %v1038_v57 = vld [vmem:[#allocation2 + $0x13e] sm:$0xff] }
  0xff   : > { %956 = vst.msk [vmem:[#allocation2 + $0x158] sm:$0xf] %vm914_vm3, %v866_v4  ;;  %8584 = vmatmul.mubr.msk.f32.gmra.mrb[40].mxu1 %vm867_vm0, %v1019_v5  ;;  %v12257_v63 = vld [vmem:[#allocation2 + $0xe1] sm:$0xff]  ;;  %v12266_v5 = vld [vmem:[#allocation2 + $0xe9] sm:$0xff] }
 0x100   : > { %9078 = vmatmul.mubr.msk.f32.gmra.mrb[36].mxu0 %vm867_vm0, %v2813_v15  ;;  %8586 = vmatprep.mubr.msk.f32.mxu1 %vm11279_vm1, %v11954_v27  ;;  %v965_v4 = vld [vmem:[#allocation2 + $0x45] sm:$0xff]  ;;  %v966_v15 = vld [vmem:[#allocation2 + $0x4d] sm:$0xff] }
 0x101   : > { %9080 = vmatprep.mubr.msk.f32.mxu0 %vm11279_vm1, %v11954_v27 }
 0x102   : > { %v1039_v44 = vld [vmem:[#allocation2 + $0x146] sm:$0xf] }
 0x103   : > { %8587 = vmatmul.mubr.msk.f32.gmra.mrb[42].mxu1 %vm867_vm0, %v1020_v6  ;;  %v12275_v6 = vld [vmem:[#allocation2 + $0xf1] sm:$0xff] }
 0x104   : > { %9081 = vmatmul.mubr.msk.f32.gmra.mrb[38].mxu0 %vm867_vm0, %v2814_v7  ;;  %8589 = vmatprep.mubr.msk.f32.mxu1 %vm11279_vm1, %v11954_v27  ;;  %v967_v7 = vld [vmem:[#allocation2 + $0x55] sm:$0xff] }
 0x105   : > { %9083 = vmatprep.mubr.msk.f32.mxu0 %vm11279_vm1, %v11954_v27 }
 0x107   : > { %8590 = vmatmul.mubr.msk.f32.gmra.mrb[44].mxu1 %vm867_vm0, %v1021_v8  ;;  %v12284_v8 = vld [vmem:[#allocation2 + $0xf9] sm:$0xff] }
 0x108   : > { %9084 = vmatmul.mubr.msk.f32.gmra.mrb[40].mxu0 %vm867_vm0, %v2815_v40  ;;  %8592 = vmatprep.mubr.msk.f32.mxu1 %vm11279_vm1, %v11954_v27  ;;  %v968_v40 = vld [vmem:[#allocation2 + $0x5d] sm:$0xff] }
 0x109   : > { %9148 = vmatprep.mubr.msk.f32.mxu0 %vm11279_vm1, %v11954_v27 }
 0x10b   : > { %8593 = vmatmul.mubr.msk.f32.gmra.mrb[46].mxu1 %vm867_vm0, %v1022_v12  ;;  %v969_v12 = vld [vmem:[#allocation2 + $0x65] sm:$0xff] }
 0x10c   : > { %9149 = vmatmul.mubr.msk.f32.vlgmr.msra.gmra.mrb[0].mxu0 %vm867_vm0, %v3275_v13  ;;  %8595 = vmatprep.mubr.msk.f32.mxu1 %vm11279_vm1, %v11954_v27  ;;  %v12302_v13 = vld [vmem:[#allocation2 + $0x109] sm:$0xff] }
 0x10d   : > { %9272 = vmatpush3.msk.msra.mxu0 %vm1165_vm2, %v7696_v9  ;;  %9151 = vmatprep.mubr.msk.f32.mxu0 %vm11279_vm1, %v11954_v27  ;;  %v12293_v9 = vld [vmem:[#allocation2 + $0x101] sm:$0xff] }
 0x10e   : > { %9396 = vmatprep.subr.mxu0 %v11954_v27 }
 0x10f   : > { %8596 = vmatmul.mubr.msk.f32.gmra.mrb[48].mxu1 %vm867_vm0, %v1023_v14  ;;  %v970_v14 = vld [vmem:[#allocation2 + $0x6d] sm:$0xff] }
 0x110   : > { %9152 = vmatmul.mubr.msk.f32.gmra.mrb[2].mxu0 %vm867_vm0, %v3276_v16  ;;  %8598 = vmatprep.mubr.msk.f32.mxu1 %vm11279_vm1, %v11954_v27  ;;  %v12311_v16 = vld [vmem:[#allocation2 + $0x111] sm:$0xff] }
 0x111   : > { %9154 = vmatprep.mubr.msk.f32.mxu0 %vm11279_vm1, %v11954_v27 }
 0x113   : > { %8599 = vmatmul.mubr.msk.f32.gmra.mrb[50].mxu1 %vm867_vm0, %v1024_v17  ;;  %v971_v17 = vld [vmem:[#allocation2 + $0x75] sm:$0xff] }
 0x114   : > { %9155 = vmatmul.mubr.msk.f32.gmra.mrb[4].mxu0 %vm867_vm0, %v12045_v18  ;;  %8601 = vmatprep.mubr.msk.f32.mxu1 %vm11279_vm1, %v11954_v27 }
 0x115   : > { %9157 = vmatprep.mubr.msk.f32.mxu0 %vm11279_vm1, %v11954_v27 }
 0x117   : > { %8602 = vmatmul.mubr.msk.f32.gmra.mrb[52].mxu1 %vm867_vm0, %v1025_v19  ;;  %v12320_v19 = vld [vmem:[#allocation2 + $0x119] sm:$0xff] }
 0x118   : > { %9158 = vmatmul.mubr.msk.f32.gmra.mrb[6].mxu0 %vm867_vm0, %v12054_v20  ;;  %8604 = vmatprep.mubr.msk.f32.mxu1 %vm11279_vm1, %v11954_v27 }
 0x119   : > { %9160 = vmatprep.mubr.msk.f32.mxu0 %vm11279_vm1, %v11954_v27 }
 0x11b   : > { %8605 = vmatmul.mubr.msk.f32.gmra.mrb[54].mxu1 %vm867_vm0, %v1026_v45  ;;  %v972_v45 = vld [vmem:[#allocation2 + $0x7d] sm:$0xff] }
 0x11c   : > { %9161 = vmatmul.mubr.msk.f32.gmra.mrb[8].mxu0 %vm867_vm0, %v12063_v21  ;;  %8607 = vmatprep.mubr.msk.f32.mxu1 %vm11279_vm1, %v11954_v27 }
 0x11d   : > { %9163 = vmatprep.mubr.msk.f32.mxu0 %vm11279_vm1, %v11954_v27 }
 0x11f   : > { %8608 = vmatmul.mubr.msk.f32.gmra.mrb[56].mxu1 %vm867_vm0, %v1027_v22  ;;  %v12329_v22 = vld [vmem:[#allocation2 + $0x121] sm:$0xff] }
 0x120   : > { %9164 = vmatmul.mubr.msk.f32.gmra.mrb[10].mxu0 %vm867_vm0, %v12072_v23  ;;  %8610 = vmatprep.mubr.msk.f32.mxu1 %vm11279_vm1, %v11954_v27 }
 0x121   : > { %9166 = vmatprep.mubr.msk.f32.mxu0 %vm11279_vm1, %v11954_v27 }
 0x123   : > { %8611 = vmatmul.mubr.msk.f32.gmra.mrb[58].mxu1 %vm867_vm0, %v1028_v24  ;;  %v973_v24 = vld [vmem:[#allocation2 + $0x85] sm:$0xff] }
 0x124   : > { %9167 = vmatmul.mubr.msk.f32.gmra.mrb[12].mxu0 %vm867_vm0, %v12081_v25  ;;  %8613 = vmatprep.mubr.msk.f32.mxu1 %vm11279_vm1, %v11954_v27 }
 0x125   : > { %9169 = vmatprep.mubr.msk.f32.mxu0 %vm11279_vm1, %v11954_v27 }
 0x127   : > { %8614 = vmatmul.mubr.msk.f32.gmra.mrb[60].mxu1 %vm867_vm0, %v1029_v26  ;;  %v12338_v26 = vld [vmem:[#allocation2 + $0x129] sm:$0xff] }
 0x128   : > { %9170 = vmatmul.mubr.msk.f32.gmra.mrb[14].mxu0 %vm867_vm0, %v12090_v28  ;;  %8616 = vmatprep.mubr.msk.f32.mxu1 %vm11279_vm1, %v11954_v27 }
 0x129   : > { %9172 = vmatprep.mubr.msk.f32.mxu0 %vm11279_vm1, %v11954_v27 }
 0x12b   : > { %8617 = vmatmul.mubr.msk.f32.gmra.mrb[62].mxu1 %vm867_vm0, %v1030_v29  ;;  %v974_v29 = vld [vmem:[#allocation2 + $0x8d] sm:$0xff] }
 0x12c   : > { %9173 = vmatmul.mubr.msk.f32.gmra.mrb[16].mxu0 %vm867_vm0, %v12099_v30  ;;  %8619 = vmatprep.mubr.msk.f32.mxu1 %vm11279_vm1, %v11954_v27 }
 0x12d   : > { %9175 = vmatprep.mubr.msk.f32.mxu0 %vm11279_vm1, %v11954_v27 }
 0x12f   : > { %8620 = vmatmul.mubr.msk.f32.gmra.mrb[64].mxu1 %vm867_vm0, %v1031_v31  ;;  %v12347_v31 = vld [vmem:[#allocation2 + $0x131] sm:$0xff] }
 0x130   : > { %9176 = vmatmul.mubr.msk.f32.gmra.mrb[18].mxu0 %vm867_vm0, %v12108_v32  ;;  %8622 = vmatprep.mubr.msk.f32.mxu1 %vm11279_vm1, %v11954_v27 }
 0x131   : > { %9178 = vmatprep.mubr.msk.f32.mxu0 %vm11279_vm1, %v11954_v27 }
 0x133   : > { %8623 = vmatmul.mubr.msk.f32.gmra.mrb[66].mxu1 %vm867_vm0, %v1032_v33  ;;  %v975_v33 = vld [vmem:[#allocation2 + $0x95] sm:$0xff] }
 0x134   : > { %9179 = vmatmul.mubr.msk.f32.gmra.mrb[20].mxu0 %vm867_vm0, %v12117_v34  ;;  %8625 = vmatprep.mubr.msk.f32.mxu1 %vm11279_vm1, %v11954_v27 }
 0x135   : > { %9181 = vmatprep.mubr.msk.f32.mxu0 %vm11279_vm1, %v11954_v27 }
 0x137   : > { %8626 = vmatmul.mubr.msk.f32.gmra.mrb[68].mxu1 %vm867_vm0, %v1033_v35  ;;  %v12356_v35 = vld [vmem:[#allocation2 + $0x139] sm:$0xff] }
 0x138   : > { %9182 = vmatmul.mubr.msk.f32.gmra.mrb[22].mxu0 %vm867_vm0, %v12126_v48  ;;  %8628 = vmatprep.mubr.msk.f32.mxu1 %vm11279_vm1, %v11954_v27 }
 0x139   : > { %9184 = vmatprep.mubr.msk.f32.mxu0 %vm11279_vm1, %v11954_v27 }
 0x13b   : > { %8629 = vmatmul.mubr.msk.f32.gmra.mrb[70].mxu1 %vm867_vm0, %v1034_v49  ;;  %v976_v49 = vld [vmem:[#allocation2 + $0x9d] sm:$0xff] }
 0x13c   : > { %9185 = vmatmul.mubr.msk.f32.gmra.mrb[24].mxu0 %vm867_vm0, %v12135_v36  ;;  %8631 = vmatprep.mubr.msk.f32.mxu1 %vm11279_vm1, %v11954_v27 }
 0x13d   : > { %9187 = vmatprep.mubr.msk.f32.mxu0 %vm11279_vm1, %v11954_v27 }
 0x13f   : > { %8632 = vmatmul.mubr.msk.f32.gmra.mrb[72].mxu1 %vm867_vm0, %v1035_v37  ;;  %v12365_v37 = vld [vmem:[#allocation2 + $0x141] sm:$0xff] }
 0x140   : > { %9188 = vmatmul.mubr.msk.f32.gmra.mrb[26].mxu0 %vm867_vm0, %v12144_v38  ;;  %8634 = vmatprep.mubr.msk.f32.mxu1 %vm11279_vm1, %v11954_v27 }
 0x141   : > { %9190 = vmatprep.mubr.msk.f32.mxu0 %vm11279_vm1, %v11954_v27 }
 0x143   : > { %8635 = vmatmul.mubr.msk.f32.gmra.mrb[74].mxu1 %vm867_vm0, %v1036_v39  ;;  %v977_v39 = vld [vmem:[#allocation2 + $0xa5] sm:$0xff] }
 0x144   : > { %9191 = vmatmul.mubr.msk.f32.gmra.mrb[28].mxu0 %vm867_vm0, %v12153_v41  ;;  %8637 = vmatprep.mubr.msk.f32.mxu1 %vm11279_vm1, %v11954_v27 }
 0x145   : > { %9193 = vmatprep.mubr.msk.f32.mxu0 %vm11279_vm1, %v11954_v27 }
 0x147   : > { %8638 = vmatmul.mubr.msk.f32.gmra.mrb[76].mxu1 %vm867_vm0, %v1037_v42  ;;  %v12374_v42 = vld [vmem:[#allocation2 + $0x149] sm:$0xff] }
 0x148   : > { %9194 = vmatmul.mubr.msk.f32.gmra.mrb[30].mxu0 %vm867_vm0, %v12162_v56  ;;  %8640 = vmatprep.mubr.msk.f32.mxu1 %vm11279_vm1, %v11954_v27 }
 0x149   : > { %9196 = vmatprep.mubr.msk.f32.mxu0 %vm11279_vm1, %v11954_v27 }
 0x14b   : > { %8641 = vmatmul.mubr.msk.f32.gmra.mrb[78].mxu1 %vm867_vm0, %v1038_v57  ;;  %v978_v57 = vld [vmem:[#allocation2 + $0xad] sm:$0xff] }
 0x14c   : > { %9197 = vmatmul.mubr.msk.f32.gmra.mrb[32].mxu0 %vm867_vm0, %v12171_v43  ;;  %8643 = vmatprep.mubr.msk.f32.mxu1 %vm11279_vm1, %v11954_v27 }
 0x14d   : > { %9199 = vmatprep.mubr.msk.f32.mxu0 %vm11279_vm1, %v11954_v27 }
 0x14f   : > { %8644 = vmatmul.mubr.msk.f32.gmra.mrb[80].mxu1 %vm867_vm0, %v1039_v44  ;;  %v12383_v44 = vld [vmem:[#allocation2 + $0x151] sm:$0xff] }
 0x150   : > { %9200 = vmatmul.mubr.msk.f32.gmra.mrb[34].mxu0 %vm867_vm0, %v12180_v46  ;;  %8648 = vmatprep.mubr.msk.f32.mxu1 %vm11279_vm1, %v11954_v27 }
 0x151   : > { %9202 = vmatprep.mubr.msk.f32.mxu0 %vm11279_vm1, %v11954_v27 }
 0x153   : > { %8649 = vmatmul.mubr.msk.f32.vlgmr.msra.gmra.mrb[0].mxu1 %vm867_vm0, %v957_v47  ;;  %v979_v47 = vld [vmem:[#allocation2 + $0xb5] sm:$0xff] }
 0x154   : > { %9203 = vmatmul.mubr.msk.f32.gmra.mrb[36].mxu0 %vm867_vm0, %v12189_v50  ;;  %8651 = vmatprep.mubr.msk.f32.mxu1 %vm11279_vm1, %v11954_v27 }
 0x155   : > { %9205 = vmatprep.mubr.msk.f32.mxu0 %vm11279_vm1, %v11954_v27  ;;  %8772 = vmatpush3.msk.msra.mxu1 %vm1165_vm2, %v7524_v51  ;;  %v3315_v51 = vld [vmem:[#allocation2 + $0x159] sm:$0xf] }
 0x156   : > { %8896 = vmatprep.subr.mxu1 %v11954_v27 }
 0x157   : > { %8652 = vmatmul.mubr.msk.f32.gmra.mrb[2].mxu1 %vm867_vm0, %v958_v1  ;;  %v7739_v1 = vld [vmem:[%s14090_s4 + $0x1c] sm:$0xf] }
 0x158   : > { %9206 = vmatmul.mubr.msk.f32.gmra.mrb[38].mxu0 %vm867_vm0, %v12202_v3  ;;  %8654 = vmatprep.mubr.msk.f32.mxu1 %vm11279_vm1, %v11954_v27 }
 0x159   : > { %9208 = vmatprep.mubr.msk.f32.mxu0 %vm11279_vm1, %v11954_v27 }
 0x15b   : > { %8655 = vmatmul.mubr.msk.f32.gmra.mrb[4].mxu1 %vm867_vm0, %v959_v52  ;;  %v980_v52 = vld [vmem:[#allocation2 + $0xbd] sm:$0xff] }
 0x15c   : > { %9209 = vmatmul.mubr.msk.f32.gmra.mrb[40].mxu0 %vm867_vm0, %v12212_v53  ;;  %8657 = vmatprep.mubr.msk.f32.mxu1 %vm11279_vm1, %v11954_v27 }
 0x15d   : > { %9211 = vmatprep.mubr.msk.f32.mxu0 %vm11279_vm1, %v11954_v27 }
 0x15f   : > { %8658 = vmatmul.mubr.msk.f32.gmra.mrb[6].mxu1 %vm867_vm0, %v960_v54  ;;  %v981_v54 = vld [vmem:[#allocation2 + $0xc5] sm:$0xff] }
 0x160   : > { %9212 = vmatmul.mubr.msk.f32.gmra.mrb[42].mxu0 %vm867_vm0, %v12221_v55  ;;  %8660 = vmatprep.mubr.msk.f32.mxu1 %vm11279_vm1, %v11954_v27 }
 0x161   : > { %9214 = vmatprep.mubr.msk.f32.mxu0 %vm11279_vm1, %v11954_v27 }
 0x163   : > { %8661 = vmatmul.mubr.msk.f32.gmra.mrb[8].mxu1 %vm867_vm0, %v961_v58  ;;  %v983_v58 = vld [vmem:[#allocation2 + $0xd5] sm:$0xff] }
 0x164   : > { %9215 = vmatmul.mubr.msk.f32.gmra.mrb[44].mxu0 %vm867_vm0, %v12230_v59  ;;  %8663 = vmatprep.mubr.msk.f32.mxu1 %vm11279_vm1, %v11954_v27 }
 0x165   : > { %9217 = vmatprep.mubr.msk.f32.mxu0 %vm11279_vm1, %v11954_v27 }
 0x167   : > { %8664 = vmatmul.mubr.msk.f32.gmra.mrb[10].mxu1 %vm867_vm0, %v962_v10  ;;  %v12578_v10 = vld [vmem:[#allocation2 + $0x2f] sm:$0xff] }
 0x168   : > { %9218 = vmatmul.mubr.msk.f32.gmra.mrb[46].mxu0 %vm867_vm0, %v12239_v11  ;;  %8666 = vmatprep.mubr.msk.f32.mxu1 %vm11279_vm1, %v11954_v27 }
 0x169   : > { %9220 = vmatprep.mubr.msk.f32.mxu0 %vm11279_vm1, %v11954_v27 }
 0x16b   : > { %8667 = vmatmul.mubr.msk.f32.gmra.mrb[12].mxu1 %vm867_vm0, %v963_v60  ;;  %v12598_v60 = vld [vmem:[#allocation2 + $0x3f] sm:$0xff] }
 0x16c   : > { %9221 = vmatmul.mubr.msk.f32.gmra.mrb[48].mxu0 %vm867_vm0, %v12248_v61  ;;  %8669 = vmatprep.mubr.msk.f32.mxu1 %vm11279_vm1, %v11954_v27 }
 0x16d   : > { %9223 = vmatprep.mubr.msk.f32.mxu0 %vm11279_vm1, %v11954_v27 }
 0x16f   : > { %8670 = vmatmul.mubr.msk.f32.gmra.mrb[14].mxu1 %vm867_vm0, %v964_v62  ;;  %v12618_v62 = vld [vmem:[#allocation2 + $0x4f] sm:$0xff] }
 0x170   : > { %9224 = vmatmul.mubr.msk.f32.gmra.mrb[50].mxu0 %vm867_vm0, %v12257_v63  ;;  %8672 = vmatprep.mubr.msk.f32.mxu1 %vm11279_vm1, %v11954_v27 }
 0x171   : > { %9226 = vmatprep.mubr.msk.f32.mxu0 %vm11279_vm1, %v11954_v27 }
 0x173   : > { %8673 = vmatmul.mubr.msk.f32.gmra.mrb[16].mxu1 %vm867_vm0, %v965_v4  ;;  %v12638_v4 = vld [vmem:[#allocation2 + $0x5f] sm:$0xff] }
 0x174   : > { %9227 = vmatmul.mubr.msk.f32.gmra.mrb[52].mxu0 %vm867_vm0, %v12266_v5  ;;  %8675 = vmatprep.mubr.msk.f32.mxu1 %vm11279_vm1, %v11954_v27 }
 0x175   : > { %9229 = vmatprep.mubr.msk.f32.mxu0 %vm11279_vm1, %v11954_v27 }
 0x177   : > { %8676 = vmatmul.mubr.msk.f32.gmra.mrb[18].mxu1 %vm867_vm0, %v966_v15  ;;  %v12658_v15 = vld [vmem:[#allocation2 + $0x6f] sm:$0xff] }
 0x178   : > { %9230 = vmatmul.mubr.msk.f32.gmra.mrb[54].mxu0 %vm867_vm0, %v12275_v6  ;;  %8678 = vmatprep.mubr.msk.f32.mxu1 %vm11279_vm1, %v11954_v27 }
 0x179   : > { %9232 = vmatprep.mubr.msk.f32.mxu0 %vm11279_vm1, %v11954_v27 }
 0x17b   : > { %8679 = vmatmul.mubr.msk.f32.gmra.mrb[20].mxu1 %vm867_vm0, %v967_v7  ;;  %v12676_v7 = vld [vmem:[#allocation3] sm:$0xff] }
 0x17c   : > { %9233 = vmatmul.mubr.msk.f32.gmra.mrb[56].mxu0 %vm867_vm0, %v12284_v8  ;;  %8681 = vmatprep.mubr.msk.f32.mxu1 %vm11279_vm1, %v11954_v27 }
 0x17d   : > { %9235 = vmatprep.mubr.msk.f32.mxu0 %vm11279_vm1, %v11954_v27 }
 0x17f   : > { %8682 = vmatmul.mubr.msk.f32.gmra.mrb[22].mxu1 %vm867_vm0, %v968_v40  ;;  %v12700_v40 = vld [vmem:[#allocation2 + $0x8f] sm:$0xff] }
 0x180   : > { %9236 = vmatmul.mubr.msk.f32.gmra.mrb[58].mxu0 %vm867_vm0, %v12293_v9  ;;  %8684 = vmatprep.mubr.msk.f32.mxu1 %vm11279_vm1, %v11954_v27 }
 0x181   : > { %9238 = vmatprep.mubr.msk.f32.mxu0 %vm11279_vm1, %v11954_v27 }
 0x183   : > { %8685 = vmatmul.mubr.msk.f32.gmra.mrb[24].mxu1 %vm867_vm0, %v969_v12  ;;  %v12720_v12 = vld [vmem:[#allocation2 + $0x9f] sm:$0xff] }
 0x184   : > { %9239 = vmatmul.mubr.msk.f32.gmra.mrb[60].mxu0 %vm867_vm0, %v12302_v13  ;;  %8687 = vmatprep.mubr.msk.f32.mxu1 %vm11279_vm1, %v11954_v27 }
 0x185   : > { %9241 = vmatprep.mubr.msk.f32.mxu0 %vm11279_vm1, %v11954_v27 }
 0x187   : > { %8688 = vmatmul.mubr.msk.f32.gmra.mrb[26].mxu1 %vm867_vm0, %v970_v14  ;;  %v3793_v14 = vld [vmem:[#allocation2 + $0x159] sm:$0xff] }
 0x188   : > { %9242 = vmatmul.mubr.msk.f32.gmra.mrb[62].mxu0 %vm867_vm0, %v12311_v16  ;;  %8690 = vmatprep.mubr.msk.f32.mxu1 %vm11279_vm1, %v11954_v27 }
 0x189   : > { %9244 = vmatprep.mubr.msk.f32.mxu0 %vm11279_vm1, %v11954_v27 }
 0x18b   : > { %8691 = vmatmul.mubr.msk.f32.gmra.mrb[28].mxu1 %vm867_vm0, %v971_v17  ;;  %v12739_v17 = vld [vmem:[#allocation2 + $0xaf] sm:$0xff] }
 0x18c   : > { %9245 = vmatmul.mubr.msk.f32.gmra.mrb[64].mxu0 %vm867_vm0, %v12320_v19  ;;  %8693 = vmatprep.mubr.msk.f32.mxu1 %vm11279_vm1, %v11954_v27 }
 0x18d   : > { %9247 = vmatprep.mubr.msk.f32.mxu0 %vm11279_vm1, %v11954_v27 }
 0x18f   : > { %8694 = vmatmul.mubr.msk.f32.gmra.mrb[30].mxu1 %vm867_vm0, %v972_v45  ;;  %v12748_v45 = vld [vmem:[#allocation2 + $0xb7] sm:$0xff] }
 0x190   : > { %9248 = vmatmul.mubr.msk.f32.gmra.mrb[66].mxu0 %vm867_vm0, %v12329_v22  ;;  %8696 = vmatprep.mubr.msk.f32.mxu1 %vm11279_vm1, %v11954_v27 }
 0x191   : > { %9250 = vmatprep.mubr.msk.f32.mxu0 %vm11279_vm1, %v11954_v27 }
 0x193   : > { %8697 = vmatmul.mubr.msk.f32.gmra.mrb[32].mxu1 %vm867_vm0, %v973_v24  ;;  %v12760_v24 = vld [vmem:[#allocation2 + $0xbf] sm:$0xff] }
 0x194   : > { %9251 = vmatmul.mubr.msk.f32.gmra.mrb[68].mxu0 %vm867_vm0, %v12338_v26  ;;  %8699 = vmatprep.mubr.msk.f32.mxu1 %vm11279_vm1, %v11954_v27 }
 0x195   : > { %9253 = vmatprep.mubr.msk.f32.mxu0 %vm11279_vm1, %v11954_v27 }
 0x197   : > { %8700 = vmatmul.mubr.msk.f32.gmra.mrb[34].mxu1 %vm867_vm0, %v974_v29  ;;  %v12770_v29 = vld [vmem:[#allocation2 + $0xc7] sm:$0xff] }
 0x198   : > { %9254 = vmatmul.mubr.msk.f32.gmra.mrb[70].mxu0 %vm867_vm0, %v12347_v31  ;;  %8702 = vmatprep.mubr.msk.f32.mxu1 %vm11279_vm1, %v11954_v27 }
 0x199   : > { %9256 = vmatprep.mubr.msk.f32.mxu0 %vm11279_vm1, %v11954_v27 }
 0x19b   : > { %8703 = vmatmul.mubr.msk.f32.gmra.mrb[36].mxu1 %vm867_vm0, %v975_v33  ;;  %v12779_v33 = vld [vmem:[#allocation2 + $0xcf] sm:$0xff] }
 0x19c   : > { %9257 = vmatmul.mubr.msk.f32.gmra.mrb[72].mxu0 %vm867_vm0, %v12356_v35  ;;  %8705 = vmatprep.mubr.msk.f32.mxu1 %vm11279_vm1, %v11954_v27 }
 0x19d   : > { %9259 = vmatprep.mubr.msk.f32.mxu0 %vm11279_vm1, %v11954_v27 }
 0x19f   : > { %8706 = vmatmul.mubr.msk.f32.gmra.mrb[38].mxu1 %vm867_vm0, %v976_v49  ;;  %v12788_v49 = vld [vmem:[#allocation2 + $0xd7] sm:$0xff] }
 0x1a0   : > { %9260 = vmatmul.mubr.msk.f32.gmra.mrb[74].mxu0 %vm867_vm0, %v12365_v37  ;;  %8708 = vmatprep.mubr.msk.f32.mxu1 %vm11279_vm1, %v11954_v27 }
 0x1a1   : > { %9262 = vmatprep.mubr.msk.f32.mxu0 %vm11279_vm1, %v11954_v27 }
 0x1a3   : > { %8709 = vmatmul.mubr.msk.f32.gmra.mrb[40].mxu1 %vm867_vm0, %v977_v39  ;;  %v12797_v39 = vld [vmem:[#allocation2 + $0xdf] sm:$0xff] }
 0x1a4   : > { %9263 = vmatmul.mubr.msk.f32.gmra.mrb[76].mxu0 %vm867_vm0, %v12374_v42  ;;  %8711 = vmatprep.mubr.msk.f32.mxu1 %vm11279_vm1, %v11954_v27 }
 0x1a5   : > { %9265 = vmatprep.mubr.msk.f32.mxu0 %vm11279_vm1, %v11954_v27 }
 0x1a7   : > { %8712 = vmatmul.mubr.msk.f32.gmra.mrb[42].mxu1 %vm867_vm0, %v978_v57  ;;  %v12806_v57 = vld [vmem:[#allocation2 + $0xe7] sm:$0xff] }
 0x1a8   : > { %9266 = vmatmul.mubr.msk.f32.gmra.mrb[78].mxu0 %vm867_vm0, %v12383_v44  ;;  %8714 = vmatprep.mubr.msk.f32.mxu1 %vm11279_vm1, %v11954_v27 }
 0x1a9   : > { %9268 = vmatprep.mubr.msk.f32.mxu0 %vm11279_vm1, %v11954_v27 }
 0x1ab   : > { %8715 = vmatmul.mubr.msk.f32.gmra.mrb[44].mxu1 %vm867_vm0, %v979_v47  ;;  %v12815_v47 = vld [vmem:[#allocation2 + $0xef] sm:$0xff] }
 0x1ac   : > { %9269 = vmatmul.mubr.msk.f32.gmra.mrb[80].mxu0 %vm867_vm0, %v3315_v51  ;;  %8717 = vmatprep.mubr.msk.f32.mxu1 %vm11279_vm1, %v11954_v27  ;;  %v4241_v51 = vld [vmem:[#allocation2 + $0x5a] sm:$0xff] }
 0x1ad   : > { %9273 = vmatprep.mubr.msk.f32.mxu0 %vm11279_vm1, %v11954_v27 }
 0x1af   : > { %8718 = vmatmul.mubr.msk.f32.gmra.mrb[46].mxu1 %vm867_vm0, %v980_v52  ;;  %v4242_v52 = vld [vmem:[#allocation2 + $0x62] sm:$0xff] }
 0x1b0   : > { %9274 = vmatmul.mubr.msk.f32.vlgmr.msra.gmra.mrb[0].mxu0 %vm867_vm0, %v12045_v18  ;;  %8720 = vmatprep.mubr.msk.f32.mxu1 %vm11279_vm1, %v11954_v27  ;;  %v982_v18 = vld [vmem:[#allocation2 + $0xcd] sm:$0xff] }
 0x1b1   : > { %9397 = vmatpush3.msk.msra.mxu0 %vm1165_vm2, %v7739_v1  ;;  %9276 = vmatprep.mubr.msk.f32.mxu0 %vm11279_vm1, %v11954_v27  ;;  %v12824_v1 = vld [vmem:[#allocation2 + $0xf7] sm:$0xff] }
 0x1b2   : > { %9521 = vmatprep.subr.mxu0 %v11954_v27 }
 0x1b3   : > { %8721 = vmatmul.mubr.msk.f32.gmra.mrb[48].mxu1 %vm867_vm0, %v981_v54  ;;  %v12833_v54 = vld [vmem:[#allocation2 + $0xff] sm:$0xff] }
 0x1b4   : > { %9277 = vmatmul.mubr.msk.f32.gmra.mrb[2].mxu0 %vm867_vm0, %v12054_v20  ;;  %8723 = vmatprep.mubr.msk.f32.mxu1 %vm11279_vm1, %v11954_v27  ;;  %v984_v20 = vld [vmem:[#allocation2 + $0xdd] sm:$0xff] }
 0x1b5   : > { %9279 = vmatprep.mubr.msk.f32.mxu0 %vm11279_vm1, %v11954_v27 }
 0x1b7   : > { %8724 = vmatmul.mubr.msk.f32.gmra.mrb[50].mxu1 %vm867_vm0, %v982_v18  ;;  %v4243_v18 = vld [vmem:[#allocation2 + $0x6a] sm:$0xff] }
 0x1b8   : > { %9280 = vmatmul.mubr.msk.f32.gmra.mrb[4].mxu0 %vm867_vm0, %v12063_v21  ;;  %8726 = vmatprep.mubr.msk.f32.mxu1 %vm11279_vm1, %v11954_v27  ;;  %v985_v21 = vld [vmem:[#allocation2 + $0xe5] sm:$0xff] }
 0x1b9   : > { %9282 = vmatprep.mubr.msk.f32.mxu0 %vm11279_vm1, %v11954_v27 }
 0x1bb   : > { %8727 = vmatmul.mubr.msk.f32.gmra.mrb[52].mxu1 %vm867_vm0, %v983_v58  ;;  %v12842_v58 = vld [vmem:[#allocation2 + $0x107] sm:$0xff] }
 0x1bc   : > { %9283 = vmatmul.mubr.msk.f32.gmra.mrb[6].mxu0 %vm867_vm0, %v12072_v23  ;;  %8729 = vmatprep.mubr.msk.f32.mxu1 %vm11279_vm1, %v11954_v27  ;;  %v986_v23 = vld [vmem:[#allocation2 + $0xed] sm:$0xff] }
 0x1bd   : > { %9285 = vmatprep.mubr.msk.f32.mxu0 %vm11279_vm1, %v11954_v27 }
 0x1bf   : > { %8730 = vmatmul.mubr.msk.f32.gmra.mrb[54].mxu1 %vm867_vm0, %v984_v20  ;;  %v4244_v20 = vld [vmem:[#allocation2 + $0x72] sm:$0xff] }
 0x1c0   : > { %9286 = vmatmul.mubr.msk.f32.gmra.mrb[8].mxu0 %vm867_vm0, %v12081_v25  ;;  %8732 = vmatprep.mubr.msk.f32.mxu1 %vm11279_vm1, %v11954_v27  ;;  %v987_v25 = vld [vmem:[#allocation2 + $0xf5] sm:$0xff] }
 0x1c1   : > { %9288 = vmatprep.mubr.msk.f32.mxu0 %vm11279_vm1, %v11954_v27 }
 0x1c3   : > { %8733 = vmatmul.mubr.msk.f32.gmra.mrb[56].mxu1 %vm867_vm0, %v985_v21  ;;  %v12851_v21 = vld [vmem:[#allocation2 + $0x10f] sm:$0xff] }
 0x1c4   : > { %9289 = vmatmul.mubr.msk.f32.gmra.mrb[10].mxu0 %vm867_vm0, %v12090_v28  ;;  %8735 = vmatprep.mubr.msk.f32.mxu1 %vm11279_vm1, %v11954_v27  ;;  %v988_v28 = vld [vmem:[#allocation2 + $0xfd] sm:$0xff] }
 0x1c5   : > { %9291 = vmatprep.mubr.msk.f32.mxu0 %vm11279_vm1, %v11954_v27 }
 0x1c7   : > { %8736 = vmatmul.mubr.msk.f32.gmra.mrb[58].mxu1 %vm867_vm0, %v986_v23  ;;  %v4245_v23 = vld [vmem:[#allocation2 + $0x7a] sm:$0xff] }
 0x1c8   : > { %9292 = vmatmul.mubr.msk.f32.gmra.mrb[12].mxu0 %vm867_vm0, %v12099_v30  ;;  %8738 = vmatprep.mubr.msk.f32.mxu1 %vm11279_vm1, %v11954_v27  ;;  %v989_v30 = vld [vmem:[#allocation2 + $0x105] sm:$0xff] }
 0x1c9   : > { %9294 = vmatprep.mubr.msk.f32.mxu0 %vm11279_vm1, %v11954_v27 }
 0x1cb   : > { %8739 = vmatmul.mubr.msk.f32.gmra.mrb[60].mxu1 %vm867_vm0, %v987_v25  ;;  %v12860_v25 = vld [vmem:[#allocation2 + $0x117] sm:$0xff] }
 0x1cc   : > { %9295 = vmatmul.mubr.msk.f32.gmra.mrb[14].mxu0 %vm867_vm0, %v12108_v32  ;;  %8741 = vmatprep.mubr.msk.f32.mxu1 %vm11279_vm1, %v11954_v27  ;;  %v990_v32 = vld [vmem:[#allocation2 + $0x10d] sm:$0xff] }
 0x1cd   : > { %9297 = vmatprep.mubr.msk.f32.mxu0 %vm11279_vm1, %v11954_v27 }
 0x1cf   : > { %8742 = vmatmul.mubr.msk.f32.gmra.mrb[62].mxu1 %vm867_vm0, %v988_v28  ;;  %v4246_v28 = vld [vmem:[#allocation2 + $0x82] sm:$0xff] }
 0x1d0   : > { %9298 = vmatmul.mubr.msk.f32.gmra.mrb[16].mxu0 %vm867_vm0, %v12117_v34  ;;  %8744 = vmatprep.mubr.msk.f32.mxu1 %vm11279_vm1, %v11954_v27  ;;  %v991_v34 = vld [vmem:[#allocation2 + $0x115] sm:$0xff] }
 0x1d1   : > { %9300 = vmatprep.mubr.msk.f32.mxu0 %vm11279_vm1, %v11954_v27 }
 0x1d3   : > { %8745 = vmatmul.mubr.msk.f32.gmra.mrb[64].mxu1 %vm867_vm0, %v989_v30  ;;  %v12869_v30 = vld [vmem:[#allocation2 + $0x11f] sm:$0xff] }
 0x1d4   : > { %9301 = vmatmul.mubr.msk.f32.gmra.mrb[18].mxu0 %vm867_vm0, %v12126_v48  ;;  %8747 = vmatprep.mubr.msk.f32.mxu1 %vm11279_vm1, %v11954_v27  ;;  %v992_v48 = vld [vmem:[#allocation2 + $0x11d] sm:$0xff] }
 0x1d5   : > { %9303 = vmatprep.mubr.msk.f32.mxu0 %vm11279_vm1, %v11954_v27 }
 0x1d7   : > { %8748 = vmatmul.mubr.msk.f32.gmra.mrb[66].mxu1 %vm867_vm0, %v990_v32  ;;  %v4247_v32 = vld [vmem:[#allocation2 + $0x8a] sm:$0xff] }
 0x1d8   : > { %9304 = vmatmul.mubr.msk.f32.gmra.mrb[20].mxu0 %vm867_vm0, %v12135_v36  ;;  %8750 = vmatprep.mubr.msk.f32.mxu1 %vm11279_vm1, %v11954_v27  ;;  %v993_v36 = vld [vmem:[#allocation2 + $0x125] sm:$0xff] }
 0x1d9   : > { %9306 = vmatprep.mubr.msk.f32.mxu0 %vm11279_vm1, %v11954_v27 }
 0x1db   : > { %8751 = vmatmul.mubr.msk.f32.gmra.mrb[68].mxu1 %vm867_vm0, %v991_v34  ;;  %v12878_v34 = vld [vmem:[#allocation2 + $0x127] sm:$0xff] }
 0x1dc   : > { %9307 = vmatmul.mubr.msk.f32.gmra.mrb[22].mxu0 %vm867_vm0, %v12144_v38  ;;  %8753 = vmatprep.mubr.msk.f32.mxu1 %vm11279_vm1, %v11954_v27  ;;  %v994_v38 = vld [vmem:[#allocation2 + $0x12d] sm:$0xff] }
 0x1dd   : > { %9309 = vmatprep.mubr.msk.f32.mxu0 %vm11279_vm1, %v11954_v27 }
 0x1df   : > { %8754 = vmatmul.mubr.msk.f32.gmra.mrb[70].mxu1 %vm867_vm0, %v992_v48  ;;  %v4248_v48 = vld [vmem:[#allocation2 + $0x92] sm:$0xff] }
 0x1e0   : > { %9310 = vmatmul.mubr.msk.f32.gmra.mrb[24].mxu0 %vm867_vm0, %v12153_v41  ;;  %8756 = vmatprep.mubr.msk.f32.mxu1 %vm11279_vm1, %v11954_v27  ;;  %v995_v41 = vld [vmem:[#allocation2 + $0x135] sm:$0xff] }
 0x1e1   : > { %9312 = vmatprep.mubr.msk.f32.mxu0 %vm11279_vm1, %v11954_v27 }
 0x1e3   : > { %8757 = vmatmul.mubr.msk.f32.gmra.mrb[72].mxu1 %vm867_vm0, %v993_v36  ;;  %v12887_v36 = vld [vmem:[#allocation2 + $0x12f] sm:$0xff] }
 0x1e4   : > { %9313 = vmatmul.mubr.msk.f32.gmra.mrb[26].mxu0 %vm867_vm0, %v12162_v56  ;;  %8759 = vmatprep.mubr.msk.f32.mxu1 %vm11279_vm1, %v11954_v27  ;;  %v996_v56 = vld [vmem:[#allocation2 + $0x13d] sm:$0xff] }
 0x1e5   : > { %9315 = vmatprep.mubr.msk.f32.mxu0 %vm11279_vm1, %v11954_v27 }
 0x1e7   : > { %8760 = vmatmul.mubr.msk.f32.gmra.mrb[74].mxu1 %vm867_vm0, %v994_v38  ;;  %v4249_v38 = vld [vmem:[#allocation2 + $0x9a] sm:$0xff] }
 0x1e8   : > { %9316 = vmatmul.mubr.msk.f32.gmra.mrb[28].mxu0 %vm867_vm0, %v12171_v43  ;;  %8762 = vmatprep.mubr.msk.f32.mxu1 %vm11279_vm1, %v11954_v27  ;;  %v997_v43 = vld [vmem:[#allocation2 + $0x145] sm:$0xf] }
 0x1e9   : > { %9318 = vmatprep.mubr.msk.f32.mxu0 %vm11279_vm1, %v11954_v27 }
 0x1eb   : > { %8763 = vmatmul.mubr.msk.f32.gmra.mrb[76].mxu1 %vm867_vm0, %v995_v41  ;;  %v12896_v41 = vld [vmem:[#allocation2 + $0x137] sm:$0xff] }
 0x1ec   : > { %9319 = vmatmul.mubr.msk.f32.gmra.mrb[30].mxu0 %vm867_vm0, %v12180_v46  ;;  %8765 = vmatprep.mubr.msk.f32.mxu1 %vm11279_vm1, %v11954_v27  ;;  %v1835_v46 = vld [vmem:[#allocation2 + $0x7] sm:$0xff] }
 0x1ed   : > { %9321 = vmatprep.mubr.msk.f32.mxu0 %vm11279_vm1, %v11954_v27 }
 0x1ef   : > { %8766 = vmatmul.mubr.msk.f32.gmra.mrb[78].mxu1 %vm867_vm0, %v996_v56  ;;  %v4250_v56 = vld [vmem:[#allocation2 + $0xa2] sm:$0xff] }
 0x1f0   : > { %9322 = vmatmul.mubr.msk.f32.gmra.mrb[32].mxu0 %vm867_vm0, %v12189_v50  ;;  %8768 = vmatprep.mubr.msk.f32.mxu1 %vm11279_vm1, %v11954_v27  ;;  %v7567_v50 = vld [vmem:[%s14090_s4 + $0xc] sm:$0xf] }
 0x1f1   : > { %9324 = vmatprep.mubr.msk.f32.mxu0 %vm11279_vm1, %v11954_v27 }
 0x1f3   : > { %8769 = vmatmul.mubr.msk.f32.gmra.mrb[80].mxu1 %vm867_vm0, %v997_v43  ;;  %v12905_v43 = vld [vmem:[#allocation2 + $0x13f] sm:$0xff] }
 0x1f4   : > { %9325 = vmatmul.mubr.msk.f32.gmra.mrb[34].mxu0 %vm867_vm0, %v12202_v3  ;;  %8773 = vmatprep.mubr.msk.f32.mxu1 %vm11279_vm1, %v11954_v27  ;;  %v1836_v3 = vld [vmem:[#allocation2 + $0xf] sm:$0xff] }
 0x1f5   : > { %9327 = vmatprep.mubr.msk.f32.mxu0 %vm11279_vm1, %v11954_v27 }
 0x1f7   : > { %8774 = vmatmul.mubr.msk.f32.vlgmr.msra.gmra.mrb[0].mxu1 %vm867_vm0, %v1835_v46  ;;  %v4251_v46 = vld [vmem:[#allocation2 + $0xaa] sm:$0xff] }
 0x1f8   : > { %9328 = vmatmul.mubr.msk.f32.gmra.mrb[36].mxu0 %vm867_vm0, %v12212_v53  ;;  %8776 = vmatprep.mubr.msk.f32.mxu1 %vm11279_vm1, %v11954_v27  ;;  %v12548_v53 = vld [vmem:[#allocation2 + $0x17] sm:$0xff] }
 0x1f9   : > { %9330 = vmatprep.mubr.msk.f32.mxu0 %vm11279_vm1, %v11954_v27  ;;  %8897 = vmatpush3.msk.msra.mxu1 %vm1165_vm2, %v7567_v50  ;;  %v1875_v50 = vld [vmem:[#allocation2 + $0x147] sm:$0xf] }
 0x1fa   : > { %10566 = vmatprep.subr.mxu1 %v11954_v27 }
 0x1fb   : > { %8777 = vmatmul.mubr.msk.f32.gmra.mrb[2].mxu1 %vm867_vm0, %v1836_v3  ;;  %v4252_v3 = vld [vmem:[#allocation2 + $0xb2] sm:$0xff] }
 0x1fc   : > { %9331 = vmatmul.mubr.msk.f32.gmra.mrb[38].mxu0 %vm867_vm0, %v12221_v55  ;;  %8779 = vmatprep.mubr.msk.f32.mxu1 %vm11279_vm1, %v11954_v27  ;;  %v12558_v55 = vld [vmem:[#allocation2 + $0x1f] sm:$0xff] }
 0x1fd   : > { %9333 = vmatprep.mubr.msk.f32.mxu0 %vm11279_vm1, %v11954_v27 }
 0x1ff   : > { %8780 = vmatmul.mubr.msk.f32.gmra.mrb[4].mxu1 %vm867_vm0, %v12548_v53 }
 0x200   : > { %9334 = vmatmul.mubr.msk.f32.gmra.mrb[40].mxu0 %vm867_vm0, %v12230_v59  ;;  %8782 = vmatprep.mubr.msk.f32.mxu1 %vm11279_vm1, %v11954_v27  ;;  %v12568_v59 = vld [vmem:[#allocation2 + $0x27] sm:$0xff] }
 0x201   : > { %9336 = vmatprep.mubr.msk.f32.mxu0 %vm11279_vm1, %v11954_v27 }
 0x203   : > { %8783 = vmatmul.mubr.msk.f32.gmra.mrb[6].mxu1 %vm867_vm0, %v12558_v55 }
 0x204   : > { %9337 = vmatmul.mubr.msk.f32.gmra.mrb[42].mxu0 %vm867_vm0, %v12239_v11  ;;  %8785 = vmatprep.mubr.msk.f32.mxu1 %vm11279_vm1, %v11954_v27  ;;  %v12588_v11 = vld [vmem:[#allocation2 + $0x37] sm:$0xff] }
 0x205   : > { %9339 = vmatprep.mubr.msk.f32.mxu0 %vm11279_vm1, %v11954_v27 }
 0x207   : > { %8786 = vmatmul.mubr.msk.f32.gmra.mrb[8].mxu1 %vm867_vm0, %v12568_v59 }
 0x208   : > { %9340 = vmatmul.mubr.msk.f32.gmra.mrb[44].mxu0 %vm867_vm0, %v12248_v61  ;;  %8788 = vmatprep.mubr.msk.f32.mxu1 %vm11279_vm1, %v11954_v27  ;;  %v12608_v61 = vld [vmem:[#allocation2 + $0x47] sm:$0xff] }
 0x209   : > { %9342 = vmatprep.mubr.msk.f32.mxu0 %vm11279_vm1, %v11954_v27 }
 0x20b   : > { %8789 = vmatmul.mubr.msk.f32.gmra.mrb[10].mxu1 %vm867_vm0, %v12578_v10 }
 0x20c   : > { %9343 = vmatmul.mubr.msk.f32.gmra.mrb[46].mxu0 %vm867_vm0, %v12257_v63  ;;  %8791 = vmatprep.mubr.msk.f32.mxu1 %vm11279_vm1, %v11954_v27  ;;  %v12628_v63 = vld [vmem:[#allocation2 + $0x57] sm:$0xff] }
 0x20d   : > { %9345 = vmatprep.mubr.msk.f32.mxu0 %vm11279_vm1, %v11954_v27 }
 0x20f   : > { %8792 = vmatmul.mubr.msk.f32.gmra.mrb[12].mxu1 %vm867_vm0, %v12588_v11 }
 0x210   : > { %9346 = vmatmul.mubr.msk.f32.gmra.mrb[48].mxu0 %vm867_vm0, %v12266_v5  ;;  %8794 = vmatprep.mubr.msk.f32.mxu1 %vm11279_vm1, %v11954_v27  ;;  %v12648_v5 = vld [vmem:[#allocation2 + $0x67] sm:$0xff] }
 0x211   : > { %9348 = vmatprep.mubr.msk.f32.mxu0 %vm11279_vm1, %v11954_v27 }
 0x213   : > { %8795 = vmatmul.mubr.msk.f32.gmra.mrb[14].mxu1 %vm867_vm0, %v12598_v60 }
 0x214   : > { %9349 = vmatmul.mubr.msk.f32.gmra.mrb[50].mxu0 %vm867_vm0, %v12275_v6  ;;  %8797 = vmatprep.mubr.msk.f32.mxu1 %vm11279_vm1, %v11954_v27  ;;  %v12668_v6 = vld [vmem:[#allocation2 + $0x77] sm:$0xff] }
 0x215   : > { %9351 = vmatprep.mubr.msk.f32.mxu0 %vm11279_vm1, %v11954_v27 }
 0x217   : > { %8798 = vmatmul.mubr.msk.f32.gmra.mrb[16].mxu1 %vm867_vm0, %v12608_v61 }
 0x218   : > { %9352 = vmatmul.mubr.msk.f32.gmra.mrb[52].mxu0 %vm867_vm0, %v12284_v8  ;;  %8800 = vmatprep.mubr.msk.f32.mxu1 %vm11279_vm1, %v11954_v27  ;;  %v12680_v8 = vld [vmem:[#allocation2 + $0x7f] sm:$0xff] }
 0x219   : > { %9354 = vmatprep.mubr.msk.f32.mxu0 %vm11279_vm1, %v11954_v27 }
 0x21b   : > { %8801 = vmatmul.mubr.msk.f32.gmra.mrb[18].mxu1 %vm867_vm0, %v12618_v62 }
 0x21c   : > { %9355 = vmatmul.mubr.msk.f32.gmra.mrb[54].mxu0 %vm867_vm0, %v12293_v9  ;;  %8803 = vmatprep.mubr.msk.f32.mxu1 %vm11279_vm1, %v11954_v27  ;;  %v12710_v9 = vld [vmem:[#allocation2 + $0x97] sm:$0xff] }
 0x21d   : > { %9357 = vmatprep.mubr.msk.f32.mxu0 %vm11279_vm1, %v11954_v27 }
 0x21f   : > { %8804 = vmatmul.mubr.msk.f32.gmra.mrb[20].mxu1 %vm867_vm0, %v12628_v63 }
 0x220   : > { %9358 = vmatmul.mubr.msk.f32.gmra.mrb[56].mxu0 %vm867_vm0, %v12302_v13  ;;  %8806 = vmatprep.mubr.msk.f32.mxu1 %vm11279_vm1, %v11954_v27  ;;  %v12730_v13 = vld [vmem:[#allocation2 + $0xa7] sm:$0xff] }
 0x221   : > { %9360 = vmatprep.mubr.msk.f32.mxu0 %vm11279_vm1, %v11954_v27 }
 0x223   : > { %8807 = vmatmul.mubr.msk.f32.gmra.mrb[22].mxu1 %vm867_vm0, %v12638_v4 }
 0x224   : > { %9361 = vmatmul.mubr.msk.f32.gmra.mrb[58].mxu0 %vm867_vm0, %v12311_v16  ;;  %8809 = vmatprep.mubr.msk.f32.mxu1 %vm11279_vm1, %v11954_v27  ;;  %v3794_v16 = vld [vmem:[#allocation2 + $0x161] sm:$0xff] }
 0x225   : > { %9363 = vmatprep.mubr.msk.f32.mxu0 %vm11279_vm1, %v11954_v27 }
 0x227   : > { %8810 = vmatmul.mubr.msk.f32.gmra.mrb[24].mxu1 %vm867_vm0, %v12648_v5 }
 0x228   : > { %9364 = vmatmul.mubr.msk.f32.gmra.mrb[60].mxu0 %vm867_vm0, %v12320_v19  ;;  %8812 = vmatprep.mubr.msk.f32.mxu1 %vm11279_vm1, %v11954_v27  ;;  %v3795_v19 = vld [vmem:[#allocation2 + $0x169] sm:$0xf] }
 0x229   : > { %9366 = vmatprep.mubr.msk.f32.mxu0 %vm11279_vm1, %v11954_v27 }
 0x22b   : > { %8813 = vmatmul.mubr.msk.f32.gmra.mrb[26].mxu1 %vm867_vm0, %v12658_v15 }
 0x22c   : > { %9367 = vmatmul.mubr.msk.f32.gmra.mrb[62].mxu0 %vm867_vm0, %v12329_v22  ;;  %8815 = vmatprep.mubr.msk.f32.mxu1 %vm11279_vm1, %v11954_v27  ;;  %v7782_v22 = vld [vmem:[%s14090_s4 + $0x20] sm:$0xf] }
 0x22d   : > { %9369 = vmatprep.mubr.msk.f32.mxu0 %vm11279_vm1, %v11954_v27 }
 0x22f   : > { %8816 = vmatmul.mubr.msk.f32.gmra.mrb[28].mxu1 %vm867_vm0, %v12668_v6 }
 0x230   : > { %9370 = vmatmul.mubr.msk.f32.gmra.mrb[64].mxu0 %vm867_vm0, %v12338_v26  ;;  %8818 = vmatprep.mubr.msk.f32.mxu1 %vm11279_vm1, %v11954_v27  ;;  %v12690_v27 = vld [vmem:[#allocation2 + $0x87] sm:$0xff] }
 0x231   : > { %9372 = vmatprep.mubr.msk.f32.mxu0 %vm11279_vm1, %v12676_v7  ;;  %v4235_v26 = vld [vmem:[#allocation2 + $0x2a] sm:$0xff] }
 0x233   : > { %8819 = vmatmul.mubr.msk.f32.gmra.mrb[30].mxu1 %vm867_vm0, %v12680_v8 }
 0x234   : > { %9373 = vmatmul.mubr.msk.f32.gmra.mrb[66].mxu0 %vm867_vm0, %v12347_v31  ;;  %8821 = vmatprep.mubr.msk.f32.mxu1 %vm11279_vm1, %v12676_v7  ;;  %v4236_v31 = vld [vmem:[#allocation2 + $0x32] sm:$0xff] }
 0x235   : > { %9375 = vmatprep.mubr.msk.f32.mxu0 %vm11279_vm1, %v12676_v7 }
 0x237   : > { %8822 = vmatmul.mubr.msk.f32.gmra.mrb[32].mxu1 %vm867_vm0, %v12690_v27 }
 0x238   : > { %9376 = vmatmul.mubr.msk.f32.gmra.mrb[68].mxu0 %vm867_vm0, %v12356_v35  ;;  %8824 = vmatprep.mubr.msk.f32.mxu1 %vm11279_vm1, %v12676_v7  ;;  %v4237_v35 = vld [vmem:[#allocation2 + $0x3a] sm:$0xff] }
 0x239   : > { %9378 = vmatprep.mubr.msk.f32.mxu0 %vm11279_vm1, %v12676_v7 }
 0x23b   : > { %8825 = vmatmul.mubr.msk.f32.gmra.mrb[34].mxu1 %vm867_vm0, %v12700_v40 }
 0x23c   : > { %9379 = vmatmul.mubr.msk.f32.gmra.mrb[70].mxu0 %vm867_vm0, %v12365_v37  ;;  %8827 = vmatprep.mubr.msk.f32.mxu1 %vm11279_vm1, %v12676_v7  ;;  %v4238_v37 = vld [vmem:[#allocation2 + $0x42] sm:$0xff] }
 0x23d   : > { %9381 = vmatprep.mubr.msk.f32.mxu0 %vm11279_vm1, %v12676_v7 }
 0x23f   : > { %8828 = vmatmul.mubr.msk.f32.gmra.mrb[36].mxu1 %vm867_vm0, %v12710_v9 }
 0x240   : > { %9382 = vmatmul.mubr.msk.f32.gmra.mrb[72].mxu0 %vm867_vm0, %v12374_v42  ;;  %8830 = vmatprep.mubr.msk.f32.mxu1 %vm11279_vm1, %v12676_v7  ;;  %v4239_v42 = vld [vmem:[#allocation2 + $0x4a] sm:$0xff] }
 0x241   : > { %9384 = vmatprep.mubr.msk.f32.mxu0 %vm11279_vm1, %v12676_v7 }
 0x243   : > { %8831 = vmatmul.mubr.msk.f32.gmra.mrb[38].mxu1 %vm867_vm0, %v12720_v12 }
 0x244   : > { %9385 = vmatmul.mubr.msk.f32.gmra.mrb[74].mxu0 %vm867_vm0, %v12383_v44  ;;  %8833 = vmatprep.mubr.msk.f32.mxu1 %vm11279_vm1, %v12676_v7  ;;  %v4240_v44 = vld [vmem:[#allocation2 + $0x52] sm:$0xff] }
 0x245   : > { %9387 = vmatprep.mubr.msk.f32.mxu0 %vm11279_vm1, %v12676_v7 }
 0x247   : > { %8834 = vmatmul.mubr.msk.f32.gmra.mrb[40].mxu1 %vm867_vm0, %v12730_v13 }
 0x248   : > { %9388 = vmatmul.mubr.msk.f32.gmra.mrb[76].mxu0 %vm867_vm0, %v3793_v14  ;;  %8836 = vmatprep.mubr.msk.f32.mxu1 %vm11279_vm1, %v12676_v7  ;;  %v4253_v14 = vld [vmem:[#allocation2 + $0xba] sm:$0xff] }
 0x249   : > { %9390 = vmatprep.mubr.msk.f32.mxu0 %vm11279_vm1, %v12676_v7 }
 0x24b   : > { %8837 = vmatmul.mubr.msk.f32.gmra.mrb[42].mxu1 %vm867_vm0, %v12739_v17 }
 0x24c   : > { %9391 = vmatmul.mubr.msk.f32.gmra.mrb[78].mxu0 %vm867_vm0, %v3794_v16  ;;  %8839 = vmatprep.mubr.msk.f32.mxu1 %vm11279_vm1, %v12676_v7  ;;  %v11225_v16 = vld [vmem:[%s14090_s4 + $0x10] sm:$0xf] }
 0x24d   : > { %9393 = vmatprep.mubr.msk.f32.mxu0 %vm11279_vm1, %v12676_v7 }
 0x24f   : > { %8840 = vmatmul.mubr.msk.f32.gmra.mrb[44].mxu1 %vm867_vm0, %v12748_v45 }
 0x250   : > { %9394 = vmatmul.mubr.msk.f32.gmra.mrb[80].mxu0 %vm867_vm0, %v3795_v19  ;;  %8842 = vmatprep.mubr.msk.f32.mxu1 %vm11279_vm1, %v12676_v7  ;;  %v4254_v19 = vld [vmem:[#allocation2 + $0xc2] sm:$0xff] }
 0x251   : > { %9398 = vmatprep.mubr.msk.f32.mxu0 %vm11279_vm1, %v12676_v7 }
 0x253   : > { %8843 = vmatmul.mubr.msk.f32.gmra.mrb[46].mxu1 %vm867_vm0, %v12760_v24 }
 0x254   : > { %9399 = vmatmul.mubr.msk.f32.vlgmr.msra.gmra.mrb[0].mxu0 %vm867_vm0, %v4235_v26  ;;  %8845 = vmatprep.mubr.msk.f32.mxu1 %vm11279_vm1, %v12676_v7  ;;  %v4717_v26 = vld [vmem:[#allocation2 + $0x3b] sm:$0xff] }
 0x255   : > { %9522 = vmatpush3.msk.msra.mxu0 %vm1165_vm2, %v7782_v22  ;;  %9401 = vmatprep.mubr.msk.f32.mxu0 %vm11279_vm1, %v12676_v7  ;;  %v4715_v22 = vld [vmem:[#allocation2 + $0x2b] sm:$0xff] }
 0x257   : > { %8846 = vmatmul.mubr.msk.f32.gmra.mrb[48].mxu1 %vm867_vm0, %v12770_v29 }
 0x258   : > { %9402 = vmatmul.mubr.msk.f32.gmra.mrb[2].mxu0 %vm867_vm0, %v4236_v31  ;;  %8848 = vmatprep.mubr.msk.f32.mxu1 %vm11279_vm1, %v12676_v7  ;;  %v4719_v31 = vld [vmem:[#allocation2 + $0x4b] sm:$0xff] }
 0x259   : > { %9404 = vmatprep.mubr.msk.f32.mxu0 %vm11279_vm1, %v12676_v7 }
 0x25b   : > { %8849 = vmatmul.mubr.msk.f32.gmra.mrb[50].mxu1 %vm867_vm0, %v12779_v33 }
 0x25c   : > { %9405 = vmatmul.mubr.msk.f32.gmra.mrb[4].mxu0 %vm867_vm0, %v4237_v35  ;;  %8851 = vmatprep.mubr.msk.f32.mxu1 %vm11279_vm1, %v12676_v7  ;;  %v4721_v35 = vld [vmem:[#allocation2 + $0x5b] sm:$0xff] }
 0x25d   : > { %9407 = vmatprep.mubr.msk.f32.mxu0 %vm11279_vm1, %v12676_v7 }
 0x25f   : > { %8852 = vmatmul.mubr.msk.f32.gmra.mrb[52].mxu1 %vm867_vm0, %v12788_v49 }
 0x260   : > { %9408 = vmatmul.mubr.msk.f32.gmra.mrb[6].mxu0 %vm867_vm0, %v4238_v37  ;;  %8854 = vmatprep.mubr.msk.f32.mxu1 %vm11279_vm1, %v12676_v7  ;;  %v4723_v37 = vld [vmem:[#allocation2 + $0x6b] sm:$0xff] }
 0x261   : > { %9410 = vmatprep.mubr.msk.f32.mxu0 %vm11279_vm1, %v12676_v7 }
 0x263   : > { %8855 = vmatmul.mubr.msk.f32.gmra.mrb[54].mxu1 %vm867_vm0, %v12797_v39 }
 0x264   : > { %9411 = vmatmul.mubr.msk.f32.gmra.mrb[8].mxu0 %vm867_vm0, %v4239_v42  ;;  %8857 = vmatprep.mubr.msk.f32.mxu1 %vm11279_vm1, %v12676_v7  ;;  %v4725_v42 = vld [vmem:[#allocation2 + $0x7b] sm:$0xff] }
 0x265   : > { %9413 = vmatprep.mubr.msk.f32.mxu0 %vm11279_vm1, %v12676_v7 }
 0x267   : > { %8858 = vmatmul.mubr.msk.f32.gmra.mrb[56].mxu1 %vm867_vm0, %v12806_v57 }
 0x268   : > { %9414 = vmatmul.mubr.msk.f32.gmra.mrb[10].mxu0 %vm867_vm0, %v4240_v44  ;;  %8860 = vmatprep.mubr.msk.f32.mxu1 %vm11279_vm1, %v12676_v7  ;;  %v4727_v44 = vld [vmem:[#allocation2 + $0x8b] sm:$0xff] }
 0x269   : > { %9416 = vmatprep.mubr.msk.f32.mxu0 %vm11279_vm1, %v12676_v7 }
 0x26b   : > { %8861 = vmatmul.mubr.msk.f32.gmra.mrb[58].mxu1 %vm867_vm0, %v12815_v47 }
 0x26c   : > { %9417 = vmatmul.mubr.msk.f32.gmra.mrb[12].mxu0 %vm867_vm0, %v4241_v51  ;;  %8863 = vmatprep.mubr.msk.f32.mxu1 %vm11279_vm1, %v12676_v7  ;;  %v4729_v51 = vld [vmem:[#allocation2 + $0x9b] sm:$0xff] }
 0x26d   : > { %9419 = vmatprep.mubr.msk.f32.mxu0 %vm11279_vm1, %v12676_v7 }
 0x26f   : > { %8864 = vmatmul.mubr.msk.f32.gmra.mrb[60].mxu1 %vm867_vm0, %v12824_v1 }
 0x270   : > { %9420 = vmatmul.mubr.msk.f32.gmra.mrb[14].mxu0 %vm867_vm0, %v4242_v52  ;;  %8866 = vmatprep.mubr.msk.f32.mxu1 %vm11279_vm1, %v12676_v7  ;;  %v4730_v52 = vld [vmem:[#allocation2 + $0xa3] sm:$0xff] }
 0x271   : > { %9422 = vmatprep.mubr.msk.f32.mxu0 %vm11279_vm1, %v12676_v7 }
 0x273   : > { %8867 = vmatmul.mubr.msk.f32.gmra.mrb[62].mxu1 %vm867_vm0, %v12833_v54 }
 0x274   : > { %9423 = vmatmul.mubr.msk.f32.gmra.mrb[16].mxu0 %vm867_vm0, %v4243_v18  ;;  %8869 = vmatprep.mubr.msk.f32.mxu1 %vm11279_vm1, %v12676_v7  ;;  %v4731_v18 = vld [vmem:[#allocation2 + $0xab] sm:$0xff] }
 0x275   : > { %9425 = vmatprep.mubr.msk.f32.mxu0 %vm11279_vm1, %v12676_v7 }
 0x277   : > { %8870 = vmatmul.mubr.msk.f32.gmra.mrb[64].mxu1 %vm867_vm0, %v12842_v58 }
 0x278   : > { %9426 = vmatmul.mubr.msk.f32.gmra.mrb[18].mxu0 %vm867_vm0, %v4244_v20  ;;  %8872 = vmatprep.mubr.msk.f32.mxu1 %vm11279_vm1, %v12676_v7  ;;  %v4732_v20 = vld [vmem:[#allocation2 + $0xb3] sm:$0xff] }
 0x279   : > { %9428 = vmatprep.mubr.msk.f32.mxu0 %vm11279_vm1, %v12676_v7 }
 0x27b   : > { %8873 = vmatmul.mubr.msk.f32.gmra.mrb[66].mxu1 %vm867_vm0, %v12851_v21 }
 0x27c   : > { %9429 = vmatmul.mubr.msk.f32.gmra.mrb[20].mxu0 %vm867_vm0, %v4245_v23  ;;  %8875 = vmatprep.mubr.msk.f32.mxu1 %vm11279_vm1, %v12676_v7  ;;  %v4733_v23 = vld [vmem:[#allocation2 + $0xbb] sm:$0xff] }
 0x27d   : > { %9431 = vmatprep.mubr.msk.f32.mxu0 %vm11279_vm1, %v12676_v7 }
 0x27f   : > { %8876 = vmatmul.mubr.msk.f32.gmra.mrb[68].mxu1 %vm867_vm0, %v12860_v25 }
 0x280   : > { %9432 = vmatmul.mubr.msk.f32.gmra.mrb[22].mxu0 %vm867_vm0, %v4246_v28  ;;  %8878 = vmatprep.mubr.msk.f32.mxu1 %vm11279_vm1, %v12676_v7  ;;  %v4734_v28 = vld [vmem:[#allocation2 + $0xc3] sm:$0xff] }
 0x281   : > { %9434 = vmatprep.mubr.msk.f32.mxu0 %vm11279_vm1, %v12676_v7 }
 0x283   : > { %8879 = vmatmul.mubr.msk.f32.gmra.mrb[70].mxu1 %vm867_vm0, %v12869_v30 }
 0x284   : > { %9435 = vmatmul.mubr.msk.f32.gmra.mrb[24].mxu0 %vm867_vm0, %v4247_v32  ;;  %8881 = vmatprep.mubr.msk.f32.mxu1 %vm11279_vm1, %v12676_v7  ;;  %v4735_v32 = vld [vmem:[#allocation2 + $0xcb] sm:$0xff] }
 0x285   : > { %9437 = vmatprep.mubr.msk.f32.mxu0 %vm11279_vm1, %v12676_v7 }
 0x287   : > { %8882 = vmatmul.mubr.msk.f32.gmra.mrb[72].mxu1 %vm867_vm0, %v12878_v34 }
 0x288   : > { %9438 = vmatmul.mubr.msk.f32.gmra.mrb[26].mxu0 %vm867_vm0, %v4248_v48  ;;  %8884 = vmatprep.mubr.msk.f32.mxu1 %vm11279_vm1, %v12676_v7  ;;  %v4736_v48 = vld [vmem:[#allocation2 + $0xd3] sm:$0xff] }
 0x289   : > { %9440 = vmatprep.mubr.msk.f32.mxu0 %vm11279_vm1, %v12676_v7 }
 0x28b   : > { %8885 = vmatmul.mubr.msk.f32.gmra.mrb[74].mxu1 %vm867_vm0, %v12887_v36 }
 0x28c   : > { %9441 = vmatmul.mubr.msk.f32.gmra.mrb[28].mxu0 %vm867_vm0, %v4249_v38  ;;  %8887 = vmatprep.mubr.msk.f32.mxu1 %vm11279_vm1, %v12676_v7  ;;  %v4737_v38 = vld [vmem:[#allocation2 + $0xdb] sm:$0xff] }
 0x28d   : > { %9443 = vmatprep.mubr.msk.f32.mxu0 %vm11279_vm1, %v12676_v7 }
 0x28f   : > { %8888 = vmatmul.mubr.msk.f32.gmra.mrb[76].mxu1 %vm867_vm0, %v12896_v41 }
 0x290   : > { %9444 = vmatmul.mubr.msk.f32.gmra.mrb[30].mxu0 %vm867_vm0, %v4250_v56  ;;  %8890 = vmatprep.mubr.msk.f32.mxu1 %vm11279_vm1, %v12676_v7  ;;  %v4738_v56 = vld [vmem:[#allocation2 + $0xe3] sm:$0xff] }
 0x291   : > { %9446 = vmatprep.mubr.msk.f32.mxu0 %vm11279_vm1, %v12676_v7 }
 0x293   : > { %8891 = vmatmul.mubr.msk.f32.gmra.mrb[78].mxu1 %vm867_vm0, %v12905_v43 }
 0x294   : > { %9447 = vmatmul.mubr.msk.f32.gmra.mrb[32].mxu0 %vm867_vm0, %v4251_v46  ;;  %8893 = vmatprep.mubr.msk.f32.mxu1 %vm11279_vm1, %v12676_v7  ;;  %v4739_v46 = vld [vmem:[#allocation2 + $0xeb] sm:$0xff] }
 0x295   : > { %9449 = vmatprep.mubr.msk.f32.mxu0 %vm11279_vm1, %v12676_v7 }
 0x297   : > { %8894 = vmatmul.mubr.msk.f32.gmra.mrb[80].mxu1 %vm867_vm0, %v1875_v50  ;;  %v2823_v50 = vld [vmem:[#allocation2 + $0xf8] sm:$0xff] }
 0x298   : > { %9450 = vmatmul.mubr.msk.f32.gmra.mrb[34].mxu0 %vm867_vm0, %v4252_v3  ;;  %8898 = vmatprep.mubr.msk.f32.mxu1 %vm11279_vm1, %v12676_v7  ;;  %v4740_v3 = vld [vmem:[#allocation2 + $0xf3] sm:$0xff] }
 0x299   : > { %9452 = vmatprep.mubr.msk.f32.mxu0 %vm11279_vm1, %v12676_v7 }
 0x29b   : > { %8899 = vmatmul.mubr.msk.f32.vlgmr.msra.gmra.mrb[0].mxu1 %vm867_vm0, %v12548_v53  ;;  %v4255_v53 = vld [vmem:[#allocation2 + $0xca] sm:$0xff] }
 0x29c   : > { %9453 = vmatmul.mubr.msk.f32.gmra.mrb[36].mxu0 %vm867_vm0, %v4253_v14  ;;  %8901 = vmatprep.mubr.msk.f32.mxu1 %vm11279_vm1, %v12676_v7  ;;  %v2824_v14 = vld [vmem:[#allocation2 + $0x100] sm:$0xff] }
 0x29d   : > { %9455 = vmatprep.mubr.msk.f32.mxu0 %vm11279_vm1, %v12676_v7  ;;  %10567 = vmatpush3.msk.msra.mxu1 %vm1165_vm2, %v11225_v16  ;;  %v4741_v16 = vld [vmem:[#allocation2 + $0xfb] sm:$0xff] }
 0x29f   : > { %8902 = vmatmul.mubr.msk.f32.gmra.mrb[2].mxu1 %vm867_vm0, %v12558_v55  ;;  %v4256_v55 = vld [vmem:[#allocation2 + $0xd2] sm:$0xff] }
 0x2a0   : > { %9456 = vmatmul.mubr.msk.f32.gmra.mrb[38].mxu0 %vm867_vm0, %v4254_v19  ;;  %8904 = vmatprep.mubr.msk.f32.mxu1 %vm11279_vm1, %v12676_v7  ;;  %v2825_v19 = vld [vmem:[#allocation2 + $0x108] sm:$0xff] }
 0x2a1   : > { %9458 = vmatprep.mubr.msk.f32.mxu0 %vm11279_vm1, %v12676_v7 }
 0x2a3   : > { %8905 = vmatmul.mubr.msk.f32.gmra.mrb[4].mxu1 %vm867_vm0, %v12568_v59  ;;  %v4257_v59 = vld [vmem:[#allocation2 + $0xda] sm:$0xff] }
 0x2a4   : > { %9459 = vmatmul.mubr.msk.f32.gmra.mrb[40].mxu0 %vm867_vm0, %v4255_v53  ;;  %8907 = vmatprep.mubr.msk.f32.mxu1 %vm11279_vm1, %v12676_v7  ;;  %v4742_v53 = vld [vmem:[#allocation2 + $0x103] sm:$0xff] }
 0x2a5   : > { %9461 = vmatprep.mubr.msk.f32.mxu0 %vm11279_vm1, %v12676_v7 }
 0x2a7   : > { %8908 = vmatmul.mubr.msk.f32.gmra.mrb[6].mxu1 %vm867_vm0, %v12578_v10  ;;  %v4258_v10 = vld [vmem:[#allocation2 + $0xe2] sm:$0xff] }
 0x2a8   : > { %9462 = vmatmul.mubr.msk.f32.gmra.mrb[42].mxu0 %vm867_vm0, %v4256_v55  ;;  %8910 = vmatprep.mubr.msk.f32.mxu1 %vm11279_vm1, %v12676_v7  ;;  %v2826_v55 = vld [vmem:[#allocation2 + $0x110] sm:$0xff] }
 0x2a9   : > { %9464 = vmatprep.mubr.msk.f32.mxu0 %vm11279_vm1, %v12676_v7 }
 0x2ab   : > { %8911 = vmatmul.mubr.msk.f32.gmra.mrb[8].mxu1 %vm867_vm0, %v12588_v11  ;;  %v4259_v11 = vld [vmem:[#allocation2 + $0xea] sm:$0xff] }
 0x2ac   : > { %9465 = vmatmul.mubr.msk.f32.gmra.mrb[44].mxu0 %vm867_vm0, %v4257_v59  ;;  %8913 = vmatprep.mubr.msk.f32.mxu1 %vm11279_vm1, %v12676_v7  ;;  %v4743_v59 = vld [vmem:[#allocation2 + $0x10b] sm:$0xff] }
 0x2ad   : > { %9467 = vmatprep.mubr.msk.f32.mxu0 %vm11279_vm1, %v12676_v7 }
 0x2af   : > { %8914 = vmatmul.mubr.msk.f32.gmra.mrb[10].mxu1 %vm867_vm0, %v12598_v60  ;;  %v4260_v60 = vld [vmem:[#allocation2 + $0xf2] sm:$0xff] }
 0x2b0   : > { %9468 = vmatmul.mubr.msk.f32.gmra.mrb[46].mxu0 %vm867_vm0, %v4258_v10  ;;  %8916 = vmatprep.mubr.msk.f32.mxu1 %vm11279_vm1, %v12676_v7  ;;  %v2827_v10 = vld [vmem:[#allocation2 + $0x118] sm:$0xff] }
 0x2b1   : > { %9470 = vmatprep.mubr.msk.f32.mxu0 %vm11279_vm1, %v12676_v7 }
 0x2b3   : > { %8917 = vmatmul.mubr.msk.f32.gmra.mrb[12].mxu1 %vm867_vm0, %v12608_v61  ;;  %v4261_v61 = vld [vmem:[#allocation2 + $0xfa] sm:$0xff] }
 0x2b4   : > { %9471 = vmatmul.mubr.msk.f32.gmra.mrb[48].mxu0 %vm867_vm0, %v4259_v11  ;;  %8919 = vmatprep.mubr.msk.f32.mxu1 %vm11279_vm1, %v12676_v7  ;;  %v4744_v11 = vld [vmem:[#allocation2 + $0x113] sm:$0xff] }
 0x2b5   : > { %9473 = vmatprep.mubr.msk.f32.mxu0 %vm11279_vm1, %v12676_v7 }
 0x2b7   : > { %8920 = vmatmul.mubr.msk.f32.gmra.mrb[14].mxu1 %vm867_vm0, %v12618_v62  ;;  %v4262_v62 = vld [vmem:[#allocation2 + $0x102] sm:$0xff] }
 0x2b8   : > { %9474 = vmatmul.mubr.msk.f32.gmra.mrb[50].mxu0 %vm867_vm0, %v4260_v60  ;;  %8922 = vmatprep.mubr.msk.f32.mxu1 %vm11279_vm1, %v12676_v7 }
 0x2b9   : > { %9476 = vmatprep.mubr.msk.f32.mxu0 %vm11279_vm1, %v12676_v7 }
 0x2bb   : > { %8923 = vmatmul.mubr.msk.f32.gmra.mrb[16].mxu1 %vm867_vm0, %v12628_v63  ;;  %v4263_v63 = vld [vmem:[#allocation2 + $0x10a] sm:$0xff] }
 0x2bc   : > { %9477 = vmatmul.mubr.msk.f32.gmra.mrb[52].mxu0 %vm867_vm0, %v4261_v61  ;;  %8925 = vmatprep.mubr.msk.f32.mxu1 %vm11279_vm1, %v12676_v7  ;;  %v2828_v61 = vld [vmem:[#allocation2 + $0x120] sm:$0xff] }
 0x2bd   : > { %9479 = vmatprep.mubr.msk.f32.mxu0 %vm11279_vm1, %v12676_v7 }
 0x2bf   : > { %8926 = vmatmul.mubr.msk.f32.gmra.mrb[18].mxu1 %vm867_vm0, %v12638_v4  ;;  %v4264_v4 = vld [vmem:[#allocation2 + $0x112] sm:$0xff] }
 0x2c0   : > { %9480 = vmatmul.mubr.msk.f32.gmra.mrb[54].mxu0 %vm867_vm0, %v4262_v62  ;;  %8928 = vmatprep.mubr.msk.f32.mxu1 %vm11279_vm1, %v12676_v7  ;;  %v4745_v62 = vld [vmem:[#allocation2 + $0x11b] sm:$0xff] }
 0x2c1   : > { %9482 = vmatprep.mubr.msk.f32.mxu0 %vm11279_vm1, %v12676_v7 }
 0x2c3   : > { %8929 = vmatmul.mubr.msk.f32.gmra.mrb[20].mxu1 %vm867_vm0, %v12648_v5  ;;  %v4265_v5 = vld [vmem:[#allocation2 + $0x11a] sm:$0xff] }
 0x2c4   : > { %9483 = vmatmul.mubr.msk.f32.gmra.mrb[56].mxu0 %vm867_vm0, %v4263_v63  ;;  %8931 = vmatprep.mubr.msk.f32.mxu1 %vm11279_vm1, %v12676_v7 }
 0x2c5   : > { %9485 = vmatprep.mubr.msk.f32.mxu0 %vm11279_vm1, %v12676_v7 }
 0x2c7   : > { %8932 = vmatmul.mubr.msk.f32.gmra.mrb[22].mxu1 %vm867_vm0, %v12658_v15  ;;  %v4266_v15 = vld [vmem:[#allocation2 + $0x122] sm:$0xff] }
 0x2c8   : > { %9486 = vmatmul.mubr.msk.f32.gmra.mrb[58].mxu0 %vm867_vm0, %v4264_v4  ;;  %8934 = vmatprep.mubr.msk.f32.mxu1 %vm11279_vm1, %v12676_v7 }
 0x2c9   : > { %9488 = vmatprep.mubr.msk.f32.mxu0 %vm11279_vm1, %v12676_v7 }
 0x2cb   : > { %8935 = vmatmul.mubr.msk.f32.gmra.mrb[24].mxu1 %vm867_vm0, %v12668_v6  ;;  %v4267_v6 = vld [vmem:[#allocation2 + $0x12a] sm:$0xff] }
 0x2cc   : > { %9489 = vmatmul.mubr.msk.f32.gmra.mrb[60].mxu0 %vm867_vm0, %v4265_v5  ;;  %8937 = vmatprep.mubr.msk.f32.mxu1 %vm11279_vm1, %v12676_v7  ;;  %v2829_v5 = vld [vmem:[#allocation2 + $0x128] sm:$0xff] }
 0x2cd   : > { %9491 = vmatprep.mubr.msk.f32.mxu0 %vm11279_vm1, %v12676_v7 }
 0x2cf   : > { %8938 = vmatmul.mubr.msk.f32.gmra.mrb[26].mxu1 %vm867_vm0, %v12680_v8  ;;  %v4268_v8 = vld [vmem:[#allocation2 + $0x132] sm:$0xff] }
 0x2d0   : > { %9492 = vmatmul.mubr.msk.f32.gmra.mrb[62].mxu0 %vm867_vm0, %v4266_v15  ;;  %8940 = vmatprep.mubr.msk.f32.mxu1 %vm11279_vm1, %v12676_v7  ;;  %v4746_v15 = vld [vmem:[#allocation2 + $0x123] sm:$0xff] }
 0x2d1   : > { %9494 = vmatprep.mubr.msk.f32.mxu0 %vm11279_vm1, %v12676_v7 }
 0x2d3   : > { %8941 = vmatmul.mubr.msk.f32.gmra.mrb[28].mxu1 %vm867_vm0, %v12690_v27  ;;  %v4269_v27 = vld [vmem:[#allocation2 + $0x13a] sm:$0xff] }
 0x2d4   : > { %9495 = vmatmul.mubr.msk.f32.gmra.mrb[64].mxu0 %vm867_vm0, %v4267_v6  ;;  %8943 = vmatprep.mubr.msk.f32.mxu1 %vm11279_vm1, %v12676_v7 }
 0x2d5   : > { %9497 = vmatprep.mubr.msk.f32.mxu0 %vm11279_vm1, %v12676_v7 }
 0x2d7   : > { %8944 = vmatmul.mubr.msk.f32.gmra.mrb[30].mxu1 %vm867_vm0, %v12700_v40  ;;  %v4270_v40 = vld [vmem:[#allocation2 + $0x142] sm:$0xff] }
 0x2d8   : > { %9498 = vmatmul.mubr.msk.f32.gmra.mrb[66].mxu0 %vm867_vm0, %v4268_v8  ;;  %8946 = vmatprep.mubr.msk.f32.mxu1 %vm11279_vm1, %v12676_v7 }
 0x2d9   : > { %9500 = vmatprep.mubr.msk.f32.mxu0 %vm11279_vm1, %v12676_v7 }
 0x2db   : > { %8947 = vmatmul.mubr.msk.f32.gmra.mrb[32].mxu1 %vm867_vm0, %v12710_v9  ;;  %v4271_v9 = vld [vmem:[#allocation2 + $0x14a] sm:$0xff] }
 0x2dc   : > { %9501 = vmatmul.mubr.msk.f32.gmra.mrb[68].mxu0 %vm867_vm0, %v4269_v27  ;;  %8949 = vmatprep.mubr.msk.f32.mxu1 %vm11279_vm1, %v12676_v7  ;;  %v2830_v27 = vld [vmem:[#allocation2 + $0x130] sm:$0xff] }
 0x2dd   : > { %9503 = vmatprep.mubr.msk.f32.mxu0 %vm11279_vm1, %v12676_v7 }
 0x2df   : > { %8950 = vmatmul.mubr.msk.f32.gmra.mrb[34].mxu1 %vm867_vm0, %v12720_v12  ;;  %v4272_v12 = vld [vmem:[#allocation2 + $0x152] sm:$0xff] }
 0x2e0   : > { %9504 = vmatmul.mubr.msk.f32.gmra.mrb[70].mxu0 %vm867_vm0, %v4270_v40  ;;  %8952 = vmatprep.mubr.msk.f32.mxu1 %vm11279_vm1, %v12676_v7  ;;  %v4747_v40 = vld [vmem:[#allocation2 + $0x12b] sm:$0xff] }
 0x2e1   : > { %9506 = vmatprep.mubr.msk.f32.mxu0 %vm11279_vm1, %v12676_v7 }
 0x2e3   : > { %8953 = vmatmul.mubr.msk.f32.gmra.mrb[36].mxu1 %vm867_vm0, %v12730_v13  ;;  %v4273_v13 = vld [vmem:[#allocation2 + $0x15a] sm:$0xff] }
 0x2e4   : > { %9507 = vmatmul.mubr.msk.f32.gmra.mrb[72].mxu0 %vm867_vm0, %v4271_v9  ;;  %8955 = vmatprep.mubr.msk.f32.mxu1 %vm11279_vm1, %v12676_v7 }
 0x2e5   : > { %9509 = vmatprep.mubr.msk.f32.mxu0 %vm11279_vm1, %v12676_v7 }
 0x2e7   : > { %8956 = vmatmul.mubr.msk.f32.gmra.mrb[38].mxu1 %vm867_vm0, %v12739_v17  ;;  %v4274_v17 = vld [vmem:[#allocation2 + $0x162] sm:$0xff] }
 0x2e8   : > { %9510 = vmatmul.mubr.msk.f32.gmra.mrb[74].mxu0 %vm867_vm0, %v4272_v12  ;;  %8958 = vmatprep.mubr.msk.f32.mxu1 %vm11279_vm1, %v12676_v7 }
 0x2e9   : > { %9512 = vmatprep.mubr.msk.f32.mxu0 %vm11279_vm1, %v12676_v7 }
 0x2eb   : > { %8959 = vmatmul.mubr.msk.f32.gmra.mrb[40].mxu1 %vm867_vm0, %v12748_v45  ;;  %v4275_v45 = vld [vmem:[#allocation2 + $0x16a] sm:$0xf] }
 0x2ec   : > { %9513 = vmatmul.mubr.msk.f32.gmra.mrb[76].mxu0 %vm867_vm0, %v4273_v13  ;;  %8961 = vmatprep.mubr.msk.f32.mxu1 %vm11279_vm1, %v12676_v7  ;;  %v2831_v13 = vld [vmem:[#allocation2 + $0x138] sm:$0xff] }
 0x2ed   : > { %9515 = vmatprep.mubr.msk.f32.mxu0 %vm11279_vm1, %v12676_v7 }
 0x2ef   : > { %8962 = vmatmul.mubr.msk.f32.gmra.mrb[42].mxu1 %vm867_vm0, %v12760_v24  ;;  %v4716_v24 = vld [vmem:[#allocation2 + $0x33] sm:$0xff] }
 0x2f0   : > { %9516 = vmatmul.mubr.msk.f32.gmra.mrb[78].mxu0 %vm867_vm0, %v4274_v17  ;;  %8964 = vmatprep.mubr.msk.f32.mxu1 %vm11279_vm1, %v12676_v7  ;;  %v4748_v17 = vld [vmem:[#allocation2 + $0x133] sm:$0xff] }
 0x2f1   : > { %9518 = vmatprep.mubr.msk.f32.mxu0 %vm11279_vm1, %v12676_v7 }
 0x2f3   : > { %8965 = vmatmul.mubr.msk.f32.gmra.mrb[44].mxu1 %vm867_vm0, %v12770_v29  ;;  %v4718_v29 = vld [vmem:[#allocation2 + $0x43] sm:$0xff] }
 0x2f4   : > { %9519 = vmatmul.mubr.msk.f32.gmra.mrb[80].mxu0 %vm867_vm0, %v4275_v45  ;;  %8967 = vmatprep.mubr.msk.f32.mxu1 %vm11279_vm1, %v12676_v7 }
 0x2f5   : > { %9523 = vmatprep.mubr.msk.f32.mxu0 %vm11279_vm1, %v12676_v7 }
 0x2f7   : > { %8968 = vmatmul.mubr.msk.f32.gmra.mrb[46].mxu1 %vm867_vm0, %v12779_v33  ;;  %v4720_v33 = vld [vmem:[#allocation2 + $0x53] sm:$0xff] }
 0x2f8   : > { %9524 = vmatmul.mubr.msk.f32.vlgmr.msra.gmra.mrb[0].mxu0 %vm867_vm0, %v4715_v22  ;;  %8970 = vmatprep.mubr.msk.f32.mxu1 %vm11279_vm1, %v12676_v7 }
 0x2f9   : > { %9526 = vmatprep.mubr.msk.f32.mxu0 %vm11279_vm1, %v12676_v7 }
 0x2fb   : > { %8971 = vmatmul.mubr.msk.f32.gmra.mrb[48].mxu1 %vm867_vm0, %v12788_v49  ;;  %v4722_v49 = vld [vmem:[#allocation2 + $0x63] sm:$0xff] }
 0x2fc   : > { %9527 = vmatmul.mubr.msk.f32.gmra.mrb[2].mxu0 %vm867_vm0, %v4716_v24  ;;  %8973 = vmatprep.mubr.msk.f32.mxu1 %vm11279_vm1, %v12676_v7  ;;  %v2832_v24 = vld [vmem:[#allocation2 + $0x140] sm:$0xff] }
 0x2fd   : > { %9529 = vmatprep.mubr.msk.f32.mxu0 %vm11279_vm1, %v12676_v7 }
 0x2ff   : > { %8974 = vmatmul.mubr.msk.f32.gmra.mrb[50].mxu1 %vm867_vm0, %v12797_v39  ;;  %v4724_v39 = vld [vmem:[#allocation2 + $0x73] sm:$0xff] }
 0x300   : > { %9530 = vmatmul.mubr.msk.f32.gmra.mrb[4].mxu0 %vm867_vm0, %v4717_v26  ;;  %8976 = vmatprep.mubr.msk.f32.mxu1 %vm11279_vm1, %v12676_v7  ;;  %v4749_v26 = vld [vmem:[#allocation2 + $0x13b] sm:$0xff] }
 0x301   : > { %9532 = vmatprep.mubr.msk.f32.mxu0 %vm11279_vm1, %v12676_v7 }
 0x303   : > { %8977 = vmatmul.mubr.msk.f32.gmra.mrb[52].mxu1 %vm867_vm0, %v12806_v57  ;;  %v4726_v57 = vld [vmem:[#allocation2 + $0x83] sm:$0xff] }
 0x304   : > { %9533 = vmatmul.mubr.msk.f32.gmra.mrb[6].mxu0 %vm867_vm0, %v4718_v29  ;;  %8979 = vmatprep.mubr.msk.f32.mxu1 %vm11279_vm1, %v12676_v7 }
 0x305   : > { %9535 = vmatprep.mubr.msk.f32.mxu0 %vm11279_vm1, %v12676_v7 }
 0x307   : > { %8980 = vmatmul.mubr.msk.f32.gmra.mrb[54].mxu1 %vm867_vm0, %v12815_v47  ;;  %v4728_v47 = vld [vmem:[#allocation2 + $0x93] sm:$0xff] }
 0x308   : > { %9536 = vmatmul.mubr.msk.f32.gmra.mrb[8].mxu0 %vm867_vm0, %v4719_v31  ;;  %8982 = vmatprep.mubr.msk.f32.mxu1 %vm11279_vm1, %v12676_v7 }
 0x309   : > { %9538 = vmatprep.mubr.msk.f32.mxu0 %vm11279_vm1, %v12676_v7 }
 0x30b   : > { %8983 = vmatmul.mubr.msk.f32.gmra.mrb[56].mxu1 %vm867_vm0, %v12824_v1  ;;  %v2353_v1 = vld [vmem:[#allocation2 + $0x147] sm:$0xff] }
 0x30c   : > { %9539 = vmatmul.mubr.msk.f32.gmra.mrb[10].mxu0 %vm867_vm0, %v4720_v33  ;;  %8985 = vmatprep.mubr.msk.f32.mxu1 %vm11279_vm1, %v12676_v7  ;;  %v2833_v33 = vld [vmem:[#allocation2 + $0x148] sm:$0xff] }
 0x30d   : > { %9541 = vmatprep.mubr.msk.f32.mxu0 %vm11279_vm1, %v12676_v7 }
 0x30f   : > { %8986 = vmatmul.mubr.msk.f32.gmra.mrb[58].mxu1 %vm867_vm0, %v12833_v54  ;;  %v2354_v54 = vld [vmem:[#allocation2 + $0x14f] sm:$0xff] }
 0x310   : > { %9542 = vmatmul.mubr.msk.f32.gmra.mrb[12].mxu0 %vm867_vm0, %v4721_v35  ;;  %8988 = vmatprep.mubr.msk.f32.mxu1 %vm11279_vm1, %v12676_v7  ;;  %v4750_v35 = vld [vmem:[#allocation2 + $0x143] sm:$0xff] }
 0x311   : > { %9544 = vmatprep.mubr.msk.f32.mxu0 %vm11279_vm1, %v12676_v7 }
 0x313   : > { %8989 = vmatmul.mubr.msk.f32.gmra.mrb[60].mxu1 %vm867_vm0, %v12842_v58  ;;  %v2355_v58 = vld [vmem:[#allocation2 + $0x157] sm:$0xf] }
 0x314   : > { %9545 = vmatmul.mubr.msk.f32.gmra.mrb[14].mxu0 %vm867_vm0, %v4722_v49  ;;  %8991 = vmatprep.mubr.msk.f32.mxu1 %vm11279_vm1, %v12676_v7 }
 0x315   : > { %9547 = vmatprep.mubr.msk.f32.mxu0 %vm11279_vm1, %v12676_v7 }
 0x317   : > { %8992 = vmatmul.mubr.msk.f32.gmra.mrb[62].mxu1 %vm867_vm0, %v12851_v21  ;;  %v2816_v21 = vld [vmem:[#allocation2 + $0xc0] sm:$0xff] }
 0x318   : > { %9548 = vmatmul.mubr.msk.f32.gmra.mrb[16].mxu0 %vm867_vm0, %v4723_v37  ;;  %8994 = vmatprep.mubr.msk.f32.mxu1 %vm11279_vm1, %v12676_v7 }
 0x319   : > { %9550 = vmatprep.mubr.msk.f32.mxu0 %vm11279_vm1, %v12676_v7 }
 0x31b   : > { %8995 = vmatmul.mubr.msk.f32.gmra.mrb[64].mxu1 %vm867_vm0, %v12860_v25  ;;  %v2817_v25 = vld [vmem:[#allocation2 + $0xc8] sm:$0xff] }
 0x31c   : > { %9551 = vmatmul.mubr.msk.f32.gmra.mrb[18].mxu0 %vm867_vm0, %v4724_v39  ;;  %8997 = vmatprep.mubr.msk.f32.mxu1 %vm11279_vm1, %v12676_v7  ;;  %v2834_v39 = vld [vmem:[#allocation2 + $0x150] sm:$0xff] }
 0x31d   : > { %9553 = vmatprep.mubr.msk.f32.mxu0 %vm11279_vm1, %v12676_v7 }
 0x31f   : > { %8998 = vmatmul.mubr.msk.f32.gmra.mrb[66].mxu1 %vm867_vm0, %v12869_v30  ;;  %v2818_v30 = vld [vmem:[#allocation2 + $0xd0] sm:$0xff] }
 0x320   : > { %9554 = vmatmul.mubr.msk.f32.gmra.mrb[20].mxu0 %vm867_vm0, %v4725_v42  ;;  %9000 = vmatprep.mubr.msk.f32.mxu1 %vm11279_vm1, %v12676_v7  ;;  %v4751_v42 = vld [vmem:[#allocation2 + $0x14b] sm:$0xff] }
 0x321   : > { %9556 = vmatprep.mubr.msk.f32.mxu0 %vm11279_vm1, %v12676_v7 }
 0x323   : > { %9001 = vmatmul.mubr.msk.f32.gmra.mrb[68].mxu1 %vm867_vm0, %v12878_v34  ;;  %v2819_v34 = vld [vmem:[#allocation2 + $0xd8] sm:$0xff] }
 0x324   : > { %9557 = vmatmul.mubr.msk.f32.gmra.mrb[22].mxu0 %vm867_vm0, %v4726_v57  ;;  %9003 = vmatprep.mubr.msk.f32.mxu1 %vm11279_vm1, %v12676_v7 }
 0x325   : > { %9559 = vmatprep.mubr.msk.f32.mxu0 %vm11279_vm1, %v12676_v7 }
 0x327   : > { %9004 = vmatmul.mubr.msk.f32.gmra.mrb[70].mxu1 %vm867_vm0, %v12887_v36  ;;  %v2820_v36 = vld [vmem:[#allocation2 + $0xe0] sm:$0xff] }
 0x328   : > { %9560 = vmatmul.mubr.msk.f32.gmra.mrb[24].mxu0 %vm867_vm0, %v4727_v44  ;;  %9006 = vmatprep.mubr.msk.f32.mxu1 %vm11279_vm1, %v12676_v7 }
 0x329   : > { %9562 = vmatprep.mubr.msk.f32.mxu0 %vm11279_vm1, %v12676_v7 }
 0x32b   : > { %9007 = vmatmul.mubr.msk.f32.gmra.mrb[72].mxu1 %vm867_vm0, %v12896_v41  ;;  %v2821_v41 = vld [vmem:[#allocation2 + $0xe8] sm:$0xff] }
 0x32c   : > { %9563 = vmatmul.mubr.msk.f32.gmra.mrb[26].mxu0 %vm867_vm0, %v4728_v47  ;;  %9009 = vmatprep.mubr.msk.f32.mxu1 %vm11279_vm1, %v12676_v7  ;;  %v2835_v47 = vld [vmem:[#allocation2 + $0x158] sm:$0xf] }
 0x32d   : > { %9565 = vmatprep.mubr.msk.f32.mxu0 %vm11279_vm1, %v12676_v7 }
 0x32f   : > { %9010 = vmatmul.mubr.msk.f32.gmra.mrb[74].mxu1 %vm867_vm0, %v12905_v43  ;;  %v2822_v43 = vld [vmem:[#allocation2 + $0xf0] sm:$0xff] }
 0x330   : > { %9566 = vmatmul.mubr.msk.f32.gmra.mrb[28].mxu0 %vm867_vm0, %v4729_v51  ;;  %9012 = vmatprep.mubr.msk.f32.mxu1 %vm11279_vm1, %v12676_v7  ;;  %v4752_v51 = vld [vmem:[#allocation2 + $0x153] sm:$0xff] }
 0x331   : > { %9568 = vmatprep.mubr.msk.f32.mxu0 %vm11279_vm1, %v12676_v7 }
 0x333   : > { %9013 = vmatmul.mubr.msk.f32.gmra.mrb[76].mxu1 %vm867_vm0, %v2353_v1 }
 0x334   : > { %9569 = vmatmul.mubr.msk.f32.gmra.mrb[30].mxu0 %vm867_vm0, %v4730_v52  ;;  %9015 = vmatprep.mubr.msk.f32.mxu1 %vm11279_vm1, %v12676_v7 }
 0x335   : > { %9571 = vmatprep.mubr.msk.f32.mxu0 %vm11279_vm1, %v12676_v7 }
 0x337   : > { %9016 = vmatmul.mubr.msk.f32.gmra.mrb[78].mxu1 %vm867_vm0, %v2354_v54  ;;  %v4753_v54 = vld [vmem:[#allocation2 + $0x15b] sm:$0xff] }
 0x338   : > { %9572 = vmatmul.mubr.msk.f32.gmra.mrb[32].mxu0 %vm867_vm0, %v4731_v18  ;;  %9018 = vmatprep.mubr.msk.f32.mxu1 %vm11279_vm1, %v12676_v7 }
 0x339   : > { %9574 = vmatprep.mubr.msk.f32.mxu0 %vm11279_vm1, %v12676_v7 }
 0x33b   : > { %9019 = vmatmul.mubr.msk.f32.gmra.mrb[80].mxu1 %vm867_vm0, %v2355_v58  ;;  %v4754_v58 = vld [vmem:[#allocation2 + $0x163] sm:$0xff] }
 0x33c   : > { %9575 = vmatmul.mubr.msk.f32.gmra.mrb[34].mxu0 %vm867_vm0, %v4732_v20  ;;  %9086 = vmatprep.mubr.msk.f32.mxu1 %vm11279_vm1, %v12676_v7 }
 0x33d   : > { %9577 = vmatprep.mubr.msk.f32.mxu0 %vm11279_vm1, %v12676_v7 }
 0x33f   : > { %9087 = vmatmul.mubr.msk.f32.vlgmr.msra.gmra.mrb[42].mxu1 %vm867_vm0, %v2816_v21 }
 0x340   : > { %9578 = vmatmul.mubr.msk.f32.gmra.mrb[36].mxu0 %vm867_vm0, %v4733_v23  ;;  %9089 = vmatprep.mubr.msk.f32.mxu1 %vm11279_vm1, %v12676_v7  ;;  %v4755_v23 = vld [vmem:[#allocation2 + $0x16b] sm:$0xf] }
 0x341   : > { %9580 = vmatprep.mubr.msk.f32.mxu0 %vm11279_vm1, %v12676_v7 }
 0x343   : > { %9090 = vmatmul.mubr.msk.f32.gmra.mrb[44].mxu1 %vm867_vm0, %v2817_v25 }
 0x344   : > { %9581 = vmatmul.mubr.msk.f32.gmra.mrb[38].mxu0 %vm867_vm0, %v4734_v28  ;;  %9092 = vmatprep.mubr.msk.f32.mxu1 %vm11279_vm1, %v12676_v7 }
 0x345   : > { %9583 = vmatprep.mubr.msk.f32.mxu0 %vm11279_vm1, %v12676_v7 }
 0x347   : > { %9093 = vmatmul.mubr.msk.f32.gmra.mrb[46].mxu1 %vm867_vm0, %v2818_v30 }
 0x348   : > { %9584 = vmatmul.mubr.msk.f32.gmra.mrb[40].mxu0 %vm867_vm0, %v4735_v32  ;;  %9095 = vmatprep.mubr.msk.f32.mxu1 %vm11279_vm1, %v12676_v7 }
 0x349   : > { %9586 = vmatprep.mubr.msk.f32.mxu0 %vm11279_vm1, %v12676_v7 }
 0x34b   : > { %9096 = vmatmul.mubr.msk.f32.gmra.mrb[48].mxu1 %vm867_vm0, %v2819_v34 }
 0x34c   : > { %9587 = vmatmul.mubr.msk.f32.gmra.mrb[42].mxu0 %vm867_vm0, %v4736_v48  ;;  %9098 = vmatprep.mubr.msk.f32.mxu1 %vm11279_vm1, %v12676_v7 }
 0x34d   : > { %9589 = vmatprep.mubr.msk.f32.mxu0 %vm11279_vm1, %v12676_v7 }
 0x34f   : > { %9099 = vmatmul.mubr.msk.f32.gmra.mrb[50].mxu1 %vm867_vm0, %v2820_v36 }
 0x350   : > { %9590 = vmatmul.mubr.msk.f32.gmra.mrb[44].mxu0 %vm867_vm0, %v4737_v38  ;;  %9101 = vmatprep.mubr.msk.f32.mxu1 %vm11279_vm1, %v12676_v7 }
 0x351   : > { %9592 = vmatprep.mubr.msk.f32.mxu0 %vm11279_vm1, %v12676_v7 }
 0x353   : > { %9102 = vmatmul.mubr.msk.f32.gmra.mrb[52].mxu1 %vm867_vm0, %v2821_v41 }
 0x354   : > { %9593 = vmatmul.mubr.msk.f32.gmra.mrb[46].mxu0 %vm867_vm0, %v4738_v56  ;;  %9104 = vmatprep.mubr.msk.f32.mxu1 %vm11279_vm1, %v12676_v7 }
 0x355   : > { %9595 = vmatprep.mubr.msk.f32.mxu0 %vm11279_vm1, %v12676_v7 }
 0x357   : > { %9105 = vmatmul.mubr.msk.f32.gmra.mrb[54].mxu1 %vm867_vm0, %v2822_v43 }
 0x358   : > { %9596 = vmatmul.mubr.msk.f32.gmra.mrb[48].mxu0 %vm867_vm0, %v4739_v46  ;;  %9107 = vmatprep.mubr.msk.f32.mxu1 %vm11279_vm1, %v12676_v7 }
 0x359   : > { %9598 = vmatprep.mubr.msk.f32.mxu0 %vm11279_vm1, %v12676_v7 }
 0x35b   : > { %9108 = vmatmul.mubr.msk.f32.gmra.mrb[56].mxu1 %vm867_vm0, %v2823_v50 }
 0x35c   : > { %9599 = vmatmul.mubr.msk.f32.gmra.mrb[50].mxu0 %vm867_vm0, %v4740_v3  ;;  %9110 = vmatprep.mubr.msk.f32.mxu1 %vm11279_vm1, %v12676_v7 }
 0x35d   : > { %9601 = vmatprep.mubr.msk.f32.mxu0 %vm11279_vm1, %v12676_v7 }
 0x35f   : > { %9111 = vmatmul.mubr.msk.f32.gmra.mrb[58].mxu1 %vm867_vm0, %v2824_v14 }
 0x360   : > { %9602 = vmatmul.mubr.msk.f32.gmra.mrb[52].mxu0 %vm867_vm0, %v4741_v16  ;;  %9113 = vmatprep.mubr.msk.f32.mxu1 %vm11279_vm1, %v12676_v7 }
 0x361   : > { %9604 = vmatprep.mubr.msk.f32.mxu0 %vm11279_vm1, %v12676_v7 }
 0x363   : > { %9114 = vmatmul.mubr.msk.f32.gmra.mrb[60].mxu1 %vm867_vm0, %v2825_v19 }
 0x364   : > { %9605 = vmatmul.mubr.msk.f32.gmra.mrb[54].mxu0 %vm867_vm0, %v4742_v53  ;;  %9116 = vmatprep.mubr.msk.f32.mxu1 %vm11279_vm1, %v12676_v7 }
 0x365   : > { %9607 = vmatprep.mubr.msk.f32.mxu0 %vm11279_vm1, %v12676_v7 }
 0x367   : > { %9117 = vmatmul.mubr.msk.f32.gmra.mrb[62].mxu1 %vm867_vm0, %v2826_v55 }
 0x368   : > { %9608 = vmatmul.mubr.msk.f32.gmra.mrb[56].mxu0 %vm867_vm0, %v4743_v59  ;;  %9119 = vmatprep.mubr.msk.f32.mxu1 %vm11279_vm1, %v12676_v7 }
 0x369   : > { %9610 = vmatprep.mubr.msk.f32.mxu0 %vm11279_vm1, %v12676_v7 }
 0x36b   : > { %9120 = vmatmul.mubr.msk.f32.gmra.mrb[64].mxu1 %vm867_vm0, %v2827_v10 }
 0x36c   : > { %9611 = vmatmul.mubr.msk.f32.gmra.mrb[58].mxu0 %vm867_vm0, %v4744_v11  ;;  %9122 = vmatprep.mubr.msk.f32.mxu1 %vm11279_vm1, %v12676_v7 }
 0x36d   : > { %9613 = vmatprep.mubr.msk.f32.mxu0 %vm11279_vm1, %v12676_v7 }
 0x36e   : > { %v13280_v60 = vpop.f32.mrb[0].mxu1 }
 0x36f   : > { %v8900_v63 = vpop.f32.mrb[1].mxu1  ;;  %9123 = vmatmul.mubr.msk.f32.gmra.mrb[66].mxu1 %vm867_vm0, %v2828_v61  ;;  %v13378_v61 = vld [vmem:[%s14091_s5] ss:$0 sm:$0xff] }
 0x370   : > { %9614 = vmatmul.mubr.msk.f32.gmra.mrb[60].mxu0 %vm867_vm0, %v4745_v62  ;;  %9125 = vmatprep.mubr.msk.f32.mxu1 %vm11279_vm1, %v12676_v7 }
 0x371   : > { %9616 = vmatprep.mubr.msk.f32.mxu0 %vm11279_vm1, %v12676_v7 }
 0x372   : > { %v13288_v4 = vpop.f32.mrb[2].mxu1 }
 0x373   : > { %v8903_v6 = vpop.f32.mrb[3].mxu1  ;;  %9126 = vmatmul.mubr.msk.f32.gmra.mrb[68].mxu1 %vm867_vm0, %v2829_v5  ;;  %v13384_v5 = vld [vmem:[%s14092_s6] ss:$0 sm:$0xff] }
 0x374   : > { %9617 = vmatmul.mubr.msk.f32.gmra.mrb[62].mxu0 %vm867_vm0, %v4746_v15  ;;  %9128 = vmatprep.mubr.msk.f32.mxu1 %vm11279_vm1, %v12676_v7 }
 0x375   : > { %9619 = vmatprep.mubr.msk.f32.mxu0 %vm11279_vm1, %v12676_v7 }
 0x376   : > { %v13296_v8 = vpop.f32.mrb[4].mxu1 }
 0x377   : > { %v8906_v9 = vpop.f32.mrb[5].mxu1  ;;  %9129 = vmatmul.mubr.msk.f32.gmra.mrb[70].mxu1 %vm867_vm0, %v2830_v27 }
 0x378   : > { %9620 = vmatmul.mubr.msk.f32.gmra.mrb[64].mxu0 %vm867_vm0, %v4747_v40  ;;  %9131 = vmatprep.mubr.msk.f32.mxu1 %vm11279_vm1, %v12676_v7 }
 0x379   : > { %9622 = vmatprep.mubr.msk.f32.mxu0 %vm11279_vm1, %v12676_v7 }
 0x37a   : > { %v13304_v12 = vpop.f32.mrb[6].mxu1 }
 0x37b   : > { %v8909_v45 = vpop.f32.mrb[7].mxu1  ;;  %9132 = vmatmul.mubr.msk.f32.gmra.mrb[72].mxu1 %vm867_vm0, %v2831_v13 }
 0x37c   : > { %9623 = vmatmul.mubr.msk.f32.gmra.mrb[66].mxu0 %vm867_vm0, %v4748_v17  ;;  %9134 = vmatprep.mubr.msk.f32.mxu1 %vm11279_vm1, %v12676_v7 }
 0x37d   : > { %9625 = vmatprep.mubr.msk.f32.mxu0 %vm11279_vm1, %v12676_v7 }
 0x37e   : > { %v13312_v22 = vpop.f32.mrb[8].mxu1 }
 0x37f   : > { %v8912_v29 = vpop.f32.mrb[9].mxu1  ;;  %9135 = vmatmul.mubr.msk.f32.gmra.mrb[74].mxu1 %vm867_vm0, %v2832_v24 }
 0x380   : > { %9626 = vmatmul.mubr.msk.f32.gmra.mrb[68].mxu0 %vm867_vm0, %v4749_v26  ;;  %9137 = vmatprep.mubr.msk.f32.mxu1 %vm11279_vm1, %v12676_v7 }
 0x381   : > { %9628 = vmatprep.mubr.msk.f32.mxu0 %vm11279_vm1, %v12676_v7 }
 0x382   : > { %v13320_v31 = vpop.f32.mrb[10].mxu1 }
 0x383   : > { %v8915_v49 = vpop.f32.mrb[11].mxu1  ;;  %9138 = vmatmul.mubr.msk.f32.gmra.mrb[76].mxu1 %vm867_vm0, %v2833_v33 }
 0x384   : > { %9629 = vmatmul.mubr.msk.f32.gmra.mrb[70].mxu0 %vm867_vm0, %v4750_v35  ;;  %9140 = vmatprep.mubr.msk.f32.mxu1 %vm11279_vm1, %v12676_v7 }
 0x385   : > { %9631 = vmatprep.mubr.msk.f32.mxu0 %vm11279_vm1, %v12676_v7 }
 0x386   : > { %v13328_v37 = vpop.f32.mrb[12].mxu1 }
 0x387   : > { %v8918_v57 = vpop.f32.mrb[13].mxu1  ;;  %9141 = vmatmul.mubr.msk.f32.gmra.mrb[78].mxu1 %vm867_vm0, %v2834_v39 }
 0x388   : > { %9632 = vmatmul.mubr.msk.f32.gmra.mrb[72].mxu0 %vm867_vm0, %v4751_v42  ;;  %9143 = vmatprep.mubr.msk.f32.mxu1 %vm11279_vm1, %v12676_v7 }
 0x389   : > { %9634 = vmatprep.mubr.msk.f32.mxu0 %vm11279_vm1, %v12676_v7 }
 0x38a   : > { %v13336_v44 = vpop.f32.mrb[14].mxu1 }
 0x38b   : > { %v8921_v1 = vpop.f32.mrb[15].mxu1  ;;  %9144 = vmatmul.mubr.msk.f32.gmra.mrb[80].mxu1 %vm867_vm0, %v2835_v47 }
 0x38c   : > { %9635 = vmatmul.mubr.msk.f32.gmra.mrb[74].mxu0 %vm867_vm0, %v4752_v51 }
 0x38d   : > { %9637 = vmatprep.mubr.msk.f32.mxu0 %vm11279_vm1, %v12676_v7 }
 0x38e   : > { %v13342_v52 = vpop.f32.mrb[16].mxu1 }
 0x38f   : > { %v8924_v18 = vpop.f32.mrb[17].mxu1 }
 0x390   : > { %9638 = vmatmul.mubr.msk.f32.gmra.mrb[76].mxu0 %vm867_vm0, %v4753_v54 }
 0x391   : > { %9640 = vmatprep.mubr.msk.f32.mxu0 %vm11279_vm1, %v12676_v7 }
 0x392   : > { %v13347_v20 = vpop.f32.mrb[18].mxu1 }
 0x393   : > { %v8927_v21 = vpop.f32.mrb[19].mxu1 }
 0x394   : > { %9641 = vmatmul.mubr.msk.f32.gmra.mrb[78].mxu0 %vm867_vm0, %v4754_v58 }
 0x395   : > { %9643 = vmatprep.mubr.msk.f32.mxu0 %vm11279_vm1, %v12676_v7 }
 0x396   : > { %v13352_v25 = vpop.f32.mrb[20].mxu1 }
 0x397   : > { %v8930_v28 = vpop.f32.mrb[21].mxu1 }
 0x398   : > { %9644 = vmatmul.mubr.msk.f32.gmra.mrb[80].mxu0 %vm867_vm0, %v4755_v23 }
 0x39a   : > { %v13355_v30 = vpop.f32.mrb[22].mxu1 }
 0x39b   : > { %v8933_v32 = vpop.f32.mrb[23].mxu1 }
 0x39e   : > { %v13357_v34 = vpop.f32.mrb[24].mxu1 }
 0x39f   : > { %v8936_v48 = vpop.f32.mrb[25].mxu1 }
 0x3a2   : > { %v13359_v36 = vpop.f32.mrb[26].mxu1 }
 0x3a3   : > { %v8939_v38 = vpop.f32.mrb[27].mxu1 }
 0x3a6   : > { %v13361_v41 = vpop.f32.mrb[28].mxu1 }
 0x3a7   : > { %v8942_v56 = vpop.f32.mrb[29].mxu1 }
 0x3aa   : > { %v13363_v43 = vpop.f32.mrb[30].mxu1 }
 0x3ab   : > { %v8945_v7 = vpop.f32.mrb[31].mxu1 }
 0x3ae   : > { %v13365_v46 = vpop.f32.mrb[32].mxu1 }
 0x3af   : > { %v8948_v50 = vpop.f32.mrb[33].mxu1 }
 0x3b2   : > { %v13367_v3 = vpop.f32.mrb[34].mxu1 }
 0x3b3   : > { %v8951_v14 = vpop.f32.mrb[35].mxu1 }
 0x3b6   : > { %v13369_v16 = vpop.f32.mrb[36].mxu1 }
 0x3b7   : > { %v8954_v19 = vpop.f32.mrb[37].mxu1 }
 0x3ba   : > { %v13371_v53 = vpop.f32.mrb[38].mxu1 }
 0x3bb   : > { %v8957_v55 = vpop.f32.mrb[39].mxu1 }
 0x3be   : > { %v13373_v59 = vpop.f32.mrb[40].mxu1 }
 0x3bf   : > { %v8960_v10 = vpop.f32.mrb[41].mxu1 }
 0x3cb   : > { %v4950_v11 = vpop.f32.mrb[0].mxu0 }
 0x3cc   : > { %v10568_v62 = vadd.f32 %v4950_v11, %v13280_v60  ;;  %v9525_v63 = vpop.f32.mrb[1].mxu0 }
 0x3ce   : > { %v5202_v15 = vmul.f32 %v10568_v62, %v13378_v61 }
 0x3cf   : > { %v4955_v6 = vpop.f32.mrb[2].mxu0 }
 0x3d0   : > { %v5250_v27 = vadd.f32 %v13384_v5, %v5202_v15  ;;  %v10569_v40 = vadd.f32 %v4955_v6, %v13288_v4  ;;  %v9528_v9 = vpop.f32.mrb[3].mxu0 }
 0x3d2   : > { %v5291_v13 = vmax.f32 %v5250_v27, 0.0  ;;  %v5203_v17 = vmul.f32 %v10569_v40, %v13378_v61 }
 0x3d3   : > { %v4960_v45 = vpop.f32.mrb[4].mxu0 }
 0x3d4   : > { %5349 = vst [vmem:[#allocation4] sm:$0xff] %v5291_v13  ;;  %v5251_v60 = vadd.f32 %v13384_v5, %v5203_v17  ;;  %v10570_v24 = vadd.f32 %v4960_v45, %v13296_v8  ;;  %v9531_v26 = vpop.f32.mrb[5].mxu0 }
 0x3d6   : > { %v5292_v29 = vmax.f32 %v5251_v60, 0.0  ;;  %v5204_v33 = vmul.f32 %v10570_v24, %v13378_v61 }
 0x3d7   : > { %v4965_v35 = vpop.f32.mrb[6].mxu0 }
 0x3d8   : > { %5350 = vst [vmem:[#allocation4 + $0x8] sm:$0xff] %v5292_v29  ;;  %v5252_v49 = vadd.f32 %v13384_v5, %v5204_v33  ;;  %v10571_v4 = vadd.f32 %v4965_v35, %v13304_v12  ;;  %v9534_v39 = vpop.f32.mrb[7].mxu0 }
 0x3da   : > { %v5293_v42 = vmax.f32 %v5252_v49, 0.0  ;;  %v5205_v57 = vmul.f32 %v10571_v4, %v13378_v61 }
 0x3db   : > { %v4970_v47 = vpop.f32.mrb[8].mxu0 }
 0x3dc   : > { %5351 = vst [vmem:[#allocation4 + $0x10] sm:$0xff] %v5293_v42  ;;  %v5253_v51 = vadd.f32 %v13384_v5, %v5205_v57  ;;  %v10572_v8 = vadd.f32 %v4970_v47, %v13312_v22  ;;  %v9537_v1 = vpop.f32.mrb[9].mxu0 }
 0x3de   : > { %v5294_v54 = vmax.f32 %v5253_v51, 0.0  ;;  %v5206_v18 = vmul.f32 %v10572_v8, %v13378_v61 }
 0x3df   : > { %v4975_v58 = vpop.f32.mrb[10].mxu0 }
 0x3e0   : > { %5352 = vst [vmem:[#allocation4 + $0x18] sm:$0xff] %v5294_v54  ;;  %v5254_v21 = vadd.f32 %v13384_v5, %v5206_v18  ;;  %v10573_v12 = vadd.f32 %v4975_v58, %v13320_v31  ;;  %v9540_v23 = vpop.f32.mrb[11].mxu0 }
 0x3e2   : > { %v5295_v28 = vmax.f32 %v5254_v21, 0.0  ;;  %v5207_v32 = vmul.f32 %v10573_v12, %v13378_v61 }
 0x3e3   : > { %v4980_v48 = vpop.f32.mrb[12].mxu0 }
 0x3e4   : > { %5353 = vst [vmem:[#allocation4 + $0x20] sm:$0xff] %v5295_v28  ;;  %v5255_v38 = vadd.f32 %v13384_v5, %v5207_v32  ;;  %v10574_v22 = vadd.f32 %v4980_v48, %v13328_v37  ;;  %v9543_v56 = vpop.f32.mrb[13].mxu0 }
 0x3e6   : > { %v5296_v7 = vmax.f32 %v5255_v38, 0.0  ;;  %v5208_v50 = vmul.f32 %v10574_v22, %v13378_v61 }
 0x3e7   : > { %v4985_v14 = vpop.f32.mrb[14].mxu0 }
 0x3e8   : > { %5354 = vst [vmem:[#allocation4 + $0x28] sm:$0xff] %v5296_v7  ;;  %v5256_v19 = vadd.f32 %v13384_v5, %v5208_v50  ;;  %v10575_v31 = vadd.f32 %v4985_v14, %v13336_v44  ;;  %v9546_v55 = vpop.f32.mrb[15].mxu0 }
 0x3ea   : > { %v5297_v10 = vmax.f32 %v5256_v19, 0.0  ;;  %v5209_v11 = vmul.f32 %v10575_v31, %v13378_v61 }
 0x3eb   : > { %v4990_v62 = vpop.f32.mrb[16].mxu0 }
 0x3ec   : > { %5355 = vst [vmem:[#allocation4 + $0x30] sm:$0xff] %v5297_v10  ;;  %v5257_v63 = vadd.f32 %v13384_v5, %v5209_v11  ;;  %v10576_v37 = vadd.f32 %v4990_v62, %v13342_v52  ;;  %v9549_v15 = vpop.f32.mrb[17].mxu0 }
 0x3ee   : > { %v5298_v6 = vmax.f32 %v5257_v63, 0.0  ;;  %v5210_v27 = vmul.f32 %v10576_v37, %v13378_v61 }
 0x3ef   : > { %v4995_v40 = vpop.f32.mrb[18].mxu0 }
 0x3f0   : > { %5356 = vst [vmem:[#allocation4 + $0x38] sm:$0xff] %v5298_v6  ;;  %v5258_v9 = vadd.f32 %v13384_v5, %v5210_v27  ;;  %v10577_v44 = vadd.f32 %v4995_v40, %v13347_v20  ;;  %v9552_v13 = vpop.f32.mrb[19].mxu0 }
 0x3f2   : > { %v5299_v17 = vmax.f32 %v5258_v9, 0.0  ;;  %v5211_v45 = vmul.f32 %v10577_v44, %v13378_v61 }
 0x3f3   : > { %v5000_v60 = vpop.f32.mrb[20].mxu0 }
 0x3f4   : > { %5357 = vst [vmem:[#allocation4 + $0x40] sm:$0xff] %v5299_v17  ;;  %v5259_v24 = vadd.f32 %v13384_v5, %v5211_v45  ;;  %v10578_v52 = vadd.f32 %v5000_v60, %v13352_v25  ;;  %v9555_v26 = vpop.f32.mrb[21].mxu0 }
 0x3f6   : > { %v5300_v29 = vmax.f32 %v5259_v24, 0.0  ;;  %v5212_v33 = vmul.f32 %v10578_v52, %v13378_v61 }
 0x3f7   : > { %v5005_v35 = vpop.f32.mrb[22].mxu0 }
 0x3f8   : > { %5358 = vst [vmem:[#allocation4 + $0x48] sm:$0xff] %v5300_v29  ;;  %v5260_v49 = vadd.f32 %v13384_v5, %v5212_v33  ;;  %v10579_v20 = vadd.f32 %v5005_v35, %v13355_v30  ;;  %v9558_v4 = vpop.f32.mrb[23].mxu0 }
 0x3fa   : > { %v5301_v39 = vmax.f32 %v5260_v49, 0.0  ;;  %v5213_v42 = vmul.f32 %v10579_v20, %v13378_v61 }
 0x3fb   : > { %v5010_v57 = vpop.f32.mrb[24].mxu0 }
 0x3fc   : > { %5359 = vst [vmem:[#allocation4 + $0x50] sm:$0xff] %v5301_v39  ;;  %v5261_v47 = vadd.f32 %v13384_v5, %v5213_v42  ;;  %v10580_v25 = vadd.f32 %v5010_v57, %v13357_v34  ;;  %v9561_v51 = vpop.f32.mrb[25].mxu0 }
 0x3fe   : > { %v5302_v8 = vmax.f32 %v5261_v47, 0.0  ;;  %v5214_v1 = vmul.f32 %v10580_v25, %v13378_v61 }
 0x3ff   : > { %v5015_v54 = vpop.f32.mrb[26].mxu0 }
 0x400   : > { %5360 = vst [vmem:[#allocation4 + $0x58] sm:$0xff] %v5302_v8  ;;  %v5262_v18 = vadd.f32 %v13384_v5, %v5214_v1  ;;  %v10581_v30 = vadd.f32 %v5015_v54, %v13359_v36  ;;  %v9564_v58 = vpop.f32.mrb[27].mxu0 }
 0x402   : > { %v5303_v21 = vmax.f32 %v5262_v18, 0.0  ;;  %v5215_v12 = vmul.f32 %v10581_v30, %v13378_v61 }
 0x403   : > { %v5020_v23 = vpop.f32.mrb[28].mxu0 }
 0x404   : > { %5361 = vst [vmem:[#allocation4 + $0x60] sm:$0xff] %v5303_v21  ;;  %v5263_v28 = vadd.f32 %v13384_v5, %v5215_v12  ;;  %v10582_v34 = vadd.f32 %v5020_v23, %v13361_v41  ;;  %v9567_v32 = vpop.f32.mrb[29].mxu0 }
 0x406   : > { %v5304_v48 = vmax.f32 %v5263_v28, 0.0  ;;  %v5216_v38 = vmul.f32 %v10582_v34, %v13378_v61 }
 0x407   : > { %v5025_v22 = vpop.f32.mrb[30].mxu0 }
 0x408   : > { %5362 = vst [vmem:[#allocation4 + $0x68] sm:$0xff] %v5304_v48  ;;  %v5264_v56 = vadd.f32 %v13384_v5, %v5216_v38  ;;  %v10583_v36 = vadd.f32 %v5025_v22, %v13363_v43  ;;  %v9570_v7 = vpop.f32.mrb[31].mxu0 }
 0x40a   : > { %v5305_v50 = vmax.f32 %v5264_v56, 0.0  ;;  %v5217_v14 = vmul.f32 %v10583_v36, %v13378_v61 }
 0x40b   : > { %v5030_v19 = vpop.f32.mrb[32].mxu0 }
 0x40c   : > { %5363 = vst [vmem:[#allocation4 + $0x70] sm:$0xff] %v5305_v50  ;;  %v5265_v31 = vadd.f32 %v13384_v5, %v5217_v14  ;;  %v10584_v41 = vadd.f32 %v5030_v19, %v13365_v46  ;;  %v9573_v55 = vpop.f32.mrb[33].mxu0 }
 0x40e   : > { %v5306_v10 = vmax.f32 %v5265_v31, 0.0  ;;  %v5218_v11 = vmul.f32 %v10584_v41, %v13378_v61 }
 0x40f   : > { %v5035_v62 = vpop.f32.mrb[34].mxu0 }
 0x410   : > { %5364 = vst [vmem:[#allocation4 + $0x78] sm:$0xff] %v5306_v10  ;;  %v5266_v63 = vadd.f32 %v13384_v5, %v5218_v11  ;;  %v10585_v43 = vadd.f32 %v5035_v62, %v13367_v3  ;;  %v9576_v37 = vpop.f32.mrb[35].mxu0 }
 0x412   : > { %v5307_v15 = vmax.f32 %v5266_v63, 0.0  ;;  %v5219_v6 = vmul.f32 %v10585_v43, %v13378_v61  ;;  %v3135_v27 = vpop.f32.mrb[42].mxu1 }
 0x413   : > { %v5040_v40 = vpop.f32.mrb[36].mxu0  ;;  %v9088_v44 = vpop.f32.mrb[43].mxu1 }
 0x414   : > { %5365 = vst [vmem:[#allocation4 + $0x80] sm:$0xff] %v5307_v15  ;;  %v5267_v9 = vadd.f32 %v13384_v5, %v5219_v6  ;;  %v10586_v46 = vadd.f32 %v5040_v40, %v13369_v16  ;;  %v9579_v13 = vpop.f32.mrb[37].mxu0 }
 0x416   : > { %v5308_v17 = vmax.f32 %v5267_v9, 0.0  ;;  %v5220_v45 = vmul.f32 %v10586_v46, %v13378_v61  ;;  %v3140_v60 = vpop.f32.mrb[44].mxu1 }
 0x417   : > { %v5045_v24 = vpop.f32.mrb[38].mxu0  ;;  %v9091_v26 = vpop.f32.mrb[45].mxu1 }
 0x418   : > { %5366 = vst [vmem:[#allocation4 + $0x88] sm:$0xff] %v5308_v17  ;;  %v5268_v3 = vadd.f32 %v13384_v5, %v5220_v45  ;;  %v10587_v52 = vadd.f32 %v5045_v24, %v13371_v53  ;;  %v9582_v29 = vpop.f32.mrb[39].mxu0 }
 0x41a   : > { %v5309_v33 = vmax.f32 %v5268_v3, 0.0  ;;  %v5221_v35 = vmul.f32 %v10587_v52, %v13378_v61  ;;  %v3145_v49 = vpop.f32.mrb[46].mxu1 }
 0x41b   : > { %v5050_v20 = vpop.f32.mrb[40].mxu0  ;;  %v9094_v39 = vpop.f32.mrb[47].mxu1 }
 0x41c   : > { %5367 = vst [vmem:[#allocation4 + $0x90] sm:$0xff] %v5309_v33  ;;  %v5269_v16 = vadd.f32 %v13384_v5, %v5221_v35  ;;  %v10588_v4 = vadd.f32 %v5050_v20, %v13373_v59  ;;  %v9585_v42 = vpop.f32.mrb[41].mxu0 }
 0x41e   : > { %v5310_v57 = vmax.f32 %v5269_v16, 0.0  ;;  %v5222_v47 = vmul.f32 %v10588_v4, %v13378_v61  ;;  %v3150_v25 = vpop.f32.mrb[48].mxu1 }
 0x41f   : > { %v5055_v51 = vpop.f32.mrb[42].mxu0  ;;  %v9097_v1 = vpop.f32.mrb[49].mxu1 }
 0x420   : > { %5368 = vst [vmem:[#allocation4 + $0x98] sm:$0xff] %v5310_v57  ;;  %v5270_v53 = vadd.f32 %v13384_v5, %v5222_v47  ;;  %v10589_v8 = vadd.f32 %v5055_v51, %v3135_v27  ;;  %v9588_v54 = vpop.f32.mrb[43].mxu0 }
 0x422   : > { %v5311_v18 = vmax.f32 %v5270_v53, 0.0  ;;  %v5223_v30 = vmul.f32 %v10589_v8, %v13378_v61  ;;  %v3155_v58 = vpop.f32.mrb[50].mxu1 }
 0x423   : > { %v5060_v21 = vpop.f32.mrb[44].mxu0  ;;  %v9100_v23 = vpop.f32.mrb[51].mxu1 }
 0x424   : > { %5369 = vst [vmem:[#allocation4 + $0xa0] sm:$0xff] %v5311_v18  ;;  %v5271_v59 = vadd.f32 %v13384_v5, %v5223_v30  ;;  %v10590_v12 = vadd.f32 %v5060_v21, %v3140_v60  ;;  %v9591_v28 = vpop.f32.mrb[45].mxu0 }
 0x426   : > { %v5312_v34 = vmax.f32 %v5271_v59, 0.0  ;;  %v5224_v32 = vmul.f32 %v10590_v12, %v13378_v61  ;;  %v3160_v48 = vpop.f32.mrb[52].mxu1 }
 0x427   : > { %v5065_v38 = vpop.f32.mrb[46].mxu0  ;;  %v9103_v36 = vpop.f32.mrb[53].mxu1 }
 0x428   : > { %5370 = vst [vmem:[#allocation4 + $0xa8] sm:$0xff] %v5312_v34  ;;  %v5272_v22 = vadd.f32 %v13384_v5, %v5224_v32  ;;  %v10591_v56 = vadd.f32 %v5065_v38, %v3145_v49  ;;  %v9594_v7 = vpop.f32.mrb[47].mxu0 }
 0x42a   : > { %v5313_v50 = vmax.f32 %v5272_v22, 0.0  ;;  %v5225_v14 = vmul.f32 %v10591_v56, %v13378_v61  ;;  %v3165_v19 = vpop.f32.mrb[54].mxu1 }
 0x42b   : > { %v5070_v31 = vpop.f32.mrb[48].mxu0  ;;  %v9106_v10 = vpop.f32.mrb[55].mxu1 }
 0x42c   : > { %5371 = vst [vmem:[#allocation4 + $0xb0] sm:$0xff] %v5313_v50  ;;  %v5273_v41 = vadd.f32 %v13384_v5, %v5225_v14  ;;  %v10592_v55 = vadd.f32 %v5070_v31, %v3150_v25  ;;  %v9597_v11 = vpop.f32.mrb[49].mxu0 }
 0x42e   : > { %v5314_v62 = vmax.f32 %v5273_v41, 0.0  ;;  %v5226_v63 = vmul.f32 %v10592_v55, %v13378_v61  ;;  %v3170_v43 = vpop.f32.mrb[56].mxu1 }
 0x42f   : > { %v5075_v37 = vpop.f32.mrb[50].mxu0  ;;  %v9109_v27 = vpop.f32.mrb[57].mxu1 }
 0x430   : > { %5372 = vst [vmem:[#allocation4 + $0xb8] sm:$0xff] %v5314_v62  ;;  %v5274_v15 = vadd.f32 %v13384_v5, %v5226_v63  ;;  %v10593_v6 = vadd.f32 %v5075_v37, %v3155_v58  ;;  %v9600_v40 = vpop.f32.mrb[51].mxu0 }
 0x432   : > { %v5315_v9 = vmax.f32 %v5274_v15, 0.0  ;;  %v5227_v46 = vmul.f32 %v10593_v6, %v13378_v61  ;;  %v3175_v44 = vpop.f32.mrb[58].mxu1 }
 0x433   : > { %v5080_v13 = vpop.f32.mrb[52].mxu0  ;;  %v9112_v60 = vpop.f32.mrb[59].mxu1 }
 0x434   : > { %5373 = vst [vmem:[#allocation4 + $0xc0] sm:$0xff] %v5315_v9  ;;  %v5275_v17 = vadd.f32 %v13384_v5, %v5227_v46  ;;  %v10594_v45 = vadd.f32 %v5080_v13, %v3160_v48  ;;  %v9603_v24 = vpop.f32.mrb[53].mxu0 }
 0x436   : > { %v5316_v3 = vmax.f32 %v5275_v17, 0.0  ;;  %v5228_v52 = vmul.f32 %v10594_v45, %v13378_v61  ;;  %v3180_v26 = vpop.f32.mrb[60].mxu1 }
 0x437   : > { %v5085_v29 = vpop.f32.mrb[54].mxu0  ;;  %v9115_v49 = vpop.f32.mrb[61].mxu1 }
 0x438   : > { %5374 = vst [vmem:[#allocation4 + $0xc8] sm:$0xff] %v5316_v3  ;;  %v5276_v33 = vadd.f32 %v13384_v5, %v5228_v52  ;;  %v10595_v35 = vadd.f32 %v5085_v29, %v3165_v19  ;;  %v9606_v20 = vpop.f32.mrb[55].mxu0 }
 0x43a   : > { %v5317_v16 = vmax.f32 %v5276_v33, 0.0  ;;  %v5229_v4 = vmul.f32 %v10595_v35, %v13378_v61  ;;  %v3185_v39 = vpop.f32.mrb[62].mxu1 }
 0x43b   : > { %v5090_v42 = vpop.f32.mrb[56].mxu0  ;;  %v9118_v25 = vpop.f32.mrb[63].mxu1 }
 0x43c   : > { %5375 = vst [vmem:[#allocation4 + $0xd0] sm:$0xff] %v5317_v16  ;;  %v5277_v57 = vadd.f32 %v13384_v5, %v5229_v4  ;;  %v10596_v47 = vadd.f32 %v5090_v42, %v3170_v43  ;;  %v9609_v51 = vpop.f32.mrb[57].mxu0 }
 0x43e   : > { %v5318_v53 = vmax.f32 %v5277_v57, 0.0  ;;  %v5230_v8 = vmul.f32 %v10596_v47, %v13378_v61  ;;  %v3190_v1 = vpop.f32.mrb[64].mxu1 }
 0x43f   : > { %v5095_v54 = vpop.f32.mrb[58].mxu0  ;;  %v9121_v58 = vpop.f32.mrb[65].mxu1 }
 0x440   : > { %5376 = vst [vmem:[#allocation4 + $0xd8] sm:$0xff] %v5318_v53  ;;  %v5278_v18 = vadd.f32 %v13384_v5, %v5230_v8  ;;  %v10597_v30 = vadd.f32 %v5095_v54, %v3175_v44  ;;  %v9612_v21 = vpop.f32.mrb[59].mxu0 }
 0x442   : > { %v5319_v59 = vmax.f32 %v5278_v18, 0.0  ;;  %v5231_v12 = vmul.f32 %v10597_v30, %v13378_v61  ;;  %v3195_v23 = vpop.f32.mrb[66].mxu1 }
 0x443   : > { %v5100_v28 = vpop.f32.mrb[60].mxu0  ;;  %v9124_v48 = vpop.f32.mrb[67].mxu1 }
 0x444   : > { %5377 = vst [vmem:[#allocation4 + $0xe0] sm:$0xff] %v5319_v59  ;;  %v5279_v34 = vadd.f32 %v13384_v5, %v5231_v12  ;;  %v10598_v32 = vadd.f32 %v5100_v28, %v3180_v26  ;;  %v9615_v38 = vpop.f32.mrb[61].mxu0 }
 0x446   : > { %v5320_v22 = vmax.f32 %v5279_v34, 0.0  ;;  %v5232_v56 = vmul.f32 %v10598_v32, %v13378_v61  ;;  %v3200_v36 = vpop.f32.mrb[68].mxu1 }
 0x447   : > { %v5105_v7 = vpop.f32.mrb[62].mxu0  ;;  %v9127_v19 = vpop.f32.mrb[69].mxu1 }
 0x448   : > { %5378 = vst [vmem:[#allocation4 + $0xe8] sm:$0xff] %v5320_v22  ;;  %v5280_v50 = vadd.f32 %v13384_v5, %v5232_v56  ;;  %v10599_v14 = vadd.f32 %v5105_v7, %v3185_v39  ;;  %v9618_v31 = vpop.f32.mrb[63].mxu0 }
 0x44a   : > { %v5321_v41 = vmax.f32 %v5280_v50, 0.0  ;;  %v5233_v55 = vmul.f32 %v10599_v14, %v13378_v61  ;;  %v3205_v10 = vpop.f32.mrb[70].mxu1 }
 0x44b   : > { %v5110_v11 = vpop.f32.mrb[64].mxu0  ;;  %v9130_v43 = vpop.f32.mrb[71].mxu1 }
 0x44c   : > { %5379 = vst [vmem:[#allocation4 + $0xf0] sm:$0xff] %v5321_v41  ;;  %v5281_v62 = vadd.f32 %v13384_v5, %v5233_v55  ;;  %v10600_v63 = vadd.f32 %v5110_v11, %v3190_v1  ;;  %v9621_v37 = vpop.f32.mrb[65].mxu0 }
 0x44e   : > { %v5322_v15 = vmax.f32 %v5281_v62, 0.0  ;;  %v5234_v6 = vmul.f32 %v10600_v63, %v13378_v61  ;;  %v3210_v27 = vpop.f32.mrb[72].mxu1 }
 0x44f   : > { %v5115_v40 = vpop.f32.mrb[66].mxu0  ;;  %v9133_v44 = vpop.f32.mrb[73].mxu1 }
 0x450   : > { %5380 = vst [vmem:[#allocation4 + $0xf8] sm:$0xff] %v5322_v15  ;;  %v5282_v9 = vadd.f32 %v13384_v5, %v5234_v6  ;;  %v10601_v46 = vadd.f32 %v5115_v40, %v3195_v23  ;;  %v9624_v13 = vpop.f32.mrb[67].mxu0 }
 0x452   : > { %v5323_v17 = vmax.f32 %v5282_v9, 0.0  ;;  %v5235_v45 = vmul.f32 %v10601_v46, %v13378_v61  ;;  %v3215_v60 = vpop.f32.mrb[74].mxu1 }
 0x453   : > { %v5120_v24 = vpop.f32.mrb[68].mxu0  ;;  %v9136_v26 = vpop.f32.mrb[75].mxu1 }
 0x454   : > { %5381 = vst [vmem:[#allocation4 + $0x100] sm:$0xff] %v5323_v17  ;;  %v5283_v3 = vadd.f32 %v13384_v5, %v5235_v45  ;;  %v10602_v52 = vadd.f32 %v5120_v24, %v3200_v36  ;;  %v9627_v29 = vpop.f32.mrb[69].mxu0 }
 0x456   : > { %v5324_v33 = vmax.f32 %v5283_v3, 0.0  ;;  %v5236_v35 = vmul.f32 %v10602_v52, %v13378_v61  ;;  %v3220_v49 = vpop.f32.mrb[76].mxu1 }
 0x457   : > { %v5125_v20 = vpop.f32.mrb[70].mxu0  ;;  %v9139_v39 = vpop.f32.mrb[77].mxu1 }
 0x458   : > { %5382 = vst [vmem:[#allocation4 + $0x108] sm:$0xff] %v5324_v33  ;;  %v5284_v16 = vadd.f32 %v13384_v5, %v5236_v35  ;;  %v10603_v4 = vadd.f32 %v5125_v20, %v3205_v10  ;;  %v9630_v42 = vpop.f32.mrb[71].mxu0 }
 0x45a   : > { %v5325_v57 = vmax.f32 %v5284_v16, 0.0  ;;  %v5237_v47 = vmul.f32 %v10603_v4, %v13378_v61  ;;  %v3225_v25 = vpop.f32.mrb[78].mxu1 }
 0x45b   : > { %v5130_v51 = vpop.f32.mrb[72].mxu0  ;;  %v9142_v1 = vpop.f32.mrb[79].mxu1 }
 0x45c   : > { %5383 = vst [vmem:[#allocation4 + $0x110] sm:$0xff] %v5325_v57  ;;  %v5285_v53 = vadd.f32 %v13384_v5, %v5237_v47  ;;  %v10604_v8 = vadd.f32 %v5130_v51, %v3210_v27  ;;  %v9633_v54 = vpop.f32.mrb[73].mxu0 }
 0x45e   : > { %v5326_v18 = vmax.f32 %v5285_v53, 0.0  ;;  %v5238_v30 = vmul.f32 %v10604_v8, %v13378_v61  ;;  %v3230_v58 = vpop.f32.mrb[80].mxu1 }
 0x45f   : > { %v5135_v21 = vpop.f32.mrb[74].mxu0  ;;  %v9145_v23 = vpop.f32.mrb[81].mxu1 }
 0x460   : > { %5384 = vst [vmem:[#allocation4 + $0x118] sm:$0xff] %v5326_v18  ;;  %v5286_v59 = vadd.f32 %v13384_v5, %v5238_v30  ;;  %v10605_v12 = vadd.f32 %v5135_v21, %v3215_v60  ;;  %v9636_v28 = vpop.f32.mrb[75].mxu0 }
 0x462   : > { %v5327_v34 = vmax.f32 %v5286_v59, 0.0  ;;  %v5239_v32 = vmul.f32 %v10605_v12, %v13378_v61 }
 0x463   : > { %v5140_v48 = vpop.f32.mrb[76].mxu0 }
 0x464   : > { %5385 = vst [vmem:[#allocation4 + $0x120] sm:$0xff] %v5327_v34  ;;  %v5287_v38 = vadd.f32 %v13384_v5, %v5239_v32  ;;  %v10606_v22 = vadd.f32 %v5140_v48, %v3220_v49  ;;  %v9639_v56 = vpop.f32.mrb[77].mxu0 }
 0x466   : > { %v5328_v36 = vmax.f32 %v5287_v38, 0.0  ;;  %v5240_v7 = vmul.f32 %v10606_v22, %v13378_v61 }
 0x467   : > { %v5145_v50 = vpop.f32.mrb[78].mxu0 }
 0x468   : > { %5386 = vst [vmem:[#allocation4 + $0x128] sm:$0xff] %v5328_v36  ;;  %v5288_v14 = vadd.f32 %v13384_v5, %v5240_v7  ;;  %v10607_v19 = vadd.f32 %v5145_v50, %v3225_v25  ;;  %v9642_v31 = vpop.f32.mrb[79].mxu0 }
 0x46a   : > { %v5329_v41 = vmax.f32 %v5288_v14, 0.0  ;;  %v5241_v55 = vmul.f32 %v10607_v19, %v13378_v61 }
 0x46b   : > { %v5150_v10 = vpop.f32.mrb[80].mxu0 }
 0x46c   : > { %5387 = vst [vmem:[#allocation4 + $0x130] sm:$0xff] %v5329_v41  ;;  %v5289_v11 = vadd.f32 %v13384_v5, %v5241_v55  ;;  %v10608_v62 = vadd.f32 %v5150_v10, %v3230_v58  ;;  %v9645_v63 = vpop.f32.mrb[81].mxu0 }
 0x46e   : > { %v5330_v43 = vmax.f32 %v5289_v11, 0.0  ;;  %v5242_v37 = vmul.f32 %v10608_v62, %v13378_v61 }
 0x470   : > { %5388 = vst [vmem:[#allocation4 + $0x138] sm:$0xff] %v5330_v43  ;;  %v5290_v15 = vadd.f32 %v13384_v5, %v5242_v37 }
 0x472   : > { %v5331_v6 = vmax.f32 %v5290_v15, 0.0 }
 0x474   : > { %5389 = vst [vmem:[#allocation4 + $0x140] sm:$0xf] %v5331_v6 }
 0x475 LB: >> { %v11280_v27 = vmov 0.0|0.0   ;;  %s7828_s25 = smul.u32 36, %s11272_s24  ;;  %vm11281_vm4 = vmmov 0   ;;  %v11282_v61 = vmov 0.0   ;;  %vm5421_vm5 = vcmask 1041408   ;;  %s11272_s24 = sphi %s13488_s24, %s5409_s24  }
 0x476   : >> { %10344 = vmatprep.subr.bf16.mxu0 %v11280_v27  ;;  %10347 = vmatprep.subr.bf16.mxu1 %v11280_v27  ;;  %vm5417_vm6 = vcmask 146432   ;;  %s7380_s28 = smul.u32 10, %s11272_s24  ;;  %s5409_s24 = sadd.s32 1, %s11272_s24  }
 0x477   : >> { %9652 = vmatprep.mubr.msk.f32.mxu0 %vm11281_vm4, %v11282_v61  ;;  %9661 = vmatprep.mubr.msk.f32.mxu1 %vm11281_vm4, %v11282_v61  ;;  %s7385_s26 = scalar_lea.vmem %s11663_s13, %s7828_s25  ;;  %s7378_s27 = scalar_lea.vmem [#allocation4], %s7828_s25 }
 0x478   : >> { %v7837_v9 = vld [vmem:[%s7385_s26 + $0x12] sm:$0xff]  ;;  %v7838_v44 = vld [vmem:[%s7385_s26 + $0x1a] sm:$0xff]  ;;  %v7839_v45 = vld [vmem:[%s7385_s26 + $0x22] sm:$0x3]  ;;  %s7381_s29 = scalar_lea.vmem [#allocation3], %s7380_s28  ;;  %s7388_s30 = scalar_lea.vmem [#allocation5], %s7380_s28 }
 0x479   : >> { %v10348_v13 = vpack.c.bf16 %v7838_v44, %v7837_v9  ;;  %p5406_p3 = scmp.ge.s32.totalorder %s5409_s24, 8  }
 0x47a   : > { %v5623_v26 = vld [vmem:[#allocation6 + $0x80] sm:$0xff] (%p5406_p3)  ;;  %v5624_v29 = vld [vmem:[#allocation6 + $0x88] sm:$0xff] (%p5406_p3)  ;;  %v11283_v35 = vmov (%p5406_p3), 0.0|0.0   ;;  %v5625_v16 = vld [vmem:[#allocation6 + $0x90] sm:$0xff] (%p5406_p3) }
 0x47b   : >> { %v7829_v5 = vld [vmem:[%s7378_s27 + $0x12] sm:$0xff]  ;;  %v7830_v40 = vld [vmem:[%s7378_s27 + $0x1a] sm:$0xff]  ;;  %10349 = vmatpush3.bf16.msra.mxu1 %v10348_v13  ;;  %v7831_v17 = vld [vmem:[%s7378_s27 + $0x22] sm:$0x3]  ;;  %v10351_v49 = vpack.c.bf16 (%p5406_p3), %v5624_v29, %v5623_v26 }
 0x47c   : >> { %v10345_v46 = vpack.c.bf16 %v7830_v40, %v7829_v5  ;;  %9659 = vmatprep.subr.mxu1 %v11282_v61  ;;  %v5593_v33 = vld [vmem:[#allocation6] sm:$0xff] (%p5406_p3)  ;;  %v5594_v20 = vld [vmem:[#allocation6 + $0x8] sm:$0xff] (%p5406_p3)  ;;  %v5626_v4 = vld [vmem:[#allocation6 + $0x98] sm:$0xff] (%p5406_p3) }
 0x47d   : > { %v10375_v39 = vpack.c.bf16 (%p5406_p3), %v5594_v20, %v5593_v33  ;;  %v5595_v42 = vld [vmem:[#allocation6 + $0x10] sm:$0xff] (%p5406_p3)  ;;  %v10354_v57 = vpack.c.bf16 (%p5406_p3), %v5626_v4, %v5625_v16  ;;  %v5627_v25 = vld [vmem:[#allocation6 + $0xa0] sm:$0xff] (%p5406_p3)  ;;  %v5628_v51 = vld [vmem:[#allocation6 + $0xa8] sm:$0xff] (%p5406_p3) }
 0x47e   : >> { %10346 = vmatpush3.bf16.msra.mxu0 %v10345_v46  ;;  %v5597_v53 = vld [vmem:[#allocation6 + $0x20] sm:$0xff] (%p5406_p3)  ;;  %v5598_v8 = vld [vmem:[#allocation6 + $0x28] sm:$0xff] (%p5406_p3)  ;;  %v10357_v1 = vpack.c.bf16 (%p5406_p3), %v5628_v51, %v5627_v25  ;;  %v5629_v18 = vld [vmem:[#allocation6 + $0xb0] sm:$0xff] (%p5406_p3) }
 0x47f   : >> { %9650 = vmatprep.subr.mxu0 %v11282_v61  ;;  %9660 = vmatpush3.msk.msra.mxu1 %vm5421_vm5, %v7839_v45  ;;  %v10381_v54 = vpack.c.bf16 (%p5406_p3), %v5598_v8, %v5597_v53  ;;  %v5630_v30 = vld [vmem:[#allocation6 + $0xb8] sm:$0xff] (%p5406_p3)  ;;  %v5599_v58 = vld [vmem:[#allocation6 + $0x30] sm:$0xff] (%p5406_p3)  ;;  %v5631_v23 = vld [vmem:[#allocation6 + $0xc0] sm:$0xff] (%p5406_p3) }
 0x480   : >> { %9662 = vmatmul.mubr.msk.f32.vlgmr.msra.gmra.mrb[0].mxu1 %vm5417_vm6, %v11526_v2  ;;  %10374 = vmatprep.subr.bf16.mxu1 (%p5406_p3), %v11283_v35  ;;  %v5600_v21 = vld [vmem:[#allocation6 + $0x38] sm:$0xff] (%p5406_p3)  ;;  %v10360_v59 = vpack.c.bf16 (%p5406_p3), %v5630_v30, %v5629_v18  ;;  %v5632_v28 = vld [vmem:[#allocation6 + $0xc8] sm:$0xff] (%p5406_p3)  ;;  %v5601_v34 = vld [vmem:[#allocation6 + $0x40] sm:$0xff] (%p5406_p3) }
 0x481   : > { %9767 = vmatprep.mubr.msk.f32.mxu1 (%p5406_p3), %vm11279_vm1, %v11277_v0  ;;  %10376 = vmatpush3.bf16.msra.mxu1 (%p5406_p3), %v10375_v39  ;;  %v10384_v12 = vpack.c.bf16 (%p5406_p3), %v5600_v21, %v5599_v58  ;;  %v5602_v32 = vld [vmem:[#allocation6 + $0x48] sm:$0xff] (%p5406_p3)  ;;  %v10363_v48 = vpack.c.bf16 (%p5406_p3), %v5632_v28, %v5631_v23  ;;  %v5633_v22 = vld [vmem:[#allocation6 + $0xd0] sm:$0xff] (%p5406_p3)  ;;  %v5634_v56 = vld [vmem:[#allocation6 + $0xd8] sm:$0xff] (%p5406_p3) }
 0x482   : >> { %9651 = vmatpush3.msk.msra.mxu0 %vm5421_vm5, %v7831_v17  ;;  %10377 = vmatprep.subr.bf16.mxu1 (%p5406_p3), %v11283_v35  ;;  %v10387_v38 = vpack.c.bf16 (%p5406_p3), %v5602_v32, %v5601_v34  ;;  %v5603_v36 = vld [vmem:[#allocation6 + $0x50] sm:$0xff] (%p5406_p3)  ;;  %v5604_v7 = vld [vmem:[#allocation6 + $0x58] sm:$0xff] (%p5406_p3)  ;;  %v10366_v50 = vpack.c.bf16 (%p5406_p3), %v5634_v56, %v5633_v22  ;;  %v5635_v19 = vld [vmem:[#allocation6 + $0xe0] sm:$0xff] (%p5406_p3) }
 0x483   : >> { %9653 = vmatmul.mubr.msk.f32.vlgmr.msra.gmra.mrb[0].mxu0 %vm5417_vm6, %v11526_v2  ;;  %10350 = vmatprep.subr.bf16.mxu0 (%p5406_p3), %v11283_v35  ;;  %v5596_v2 = vld [vmem:[#allocation6 + $0x18] sm:$0xff] (%p5406_p3)  ;;  %v10390_v14 = vpack.c.bf16 (%p5406_p3), %v5604_v7, %v5603_v36  ;;  %v5636_v31 = vld [vmem:[#allocation6 + $0xe8] sm:$0xff] (%p5406_p3)  ;;  %v5605_v41 = vld [vmem:[#allocation6 + $0x60] sm:$0xff] (%p5406_p3) }
 0x484   : > { %9696 = vmatprep.mubr.msk.f32.mxu0 (%p5406_p3), %vm11279_vm1, %v11277_v0  ;;  %10352 = vmatpush3.bf16.msra.mxu0 (%p5406_p3), %v10351_v49  ;;  %v10378_v47 = vpack.c.bf16 (%p5406_p3), %v5596_v2, %v5595_v42  ;;  %v5606_v55 = vld [vmem:[#allocation6 + $0x68] sm:$0xff] (%p5406_p3)  ;;  %v10369_v10 = vpack.c.bf16 (%p5406_p3), %v5636_v31, %v5635_v19  ;;  %v5637_v62 = vld [vmem:[#allocation6 + $0xf0] sm:$0xff] (%p5406_p3)  ;;  %v5638_v63 = vld [vmem:[#allocation6 + $0xf8] sm:$0xff] (%p5406_p3) }
 0x485   : > { %10353 = vmatprep.subr.bf16.mxu0 (%p5406_p3), %v11283_v35  ;;  %v10393_v11 = vpack.c.bf16 (%p5406_p3), %v5606_v55, %v5605_v41  ;;  %v5607_v43 = vld [vmem:[#allocation6 + $0x70] sm:$0xff] (%p5406_p3)  ;;  %v5608_v37 = vld [vmem:[#allocation6 + $0x78] sm:$0xff] (%p5406_p3)  ;;  %v10372_v15 = vpack.c.bf16 (%p5406_p3), %v5638_v63, %v5637_v62  ;;  %v5913_v27 = vld [vmem:[#allocation6 + $0x100] sm:$0xff] (%p5406_p3) }
 0x486   : > { %10379 = vmatpush3.bf16.msra.mxu1 (%p5406_p3), %v10378_v47  ;;  %v10396_v6 = vpack.c.bf16 (%p5406_p3), %v5608_v37, %v5607_v43  ;;  %v5914_v61 = vld [vmem:[#allocation6 + $0x108] sm:$0xff] (%p5406_p3)  ;;  %v6086_v5 = vld [vmem:[#allocation6 + $0x180] sm:$0xff] (%p5406_p3)  ;;  %v5915_v17 = vld [vmem:[#allocation6 + $0x110] sm:$0xff] (%p5406_p3) }
 0x487   : > { %10380 = vmatprep.subr.bf16.mxu1 (%p5406_p3), %v11283_v35  ;;  %v6087_v40 = vld [vmem:[#allocation6 + $0x188] sm:$0xff] (%p5406_p3)  ;;  %v10399_v46 = vpack.c.bf16 (%p5406_p3), %v5914_v61, %v5913_v27  ;;  %v5916_v45 = vld [vmem:[#allocation6 + $0x118] sm:$0xff] (%p5406_p3)  ;;  %v5917_v33 = vld [vmem:[#allocation6 + $0x120] sm:$0xff] (%p5406_p3) }
 0x488   : > { %10355 = vmatpush3.bf16.msra.mxu0 (%p5406_p3), %v10354_v57  ;;  %v10423_v13 = vpack.c.bf16 (%p5406_p3), %v6087_v40, %v6086_v5  ;;  %v10402_v26 = vpack.c.bf16 (%p5406_p3), %v5916_v45, %v5915_v17  ;;  %v5918_v49 = vld [vmem:[#allocation6 + $0x128] sm:$0xff] (%p5406_p3)  ;;  %v6090_v20 = vld [vmem:[#allocation6 + $0x1a0] sm:$0xff] (%p5406_p3)  ;;  %v5919_v57 = vld [vmem:[#allocation6 + $0x130] sm:$0xff] (%p5406_p3) }
 0x489   : > { %10356 = vmatprep.subr.bf16.mxu0 (%p5406_p3), %v11283_v35  ;;  %v6091_v16 = vld [vmem:[#allocation6 + $0x1a8] sm:$0xff] (%p5406_p3)  ;;  %v10405_v42 = vpack.c.bf16 (%p5406_p3), %v5918_v49, %v5917_v33  ;;  %v5920_v47 = vld [vmem:[#allocation6 + $0x138] sm:$0xff] (%p5406_p3)  ;;  %v6092_v25 = vld [vmem:[#allocation6 + $0x1b0] sm:$0xff] (%p5406_p3) }
 0x48a   : > { %10382 = vmatpush3.bf16.msra.mxu1 (%p5406_p3), %v10381_v54  ;;  %v10429_v2 = vpack.c.bf16 (%p5406_p3), %v6091_v16, %v6090_v20  ;;  %v6093_v51 = vld [vmem:[#allocation6 + $0x1b8] sm:$0xff] (%p5406_p3)  ;;  %v5921_v18 = vld [vmem:[#allocation6 + $0x140] sm:$0xff] (%p5406_p3)  ;;  %v5922_v30 = vld [vmem:[#allocation6 + $0x148] sm:$0xff] (%p5406_p3) }
 0x48b   : > { %10383 = vmatprep.subr.bf16.mxu1 (%p5406_p3), %v11283_v35  ;;  %v10432_v54 = vpack.c.bf16 (%p5406_p3), %v6093_v51, %v6092_v25  ;;  %v6094_v58 = vld [vmem:[#allocation6 + $0x1c0] sm:$0xff] (%p5406_p3)  ;;  %v6095_v21 = vld [vmem:[#allocation6 + $0x1c8] sm:$0xff] (%p5406_p3)  ;;  %v10411_v23 = vpack.c.bf16 (%p5406_p3), %v5922_v30, %v5921_v18  ;;  %v5923_v34 = vld [vmem:[#allocation6 + $0x150] sm:$0xff] (%p5406_p3) }
 0x48c   : > { %10358 = vmatpush3.bf16.msra.mxu0 (%p5406_p3), %v10357_v1  ;;  %v10408_v1 = vpack.c.bf16 (%p5406_p3), %v5920_v47, %v5919_v57  ;;  %v10435_v28 = vpack.c.bf16 (%p5406_p3), %v6095_v21, %v6094_v58  ;;  %v5924_v32 = vld [vmem:[#allocation6 + $0x158] sm:$0xff] (%p5406_p3)  ;;  %v6098_v19 = vld [vmem:[#allocation6 + $0x1e0] sm:$0xff] (%p5406_p3)  ;;  %v6099_v31 = vld [vmem:[#allocation6 + $0x1e8] sm:$0xff] (%p5406_p3) }
 0x48d   : > { %10359 = vmatprep.subr.bf16.mxu0 (%p5406_p3), %v11283_v35  ;;  %v10414_v36 = vpack.c.bf16 (%p5406_p3), %v5924_v32, %v5923_v34  ;;  %v5927_v62 = vld [vmem:[#allocation6 + $0x170] sm:$0xff] (%p5406_p3)  ;;  %v5928_v63 = vld [vmem:[#allocation6 + $0x178] sm:$0xff] (%p5406_p3)  ;;  %v6263_v51 = vld [vmem:[#allocation6 + $0x220] sm:$0xff] (%p5406_p3) }
 0x48e   : > { %10385 = vmatpush3.bf16.msra.mxu1 (%p5406_p3), %v10384_v12  ;;  %v6100_v43 = vld [vmem:[#allocation6 + $0x1f0] sm:$0xff] (%p5406_p3)  ;;  %v6101_v37 = vld [vmem:[#allocation6 + $0x1f8] sm:$0xff] (%p5406_p3)  ;;  %v10420_v27 = vpack.c.bf16 (%p5406_p3), %v5928_v63, %v5927_v62  ;;  %v6267_v32 = vld [vmem:[#allocation6 + $0x240] sm:$0xff] (%p5406_p3) }
 0x48f   : > { %10386 = vmatprep.subr.bf16.mxu1 (%p5406_p3), %v11283_v35  ;;  %v10444_v61 = vpack.c.bf16 (%p5406_p3), %v6101_v37, %v6100_v43  ;;  %v6265_v58 = vld [vmem:[#allocation6 + $0x230] sm:$0xff] (%p5406_p3)  ;;  %v6266_v21 = vld [vmem:[#allocation6 + $0x238] sm:$0xff] (%p5406_p3)  ;;  %v6272_v62 = vld [vmem:[#allocation6 + $0x268] sm:$0xff] (%p5406_p3) }
 0x490   : > { %10361 = vmatpush3.bf16.msra.mxu0 (%p5406_p3), %v10360_v59  ;;  %v6444_v63 = vld [vmem:[#allocation6 + $0x2e0] sm:$0xff] (%p5406_p3)  ;;  %v6445_v43 = vld [vmem:[#allocation6 + $0x2e8] sm:$0xff] (%p5406_p3) }
 0x491   : > { %10362 = vmatprep.subr.bf16.mxu0 (%p5406_p3), %v11283_v35 }
 0x492   : > { %10388 = vmatpush3.bf16.msra.mxu1 (%p5406_p3), %v10387_v38  ;;  %v6097_v38 = vld [vmem:[#allocation6 + $0x1d8] sm:$0xff] (%p5406_p3) }
 0x493   : > { %10389 = vmatprep.subr.bf16.mxu1 (%p5406_p3), %v11283_v35 }
 0x494   : > { %10364 = vmatpush3.bf16.msra.mxu0 (%p5406_p3), %v10363_v48  ;;  %v6096_v48 = vld [vmem:[#allocation6 + $0x1d0] sm:$0xff] (%p5406_p3) }
 0x495   : > { %10365 = vmatprep.subr.bf16.mxu0 (%p5406_p3), %v11283_v35  ;;  %v10438_v7 = vpack.c.bf16 (%p5406_p3), %v6097_v38, %v6096_v48  ;;  %v6268_v48 = vld [vmem:[#allocation6 + $0x248] sm:$0xff] (%p5406_p3)  ;;  %v6440_v38 = vld [vmem:[#allocation6 + $0x2c0] sm:$0xff] (%p5406_p3) }
 0x496   : > { %10391 = vmatpush3.bf16.msra.mxu1 (%p5406_p3), %v10390_v14  ;;  %v5926_v14 = vld [vmem:[#allocation6 + $0x168] sm:$0xff] (%p5406_p3) }
 0x497   : > { %10392 = vmatprep.subr.bf16.mxu1 (%p5406_p3), %v11283_v35 }
 0x498   : > { %10367 = vmatpush3.bf16.msra.mxu0 (%p5406_p3), %v10366_v50  ;;  %v5925_v50 = vld [vmem:[#allocation6 + $0x160] sm:$0xff] (%p5406_p3) }
 0x499   : > { %10368 = vmatprep.subr.bf16.mxu0 (%p5406_p3), %v11283_v35 }
 0x49a   : > { %10394 = vmatpush3.bf16.msra.mxu1 (%p5406_p3), %v10393_v11  ;;  %v10441_v11 = vpack.c.bf16 (%p5406_p3), %v6099_v31, %v6098_v19  ;;  %v6442_v19 = vld [vmem:[#allocation6 + $0x2d0] sm:$0xff] (%p5406_p3)  ;;  %v6443_v31 = vld [vmem:[#allocation6 + $0x2d8] sm:$0xff] (%p5406_p3) }
 0x49b   : > { %10395 = vmatprep.subr.bf16.mxu1 (%p5406_p3), %v11283_v35 }
 0x49c   : > { %10370 = vmatpush3.bf16.msra.mxu0 (%p5406_p3), %v10369_v10  ;;  %v10417_v10 = vpack.c.bf16 (%p5406_p3), %v5926_v14, %v5925_v50  ;;  %v6269_v50 = vld [vmem:[#allocation6 + $0x250] sm:$0xff] (%p5406_p3)  ;;  %v6270_v14 = vld [vmem:[#allocation6 + $0x258] sm:$0xff] (%p5406_p3) }
 0x49d   : > { %10371 = vmatprep.subr.bf16.mxu0 (%p5406_p3), %v11283_v35 }
 0x49e   : > { %10397 = vmatpush3.bf16.msra.mxu1 (%p5406_p3), %v10396_v6 }
 0x49f   : > { %10422 = vmatprep.subr.bf16.mxu1 (%p5406_p3), %v11283_v35 }
 0x4a0   : > { %10373 = vmatpush3.bf16.msra.mxu0 (%p5406_p3), %v10372_v15 }
 0x4a1   : > { %10398 = vmatprep.subr.bf16.mxu0 (%p5406_p3), %v11283_v35 }
 0x551   : > { %5408 = sbr.rel (!%p5406_p3) target bundleno = 1141 (0x475), region = 126 }
 0x553   : >> { %v5573_v24 = vpop.f32.mrb[0].mxu1 }
 0x554   : >> { %7842 = vst.msk [vmem:[%s7388_s30 + $0xb] sm:$0xff] %vm867_vm0, %v5573_v24  ;;  %v9663_v52 = vpop.f32.mrb[1].mxu1  ;;  %v6089_v24 = vld [vmem:[#allocation6 + $0x198] sm:$0xff] (%p5406_p3) }
 0x556   : >> { %v5491_v60 = vpop.f32.mrb[0].mxu0 }
 0x557   : >> { %7834 = vst [vmem:[%s7381_s29 + $0x1b] sm:$0xff] %v5491_v60  ;;  %v9654_v3 = vpop.f32.mrb[1].mxu0  ;;  %v6088_v60 = vld [vmem:[#allocation6 + $0x190] sm:$0xff] (%p5406_p3) }
 0x558   : > { %v10426_v29 = vpack.c.bf16 %v6089_v24, %v6088_v60 }
 0x55e   : > { %v5609_v9 = vld [vmem:[#allocation3 + $0x6] sm:$0xff]  ;;  %v5610_v3 = vld [vmem:[#allocation3 + $0xe] sm:$0xff]  ;;  %v5611_v4 = vld [vmem:[#allocation3 + $0x16] sm:$0xff] }
 0x55f   : > { %v5580_v44 = vld [vmem:[#allocation3 + $0x5] sm:$0xff]  ;;  %9697 = vmatmul.mubr.f32.vlgmr.msra.gmra.mrb[0].mxu0 %v5609_v9  ;;  %v5581_v52 = vld [vmem:[#allocation3 + $0xd] sm:$0xff]  ;;  %v5582_v39 = vld [vmem:[#allocation3 + $0x15] sm:$0xff] }
 0x560   : > { %9768 = vmatmul.mubr.f32.vlgmr.msra.gmra.mrb[0].mxu1 %v5580_v44  ;;  %10400 = vmatpush3.bf16.msra.mxu0 %v10399_v46  ;;  %v5612_v53 = vld [vmem:[#allocation3 + $0x1e] sm:$0xff]  ;;  %v5613_v59 = vld [vmem:[#allocation3 + $0x26] sm:$0xff]  ;;  %v5614_v22 = vld [vmem:[#allocation3 + $0x2e] sm:$0xff] }
 0x561   : > { %9699 = vmatprep.mubr.msk.f32.mxu0 %vm11279_vm1, %v11277_v0  ;;  %10424 = vmatpush3.bf16.msra.mxu1 %v10423_v13  ;;  %v5583_v8 = vld [vmem:[#allocation3 + $0x1d] sm:$0xff]  ;;  %v5584_v12 = vld [vmem:[#allocation3 + $0x25] sm:$0xff]  ;;  %v5585_v56 = vld [vmem:[#allocation3 + $0x2d] sm:$0xff] }
 0x562   : > { %9770 = vmatprep.mubr.msk.f32.mxu1 %vm11279_vm1, %v11277_v0  ;;  %10401 = vmatprep.subr.bf16.mxu0 %v11283_v35  ;;  %v5615_v41 = vld [vmem:[#allocation3 + $0x36] sm:$0xff]  ;;  %v5616_v15 = vld [vmem:[#allocation3 + $0x3e] sm:$0xff]  ;;  %v5617_v5 = vld [vmem:[#allocation3 + $0x46] sm:$0xff] }
 0x563   : > { %9700 = vmatmul.mubr.f32.gmra.mrb[2].mxu0 %v5610_v3  ;;  %10425 = vmatprep.subr.bf16.mxu1 %v11283_v35  ;;  %v5586_v55 = vld [vmem:[#allocation3 + $0x35] sm:$0xff]  ;;  %v5587_v6 = vld [vmem:[#allocation3 + $0x3d] sm:$0xff]  ;;  %v5588_v40 = vld [vmem:[#allocation3 + $0x45] sm:$0xff] }
 0x564   : > { %9771 = vmatmul.mubr.f32.gmra.mrb[2].mxu1 %v5581_v52  ;;  %9702 = vmatprep.mubr.msk.f32.mxu0 %vm11279_vm1, %v11277_v0  ;;  %v5618_v9 = vld [vmem:[#allocation3 + $0x4e] sm:$0xff]  ;;  %v5619_v44 = vld [vmem:[#allocation3 + $0x56] sm:$0xff]  ;;  %v5620_v17 = vld [vmem:[#allocation3 + $0x5e] sm:$0xff] }
 0x565   : > { %9773 = vmatprep.mubr.msk.f32.mxu1 %vm11279_vm1, %v11277_v0  ;;  %10403 = vmatpush3.bf16.msra.mxu0 %v10402_v26  ;;  %v5589_v46 = vld [vmem:[#allocation3 + $0x4d] sm:$0xff]  ;;  %v5590_v13 = vld [vmem:[#allocation3 + $0x55] sm:$0xff]  ;;  %v5591_v45 = vld [vmem:[#allocation3 + $0x5d] sm:$0xff] }
 0x566   : > { %10427 = vmatpush3.bf16.msra.mxu1 %v10426_v29  ;;  %10404 = vmatprep.subr.bf16.mxu0 %v11283_v35  ;;  %v5621_v60 = vld [vmem:[#allocation3 + $0x66] sm:$0xf]  ;;  %v6259_v3 = vld [vmem:[#allocation6 + $0x200] sm:$0xff]  ;;  %v6072_v20 = vld [vmem:[#allocation3 + $0xf] sm:$0xff] }
 0x567   : > { %9703 = vmatmul.mubr.f32.gmra.mrb[4].mxu0 %v5611_v4  ;;  %10428 = vmatprep.subr.bf16.mxu1 %v11283_v35  ;;  %v5592_v24 = vld [vmem:[#allocation3 + $0x65] sm:$0xf]  ;;  %v6432_v26 = vld [vmem:[#allocation6 + $0x280] sm:$0xff] }
 0x568   : > { %9774 = vmatmul.mubr.f32.gmra.mrb[4].mxu1 %v5582_v39  ;;  %9705 = vmatprep.mubr.msk.f32.mxu0 %vm11279_vm1, %v11277_v0  ;;  %v6260_v52 = vld [vmem:[#allocation6 + $0x208] sm:$0xff]  ;;  %v6261_v4 = vld [vmem:[#allocation6 + $0x210] sm:$0xff]  ;;  %v6262_v39 = vld [vmem:[#allocation6 + $0x218] sm:$0xff] }
 0x569   : > { %9776 = vmatprep.mubr.msk.f32.mxu1 %vm11279_vm1, %v11277_v0  ;;  %10406 = vmatpush3.bf16.msra.mxu0 %v10405_v42  ;;  %v6433_v29 = vld [vmem:[#allocation6 + $0x288] sm:$0xff]  ;;  %v10447_v49 = vpack.c.bf16 %v6260_v52, %v6259_v3  ;;  %v6434_v42 = vld [vmem:[#allocation6 + $0x290] sm:$0xff]  ;;  %v6073_v57 = vld [vmem:[#allocation3 + $0x17] sm:$0xff]  ;;  %v10450_v47 = vpack.c.bf16 %v6262_v39, %v6261_v4 }
 0x56a   : > { %10430 = vmatpush3.bf16.msra.mxu1 %v10429_v2  ;;  %10407 = vmatprep.subr.bf16.mxu0 %v11283_v35  ;;  %v5899_v33 = vld [vmem:[#allocation3 + $0x7] sm:$0xff]  ;;  %v10471_v16 = vpack.c.bf16 %v6433_v29, %v6432_v26  ;;  %v6435_v2 = vld [vmem:[#allocation6 + $0x298] sm:$0xff]  ;;  %v6078_v37 = vld [vmem:[#allocation3 + $0x3f] sm:$0xff] }
 0x56b   : > { %9706 = vmatmul.mubr.f32.gmra.mrb[6].mxu0 %v5612_v53  ;;  %10431 = vmatprep.subr.bf16.mxu1 %v11283_v35  ;;  %v10474_v25 = vpack.c.bf16 %v6435_v2, %v6434_v42  ;;  %v6264_v53 = vld [vmem:[#allocation6 + $0x228] sm:$0xff]  ;;  %v6084_v3 = vld [vmem:[#allocation3 + $0x6f] sm:$0xf]  ;;  %v6605_v52 = vld [vmem:[#allocation6 + $0x300] sm:$0xff] }
 0x56c   : > { %9777 = vmatmul.mubr.f32.gmra.mrb[6].mxu1 %v5583_v8  ;;  %9708 = vmatprep.mubr.msk.f32.mxu0 %vm11279_vm1, %v11277_v0  ;;  %v6436_v8 = vld [vmem:[#allocation6 + $0x2a0] sm:$0xff]  ;;  %v10453_v18 = vpack.c.bf16 %v6264_v53, %v6263_v51  ;;  %v6606_v26 = vld [vmem:[#allocation6 + $0x308] sm:$0xff]  ;;  %v6607_v39 = vld [vmem:[#allocation6 + $0x310] sm:$0xff] }
 0x56d   : > { %9779 = vmatprep.mubr.msk.f32.mxu1 %vm11279_vm1, %v11277_v0  ;;  %10409 = vmatpush3.bf16.msra.mxu0 %v10408_v1  ;;  %v6437_v1 = vld [vmem:[#allocation6 + $0x2a8] sm:$0xff]  ;;  %v6778_v29 = vld [vmem:[#allocation6 + $0x380] sm:$0xff]  ;;  %v6608_v42 = vld [vmem:[#allocation6 + $0x318] sm:$0xff] }
 0x56e   : > { %10433 = vmatpush3.bf16.msra.mxu1 %v10432_v54  ;;  %10410 = vmatprep.subr.bf16.mxu0 %v11283_v35  ;;  %v6074_v54 = vld [vmem:[#allocation3 + $0x1f] sm:$0xff]  ;;  %v10477_v30 = vpack.c.bf16 %v6437_v1, %v6436_v8  ;;  %v6780_v2 = vld [vmem:[#allocation6 + $0x390] sm:$0xff]  ;;  %v10498_v51 = vpack.c.bf16 %v6608_v42, %v6607_v39 }
 0x56f   : > { %9709 = vmatmul.mubr.f32.gmra.mrb[8].mxu0 %v5613_v59  ;;  %10434 = vmatprep.subr.bf16.mxu1 %v11283_v35  ;;  %v6438_v59 = vld [vmem:[#allocation6 + $0x2b0] sm:$0xff]  ;;  %v6609_v8 = vld [vmem:[#allocation6 + $0x320] sm:$0xff]  ;;  %v6610_v1 = vld [vmem:[#allocation6 + $0x328] sm:$0xff] }
 0x570   : > { %9780 = vmatmul.mubr.f32.gmra.mrb[8].mxu1 %v5584_v12  ;;  %9711 = vmatprep.mubr.msk.f32.mxu0 %vm11279_vm1, %v11277_v0  ;;  %v6439_v12 = vld [vmem:[#allocation6 + $0x2b8] sm:$0xff]  ;;  %v6256_v39 = vld [vmem:[#allocation3 + $0x68] sm:$0xff] }
 0x571   : > { %9782 = vmatprep.mubr.msk.f32.mxu1 %vm11279_vm1, %v11277_v0  ;;  %10412 = vmatpush3.bf16.msra.mxu0 %v10411_v23  ;;  %v6075_v23 = vld [vmem:[#allocation3 + $0x27] sm:$0xff]  ;;  %v10480_v34 = vpack.c.bf16 %v6439_v12, %v6438_v59 }
 0x572   : > { %10436 = vmatpush3.bf16.msra.mxu1 %v10435_v28  ;;  %10413 = vmatprep.subr.bf16.mxu0 %v11283_v35  ;;  %v10456_v28 = vpack.c.bf16 %v6266_v21, %v6265_v58  ;;  %v13673_v58 = vld [vmem:[#allocation3 + $0x21] sm:$0xff]  ;;  %v10501_v21 = vpack.c.bf16 %v6610_v1, %v6609_v8  ;;  %v13750_v42 = vld [vmem:[#allocation3 + $0x69] sm:$0xff] }
 0x573   : > { %9712 = vmatmul.mubr.f32.gmra.mrb[10].mxu0 %v5614_v22  ;;  %10437 = vmatprep.subr.bf16.mxu1 %v11283_v35  ;;  %v6441_v22 = vld [vmem:[#allocation6 + $0x2c8] sm:$0xff]  ;;  %v6611_v12 = vld [vmem:[#allocation6 + $0x330] sm:$0xff] }
 0x574   : > { %9783 = vmatmul.mubr.f32.gmra.mrb[10].mxu1 %v5585_v56  ;;  %9714 = vmatprep.mubr.msk.f32.mxu0 %vm11279_vm1, %v11277_v0  ;;  %v6076_v56 = vld [vmem:[#allocation3 + $0x2f] sm:$0xff]  ;;  %v6764_v8 = vld [vmem:[#allocation3 + $0x1a] sm:$0xff]  ;;  %v7123_v1 = vld [vmem:[%s14094_s8] sm:$0xf] }
 0x575   : > { %9785 = vmatprep.mubr.msk.f32.mxu1 %vm11279_vm1, %v11277_v0  ;;  %10415 = vmatpush3.bf16.msra.mxu0 %v10414_v36  ;;  %v10459_v36 = vpack.c.bf16 %v6268_v48, %v6267_v32  ;;  %v6248_v32 = vld [vmem:[#allocation3 + $0x28] sm:$0xff] }
 0x576   : > { %10439 = vmatpush3.bf16.msra.mxu1 %v10438_v7  ;;  %10416 = vmatprep.subr.bf16.mxu0 %v11283_v35  ;;  %v10483_v7 = vpack.c.bf16 %v6441_v22, %v6440_v38  ;;  %v13682_v48 = vld [vmem:[#allocation3 + $0x29] sm:$0xff] }
 0x577   : > { %9715 = vmatmul.mubr.f32.gmra.mrb[12].mxu0 %v5615_v41  ;;  %10440 = vmatprep.subr.bf16.mxu1 %v11283_v35  ;;  %v6077_v41 = vld [vmem:[#allocation3 + $0x37] sm:$0xff] }
 0x578   : > { %9786 = vmatmul.mubr.f32.gmra.mrb[12].mxu1 %v5586_v55  ;;  %9717 = vmatprep.mubr.msk.f32.mxu0 %vm11279_vm1, %v11277_v0  ;;  %v10462_v55 = vpack.c.bf16 %v6270_v14, %v6269_v50  ;;  %v6787_v50 = vld [vmem:[#allocation6 + $0x3c8] sm:$0xff]  ;;  %v6249_v14 = vld [vmem:[#allocation3 + $0x30] sm:$0xff] }
 0x579   : > { %9788 = vmatprep.mubr.msk.f32.mxu1 %vm11279_vm1, %v11277_v0  ;;  %10418 = vmatpush3.bf16.msra.mxu0 %v10417_v10  ;;  %v10486_v10 = vpack.c.bf16 %v6443_v31, %v6442_v19  ;;  %v13691_v19 = vld [vmem:[#allocation3 + $0x31] sm:$0xff] }
 0x57a   : > { %10442 = vmatpush3.bf16.msra.mxu1 %v10441_v11  ;;  %10419 = vmatprep.subr.bf16.mxu0 %v11283_v35  ;;  %v6271_v11 = vld [vmem:[#allocation6 + $0x260] sm:$0xff] }
 0x57b   : > { %9718 = vmatmul.mubr.f32.gmra.mrb[14].mxu0 %v5616_v15  ;;  %10443 = vmatprep.subr.bf16.mxu1 %v11283_v35  ;;  %v10465_v15 = vpack.c.bf16 %v6272_v62, %v6271_v11  ;;  %v6788_v11 = vld [vmem:[#allocation6 + $0x3d0] sm:$0xff]  ;;  %v6789_v62 = vld [vmem:[#allocation6 + $0x3d8] sm:$0xff] }
 0x57c   : > { %9789 = vmatmul.mubr.f32.gmra.mrb[14].mxu1 %v5587_v6  ;;  %9720 = vmatprep.mubr.msk.f32.mxu0 %vm11279_vm1, %v11277_v0  ;;  %v10489_v6 = vpack.c.bf16 %v6445_v43, %v6444_v63  ;;  %v6250_v63 = vld [vmem:[#allocation3 + $0x38] sm:$0xff] }
 0x57d   : > { %9791 = vmatprep.mubr.msk.f32.mxu1 %vm11279_vm1, %v11277_v0  ;;  %10421 = vmatpush3.bf16.msra.mxu0 %v10420_v27  ;;  %v6273_v27 = vld [vmem:[#allocation6 + $0x270] sm:$0xff]  ;;  %v13700_v43 = vld [vmem:[#allocation3 + $0x39] sm:$0xff] }
 0x57e   : > { %10445 = vmatpush3.bf16.msra.mxu1 %v10444_v61  ;;  %10446 = vmatprep.subr.bf16.mxu0 %v11283_v35  ;;  %v6274_v61 = vld [vmem:[#allocation6 + $0x278] sm:$0xff] }
 0x57f   : > { %9721 = vmatmul.mubr.f32.gmra.mrb[16].mxu0 %v5617_v5  ;;  %10470 = vmatprep.subr.bf16.mxu1 %v11283_v35  ;;  %v6446_v5 = vld [vmem:[#allocation6 + $0x2f0] sm:$0xff] }
 0x580   : > { %9792 = vmatmul.mubr.f32.gmra.mrb[16].mxu1 %v5588_v40  ;;  %9723 = vmatprep.mubr.msk.f32.mxu0 %vm11279_vm1, %v11277_v0  ;;  %v6447_v40 = vld [vmem:[#allocation6 + $0x2f8] sm:$0xff] }
 0x581   : > { %9794 = vmatprep.mubr.msk.f32.mxu1 %vm11279_vm1, %v11277_v0 }
 0x583   : > { %9724 = vmatmul.mubr.f32.gmra.mrb[18].mxu0 %v5618_v9  ;;  %v6079_v9 = vld [vmem:[#allocation3 + $0x47] sm:$0xff] }
 0x584   : > { %9795 = vmatmul.mubr.f32.gmra.mrb[18].mxu1 %v5589_v46  ;;  %9726 = vmatprep.mubr.msk.f32.mxu0 %vm11279_vm1, %v11277_v0  ;;  %v10468_v46 = vpack.c.bf16 %v6274_v61, %v6273_v27  ;;  %v6618_v27 = vld [vmem:[#allocation6 + $0x368] sm:$0xff]  ;;  %v6790_v61 = vld [vmem:[#allocation6 + $0x3e0] sm:$0xff] }
 0x585   : > { %9797 = vmatprep.mubr.msk.f32.mxu1 %vm11279_vm1, %v11277_v0 }
 0x587   : > { %9727 = vmatmul.mubr.f32.gmra.mrb[20].mxu0 %v5619_v44  ;;  %v10492_v44 = vpack.c.bf16 %v6447_v40, %v6446_v5  ;;  %v6791_v5 = vld [vmem:[#allocation6 + $0x3e8] sm:$0xff] }
 0x588   : > { %9798 = vmatmul.mubr.f32.gmra.mrb[20].mxu1 %v5590_v13  ;;  %9729 = vmatprep.mubr.msk.f32.mxu0 %vm11279_vm1, %v11277_v0  ;;  %v6080_v13 = vld [vmem:[#allocation3 + $0x4f] sm:$0xff]  ;;  %v6251_v40 = vld [vmem:[#allocation3 + $0x40] sm:$0xff] }
 0x589   : > { %9800 = vmatprep.mubr.msk.f32.mxu1 %vm11279_vm1, %v11277_v0 }
 0x58b   : > { %9730 = vmatmul.mubr.f32.gmra.mrb[22].mxu0 %v5620_v17  ;;  %v6081_v17 = vld [vmem:[#allocation3 + $0x57] sm:$0xff] }
 0x58c   : > { %9801 = vmatmul.mubr.f32.gmra.mrb[22].mxu1 %v5591_v45  ;;  %9732 = vmatprep.mubr.msk.f32.mxu0 %vm11279_vm1, %v11277_v0  ;;  %v6082_v45 = vld [vmem:[#allocation3 + $0x5f] sm:$0xff] }
 0x58d   : > { %9803 = vmatprep.mubr.msk.f32.mxu1 %vm11279_vm1, %v11277_v0 }
 0x58f   : > { %9733 = vmatmul.mubr.f32.gmra.mrb[24].mxu0 %v5621_v60  ;;  %v6083_v60 = vld [vmem:[#allocation3 + $0x67] sm:$0xff] }
 0x590   : > { %9804 = vmatmul.mubr.f32.gmra.mrb[24].mxu1 %v5592_v24  ;;  %9838 = vmatprep.mubr.msk.f32.mxu0 %vm11279_vm1, %v11277_v0  ;;  %v5911_v24 = vld [vmem:[#allocation3 + $0x67] sm:$0xf] }
 0x591   : > { %9909 = vmatprep.mubr.msk.f32.mxu1 %vm11279_vm1, %v11277_v0 }
 0x593   : > { %9839 = vmatmul.mubr.f32.vlgmr.msra.gmra.mrb[26].mxu0 %v5899_v33  ;;  %v6779_v33 = vld [vmem:[#allocation6 + $0x388] sm:$0xff] }
 0x594   : > { %10448 = vmatpush3.bf16.msra.mxu0 %v10447_v49  ;;  %9910 = vmatmul.mubr.f32.vlgmr.msra.gmra.mrb[26].mxu1 %v6072_v20  ;;  %v6245_v49 = vld [vmem:[#allocation3 + $0x10] sm:$0xff]  ;;  %v10519_v4 = vpack.c.bf16 %v6779_v33, %v6778_v29 }
 0x595   : > { %9841 = vmatprep.mubr.msk.f32.mxu0 %vm11279_vm1, %v11277_v0  ;;  %10472 = vmatpush3.bf16.msra.mxu1 %v10471_v16  ;;  %v6418_v16 = vld [vmem:[#allocation3 + $0x11] sm:$0xff] }
 0x596   : > { %9912 = vmatprep.mubr.msk.f32.mxu1 %vm11279_vm1, %v11277_v0  ;;  %10449 = vmatprep.subr.bf16.mxu0 %v11283_v35  ;;  %v6253_v29 = vld [vmem:[#allocation3 + $0x50] sm:$0xff] }
 0x597   : > { %9842 = vmatmul.mubr.f32.gmra.mrb[28].mxu0 %v6072_v20  ;;  %10473 = vmatprep.subr.bf16.mxu1 %v11283_v35  ;;  %v10495_v20 = vpack.c.bf16 %v6606_v26, %v6605_v52  ;;  %v13727_v33 = vld [vmem:[#allocation3 + $0x51] sm:$0xff] }
 0x598   : > { %9913 = vmatmul.mubr.f32.gmra.mrb[28].mxu1 %v6073_v57  ;;  %9844 = vmatprep.mubr.msk.f32.mxu0 %vm11279_vm1, %v11277_v0 }
 0x599   : > { %10451 = vmatpush3.bf16.msra.mxu0 %v10450_v47  ;;  %9915 = vmatprep.mubr.msk.f32.mxu1 %vm11279_vm1, %v11277_v0  ;;  %v6246_v47 = vld [vmem:[#allocation3 + $0x18] sm:$0xff] }
 0x59a   : > { %10475 = vmatpush3.bf16.msra.mxu1 %v10474_v25  ;;  %10452 = vmatprep.subr.bf16.mxu0 %v11283_v35  ;;  %v13662_v25 = vld [vmem:[#allocation3 + $0x19] sm:$0xff] }
 0x59b   : > { %9845 = vmatmul.mubr.f32.gmra.mrb[30].mxu0 %v6073_v57  ;;  %10476 = vmatprep.subr.bf16.mxu1 %v11283_v35  ;;  %v6781_v57 = vld [vmem:[#allocation6 + $0x398] sm:$0xff] }
 0x59c   : > { %9916 = vmatmul.mubr.f32.gmra.mrb[30].mxu1 %v6074_v54  ;;  %9847 = vmatprep.mubr.msk.f32.mxu0 %vm11279_vm1, %v11277_v0  ;;  %v10522_v53 = vpack.c.bf16 %v6781_v57, %v6780_v2  ;;  %v6257_v2 = vld [vmem:[#allocation3 + $0x70] sm:$0xf] }
 0x59d   : > { %9918 = vmatprep.mubr.msk.f32.mxu1 %vm11279_vm1, %v11277_v0  ;;  %10454 = vmatpush3.bf16.msra.mxu0 %v10453_v18  ;;  %v6783_v18 = vld [vmem:[#allocation6 + $0x3a8] sm:$0xff]  ;;  %v6430_v57 = vld [vmem:[#allocation3 + $0x71] sm:$0xf] }
 0x59e   : > { %10478 = vmatpush3.bf16.msra.mxu1 %v10477_v30  ;;  %10455 = vmatprep.subr.bf16.mxu0 %v11283_v35  ;;  %v6247_v30 = vld [vmem:[#allocation3 + $0x20] sm:$0xff] }
 0x59f   : > { %9848 = vmatmul.mubr.f32.gmra.mrb[32].mxu0 %v6074_v54  ;;  %10479 = vmatprep.subr.bf16.mxu1 %v11283_v35  ;;  %v6782_v54 = vld [vmem:[#allocation6 + $0x3a0] sm:$0xff] }
 0x5a0   : > { %9919 = vmatmul.mubr.f32.gmra.mrb[32].mxu1 %v6075_v23  ;;  %9850 = vmatprep.mubr.msk.f32.mxu0 %vm11279_vm1, %v11277_v0  ;;  %v10525_v59 = vpack.c.bf16 %v6783_v18, %v6782_v54  ;;  %v6953_v54 = vld [vmem:[#allocation6 + $0x410] sm:$0xff]  ;;  %v6954_v18 = vld [vmem:[#allocation6 + $0x418] sm:$0xff] }
 0x5a1   : > { %9921 = vmatprep.mubr.msk.f32.mxu1 %vm11279_vm1, %v11277_v0  ;;  %10457 = vmatpush3.bf16.msra.mxu0 %v10456_v28  ;;  %v6784_v28 = vld [vmem:[#allocation6 + $0x3b0] sm:$0xff] }
 0x5a2   : > { %10481 = vmatpush3.bf16.msra.mxu1 %v10480_v34  ;;  %10458 = vmatprep.subr.bf16.mxu0 %v11283_v35  ;;  %v6785_v34 = vld [vmem:[#allocation6 + $0x3b8] sm:$0xff] }
 0x5a3   : > { %9851 = vmatmul.mubr.f32.gmra.mrb[34].mxu0 %v6075_v23  ;;  %10482 = vmatprep.subr.bf16.mxu1 %v11283_v35  ;;  %v6612_v23 = vld [vmem:[#allocation6 + $0x338] sm:$0xff]  ;;  %v10528_v22 = vpack.c.bf16 %v6785_v34, %v6784_v28  ;;  %v6957_v28 = vld [vmem:[#allocation6 + $0x430] sm:$0xff] }
 0x5a4   : > { %9922 = vmatmul.mubr.f32.gmra.mrb[34].mxu1 %v6076_v56  ;;  %9853 = vmatprep.mubr.msk.f32.mxu0 %vm11279_vm1, %v11277_v0  ;;  %v10504_v38 = vpack.c.bf16 %v6612_v23, %v6611_v12  ;;  %v6956_v12 = vld [vmem:[#allocation6 + $0x428] sm:$0xff]  ;;  %v6958_v34 = vld [vmem:[#allocation6 + $0x438] sm:$0xff] }
 0x5a5   : > { %9924 = vmatprep.mubr.msk.f32.mxu1 %vm11279_vm1, %v11277_v0  ;;  %10460 = vmatpush3.bf16.msra.mxu0 %v10459_v36  ;;  %v6614_v36 = vld [vmem:[#allocation6 + $0x348] sm:$0xff] }
 0x5a6   : > { %10484 = vmatpush3.bf16.msra.mxu1 %v10483_v7  ;;  %10461 = vmatprep.subr.bf16.mxu0 %v11283_v35  ;;  %v6786_v7 = vld [vmem:[#allocation6 + $0x3c0] sm:$0xff] }
 0x5a7   : > { %9854 = vmatmul.mubr.f32.gmra.mrb[36].mxu0 %v6076_v56  ;;  %10485 = vmatprep.subr.bf16.mxu1 %v11283_v35  ;;  %v6613_v56 = vld [vmem:[#allocation6 + $0x340] sm:$0xff] }
 0x5a8   : > { %9925 = vmatmul.mubr.f32.gmra.mrb[36].mxu1 %v6077_v41  ;;  %9856 = vmatprep.mubr.msk.f32.mxu0 %vm11279_vm1, %v11277_v0  ;;  %v10507_v31 = vpack.c.bf16 %v6614_v36, %v6613_v56  ;;  %v6961_v36 = vld [vmem:[#allocation6 + $0x450] sm:$0xff] }
 0x5a9   : > { %9927 = vmatprep.mubr.msk.f32.mxu1 %vm11279_vm1, %v11277_v0  ;;  %10463 = vmatpush3.bf16.msra.mxu0 %v10462_v55  ;;  %v6615_v55 = vld [vmem:[#allocation6 + $0x350] sm:$0xff] }
 0x5aa   : > { %10487 = vmatpush3.bf16.msra.mxu1 %v10486_v10  ;;  %10464 = vmatprep.subr.bf16.mxu0 %v11283_v35  ;;  %v6616_v10 = vld [vmem:[#allocation6 + $0x358] sm:$0xff] }
 0x5ab   : > { %9857 = vmatmul.mubr.f32.gmra.mrb[38].mxu0 %v6077_v41  ;;  %10488 = vmatprep.subr.bf16.mxu1 %v11283_v35  ;;  %v10531_v41 = vpack.c.bf16 %v6787_v50, %v6786_v7  ;;  %v6962_v7 = vld [vmem:[#allocation6 + $0x458] sm:$0xff]  ;;  %v6769_v50 = vld [vmem:[#allocation3 + $0x42] sm:$0xff] }
 0x5ac   : > { %9928 = vmatmul.mubr.f32.gmra.mrb[38].mxu1 %v6078_v37  ;;  %9859 = vmatprep.mubr.msk.f32.mxu0 %vm11279_vm1, %v11277_v0 }
 0x5ad   : > { %9930 = vmatprep.mubr.msk.f32.mxu1 %vm11279_vm1, %v11277_v0  ;;  %10466 = vmatpush3.bf16.msra.mxu0 %v10465_v15  ;;  %v10534_v15 = vpack.c.bf16 %v6789_v62, %v6788_v11  ;;  %v6966_v11 = vld [vmem:[#allocation6 + $0x478] sm:$0xff] }
 0x5ae   : > { %10490 = vmatpush3.bf16.msra.mxu1 %v10489_v6  ;;  %10467 = vmatprep.subr.bf16.mxu0 %v11283_v35  ;;  %v6617_v6 = vld [vmem:[#allocation6 + $0x360] sm:$0xff] }
 0x5af   : > { %9860 = vmatmul.mubr.f32.gmra.mrb[40].mxu0 %v6078_v37  ;;  %10491 = vmatprep.subr.bf16.mxu1 %v11283_v35  ;;  %v10510_v37 = vpack.c.bf16 %v6616_v10, %v6615_v55  ;;  %v6965_v10 = vld [vmem:[#allocation6 + $0x470] sm:$0xff]  ;;  %v6771_v62 = vld [vmem:[#allocation3 + $0x52] sm:$0xff] }
 0x5b0   : > { %9931 = vmatmul.mubr.f32.gmra.mrb[40].mxu1 %v6079_v9  ;;  %9862 = vmatprep.mubr.msk.f32.mxu0 %vm11279_vm1, %v11277_v0 }
 0x5b1   : > { %9933 = vmatprep.mubr.msk.f32.mxu1 %vm11279_vm1, %v11277_v0  ;;  %10469 = vmatpush3.bf16.msra.mxu0 %v10468_v46  ;;  %v10513_v46 = vpack.c.bf16 %v6618_v27, %v6617_v6  ;;  %v6775_v6 = vld [vmem:[#allocation3 + $0x72] sm:$0xff] }
 0x5b2   : > { %10493 = vmatpush3.bf16.msra.mxu1 %v10492_v44  ;;  %10494 = vmatprep.subr.bf16.mxu0 %v11283_v35  ;;  %v10537_v44 = vpack.c.bf16 %v6791_v5, %v6790_v61  ;;  %v6603_v27 = vld [vmem:[#allocation3 + $0x79] sm:$0xf] }
 0x5b3   : > { %9863 = vmatmul.mubr.f32.gmra.mrb[42].mxu0 %v6079_v9  ;;  %10518 = vmatprep.subr.bf16.mxu1 %v11283_v35  ;;  %v13709_v9 = vld [vmem:[#allocation3 + $0x41] sm:$0xff]  ;;  %v6776_v61 = vld [vmem:[#allocation3 + $0x7a] sm:$0xf] }
 0x5b4   : > { %9934 = vmatmul.mubr.f32.gmra.mrb[42].mxu1 %v6080_v13  ;;  %9865 = vmatprep.mubr.msk.f32.mxu0 %vm11279_vm1, %v11277_v0  ;;  %v6937_v5 = vld [vmem:[#allocation3 + $0x1b] sm:$0xff] }
 0x5b5   : > { %9936 = vmatprep.mubr.msk.f32.mxu1 %vm11279_vm1, %v11277_v0 }
 0x5b7   : > { %9866 = vmatmul.mubr.f32.gmra.mrb[44].mxu0 %v6080_v13  ;;  %v6619_v13 = vld [vmem:[#allocation6 + $0x370] sm:$0xff] }
 0x5b8   : > { %9937 = vmatmul.mubr.f32.gmra.mrb[44].mxu1 %v6081_v17  ;;  %9868 = vmatprep.mubr.msk.f32.mxu0 %vm11279_vm1, %v11277_v0 }
 0x5b9   : > { %9939 = vmatprep.mubr.msk.f32.mxu1 %vm11279_vm1, %v11277_v0 }
 0x5bb   : > { %9869 = vmatmul.mubr.f32.gmra.mrb[46].mxu0 %v6081_v17  ;;  %v6620_v17 = vld [vmem:[#allocation6 + $0x378] sm:$0xff] }
 0x5bc   : > { %9940 = vmatmul.mubr.f32.gmra.mrb[46].mxu1 %v6082_v45  ;;  %9871 = vmatprep.mubr.msk.f32.mxu0 %vm11279_vm1, %v11277_v0  ;;  %v10516_v52 = vpack.c.bf16 %v6620_v17, %v6619_v13 }
 0x5bd   : > { %9942 = vmatprep.mubr.msk.f32.mxu1 %vm11279_vm1, %v11277_v0 }
 0x5bf   : > { %9872 = vmatmul.mubr.f32.gmra.mrb[48].mxu0 %v6082_v45  ;;  %v6792_v45 = vld [vmem:[#allocation6 + $0x3f0] sm:$0xff] }
 0x5c0   : > { %9943 = vmatmul.mubr.f32.gmra.mrb[48].mxu1 %v6083_v60  ;;  %9874 = vmatprep.mubr.msk.f32.mxu0 %vm11279_vm1, %v11277_v0  ;;  %v6793_v60 = vld [vmem:[#allocation6 + $0x3f8] sm:$0xff] }
 0x5c1   : > { %9945 = vmatprep.mubr.msk.f32.mxu1 %vm11279_vm1, %v11277_v0  ;;  %v10540_v26 = vpack.c.bf16 %v6793_v60, %v6792_v45 }
 0x5c3   : > { %9875 = vmatmul.mubr.f32.gmra.mrb[50].mxu0 %v5911_v24  ;;  %v6252_v24 = vld [vmem:[#allocation3 + $0x48] sm:$0xff] }
 0x5c4   : > { %9946 = vmatmul.mubr.f32.gmra.mrb[50].mxu1 %v6084_v3  ;;  %9980 = vmatprep.mubr.msk.f32.mxu0 %vm11279_vm1, %v11277_v0  ;;  %v13718_v3 = vld [vmem:[#allocation3 + $0x49] sm:$0xff] }
 0x5c5   : > { %10051 = vmatprep.mubr.msk.f32.mxu1 %vm11279_vm1, %v11277_v0 }
 0x5c7   : > { %9981 = vmatmul.mubr.f32.vlgmr.msra.gmra.mrb[52].mxu0 %v6245_v49  ;;  %v6254_v49 = vld [vmem:[#allocation3 + $0x58] sm:$0xff] }
 0x5c8   : > { %10496 = vmatpush3.bf16.msra.mxu0 %v10495_v20  ;;  %10052 = vmatmul.mubr.f32.vlgmr.msra.gmra.mrb[52].mxu1 %v6418_v16  ;;  %v13736_v20 = vld [vmem:[#allocation3 + $0x59] sm:$0xff] }
 0x5c9   : > { %9983 = vmatprep.mubr.msk.f32.mxu0 %vm11279_vm1, %v11277_v0  ;;  %10520 = vmatpush3.bf16.msra.mxu1 %v10519_v4  ;;  %v6255_v16 = vld [vmem:[#allocation3 + $0x60] sm:$0xff] }
 0x5ca   : > { %10054 = vmatprep.mubr.msk.f32.mxu1 %vm11279_vm1, %v11277_v0  ;;  %10497 = vmatprep.subr.bf16.mxu0 %v11283_v35  ;;  %v13743_v4 = vld [vmem:[#allocation3 + $0x61] sm:$0xff] }
 0x5cb   : > { %9984 = vmatmul.mubr.f32.gmra.mrb[54].mxu0 %v6246_v47  ;;  %10521 = vmatprep.subr.bf16.mxu1 %v11283_v35  ;;  %v6951_v47 = vld [vmem:[#allocation6 + $0x400] sm:$0xff] }
 0x5cc   : > { %10055 = vmatmul.mubr.f32.gmra.mrb[54].mxu1 %v13662_v25  ;;  %9986 = vmatprep.mubr.msk.f32.mxu0 %vm11279_vm1, %v11277_v0 }
 0x5cd   : > { %10499 = vmatpush3.bf16.msra.mxu0 %v10498_v51  ;;  %10057 = vmatprep.mubr.msk.f32.mxu1 %vm11279_vm1, %v11277_v0  ;;  %v6952_v51 = vld [vmem:[#allocation6 + $0x408] sm:$0xff] }
 0x5ce   : > { %10523 = vmatpush3.bf16.msra.mxu1 %v10522_v53  ;;  %10500 = vmatprep.subr.bf16.mxu0 %v11283_v35  ;;  %v10543_v53 = vpack.c.bf16 %v6952_v51, %v6951_v47  ;;  %v6941_v47 = vld [vmem:[#allocation3 + $0x3b] sm:$0xff]  ;;  %v7114_v51 = vld [vmem:[#allocation5 + $0x20] sm:$0xff] }
 0x5cf   : > { %9987 = vmatmul.mubr.f32.gmra.mrb[56].mxu0 %v6247_v30  ;;  %10524 = vmatprep.subr.bf16.mxu1 %v11283_v35  ;;  %v6765_v30 = vld [vmem:[#allocation3 + $0x22] sm:$0xff] }
 0x5d0   : > { %10058 = vmatmul.mubr.f32.gmra.mrb[56].mxu1 %v13673_v58  ;;  %9989 = vmatprep.mubr.msk.f32.mxu0 %vm11279_vm1, %v11277_v0 }
 0x5d1   : > { %10060 = vmatprep.mubr.msk.f32.mxu1 %vm11279_vm1, %v11277_v0  ;;  %10502 = vmatpush3.bf16.msra.mxu0 %v10501_v21  ;;  %v10546_v21 = vpack.c.bf16 %v6954_v18, %v6953_v54 }
 0x5d2   : > { %10526 = vmatpush3.bf16.msra.mxu1 %v10525_v59  ;;  %10503 = vmatprep.subr.bf16.mxu0 %v11283_v35  ;;  %v6955_v59 = vld [vmem:[#allocation6 + $0x420] sm:$0xff] }
 0x5d3   : > { %9990 = vmatmul.mubr.f32.gmra.mrb[58].mxu0 %v6248_v32  ;;  %10527 = vmatprep.subr.bf16.mxu1 %v11283_v35  ;;  %v10549_v23 = vpack.c.bf16 %v6956_v12, %v6955_v59  ;;  %v10552_v32 = vpack.c.bf16 %v6958_v34, %v6957_v28  ;;  %v6943_v34 = vld [vmem:[#allocation3 + $0x4b] sm:$0xff] }
 0x5d4   : > { %10061 = vmatmul.mubr.f32.gmra.mrb[58].mxu1 %v13682_v48  ;;  %9992 = vmatprep.mubr.msk.f32.mxu0 %vm11279_vm1, %v11277_v0 }
 0x5d5   : > { %10063 = vmatprep.mubr.msk.f32.mxu1 %vm11279_vm1, %v11277_v0  ;;  %10505 = vmatpush3.bf16.msra.mxu0 %v10504_v38  ;;  %v6959_v38 = vld [vmem:[#allocation6 + $0x440] sm:$0xff] }
 0x5d6   : > { %10529 = vmatpush3.bf16.msra.mxu1 %v10528_v22  ;;  %10506 = vmatprep.subr.bf16.mxu0 %v11283_v35  ;;  %v6960_v22 = vld [vmem:[#allocation6 + $0x448] sm:$0xff] }
 0x5d7   : > { %9993 = vmatmul.mubr.f32.gmra.mrb[60].mxu0 %v6249_v14  ;;  %10530 = vmatprep.subr.bf16.mxu1 %v11283_v35  ;;  %v10555_v56 = vpack.c.bf16 %v6960_v22, %v6959_v38  ;;  %v10558_v14 = vpack.c.bf16 %v6962_v7, %v6961_v36  ;;  %v6944_v36 = vld [vmem:[#allocation3 + $0x53] sm:$0xff]  ;;  %v7117_v7 = vld [vmem:[#allocation5 + $0x38] sm:$0xff] }
 0x5d8   : > { %10064 = vmatmul.mubr.f32.gmra.mrb[60].mxu1 %v13691_v19  ;;  %9995 = vmatprep.mubr.msk.f32.mxu0 %vm11279_vm1, %v11277_v0 }
 0x5d9   : > { %10066 = vmatprep.mubr.msk.f32.mxu1 %vm11279_vm1, %v11277_v0  ;;  %10508 = vmatpush3.bf16.msra.mxu0 %v10507_v31  ;;  %v6964_v31 = vld [vmem:[#allocation6 + $0x468] sm:$0xff] }
 0x5da   : > { %10532 = vmatpush3.bf16.msra.mxu1 %v10531_v41  ;;  %10509 = vmatprep.subr.bf16.mxu0 %v11283_v35  ;;  %v6770_v41 = vld [vmem:[#allocation3 + $0x4a] sm:$0xff] }
 0x5db   : > { %9996 = vmatmul.mubr.f32.gmra.mrb[62].mxu0 %v6250_v63  ;;  %10533 = vmatprep.subr.bf16.mxu1 %v11283_v35  ;;  %v10564_v63 = vpack.c.bf16 %v6966_v11, %v6965_v10  ;;  %v7118_v10 = vld [vmem:[#allocation5 + $0x40] sm:$0xff] }
 0x5dc   : > { %10067 = vmatmul.mubr.f32.gmra.mrb[62].mxu1 %v13700_v43  ;;  %9998 = vmatprep.mubr.msk.f32.mxu0 %vm11279_vm1, %v11277_v0 }
 0x5dd   : > { %10069 = vmatprep.mubr.msk.f32.mxu1 %vm11279_vm1, %v11277_v0  ;;  %10511 = vmatpush3.bf16.msra.mxu0 %v10510_v37  ;;  %v6774_v37 = vld [vmem:[#allocation3 + $0x6a] sm:$0xff] }
 0x5de   : > { %10535 = vmatpush3.bf16.msra.mxu1 %v10534_v15  ;;  %10512 = vmatprep.subr.bf16.mxu0 %v11283_v35  ;;  %v6602_v15 = vld [vmem:[#allocation3 + $0x71] sm:$0xff] }
 0x5df   : > { %9999 = vmatmul.mubr.f32.gmra.mrb[64].mxu0 %v6251_v40  ;;  %10536 = vmatprep.subr.bf16.mxu1 %v11283_v35  ;;  %v7110_v40 = vld [vmem:[#allocation5] sm:$0xff] }
 0x5e0   : > { %10070 = vmatmul.mubr.f32.gmra.mrb[64].mxu1 %v13709_v9  ;;  %10001 = vmatprep.mubr.msk.f32.mxu0 %vm11279_vm1, %v11277_v0 }
 0x5e1   : > { %10072 = vmatprep.mubr.msk.f32.mxu1 %vm11279_vm1, %v11277_v0  ;;  %10514 = vmatpush3.bf16.msra.mxu0 %v10513_v46  ;;  %v7111_v46 = vld [vmem:[#allocation5 + $0x8] sm:$0xff] }
 0x5e2   : > { %10538 = vmatpush3.bf16.msra.mxu1 %v10537_v44  ;;  %10515 = vmatprep.subr.bf16.mxu0 %v11283_v35 }
 0x5e3   : > { %10002 = vmatmul.mubr.f32.gmra.mrb[66].mxu0 %v6252_v24  ;;  %10539 = vmatprep.subr.bf16.mxu1 %v11283_v35  ;;  %v6939_v24 = vld [vmem:[#allocation3 + $0x2b] sm:$0xff] }
 0x5e4   : > { %10073 = vmatmul.mubr.f32.gmra.mrb[66].mxu1 %v13718_v3  ;;  %10004 = vmatprep.mubr.msk.f32.mxu0 %vm11279_vm1, %v11277_v0 }
 0x5e5   : > { %10075 = vmatprep.mubr.msk.f32.mxu1 %vm11279_vm1, %v11277_v0  ;;  %10517 = vmatpush3.bf16.msra.mxu0 %v10516_v52 }
 0x5e6   : > { %10541 = vmatpush3.bf16.msra.mxu1 %v10540_v26  ;;  %10542 = vmatprep.subr.bf16.mxu0 %v11283_v35 }
 0x5e7   : > { %10005 = vmatmul.mubr.f32.gmra.mrb[68].mxu0 %v6253_v29  ;;  %10303 = vmatprep.subr.mxu1 %v11277_v0 }
 0x5e8   : > { %10076 = vmatmul.mubr.f32.gmra.mrb[68].mxu1 %v13727_v33  ;;  %10007 = vmatprep.mubr.msk.f32.mxu0 %vm11279_vm1, %v11277_v0 }
 0x5e9   : > { %10078 = vmatprep.mubr.msk.f32.mxu1 %vm11279_vm1, %v11277_v0 }
 0x5eb   : > { %10008 = vmatmul.mubr.f32.gmra.mrb[70].mxu0 %v6254_v49 }
 0x5ec   : > { %10079 = vmatmul.mubr.f32.gmra.mrb[70].mxu1 %v13736_v20  ;;  %10010 = vmatprep.mubr.msk.f32.mxu0 %vm11279_vm1, %v11277_v0 }
 0x5ed   : > { %10081 = vmatprep.mubr.msk.f32.mxu1 %vm11279_vm1, %v11277_v0 }
 0x5ef   : > { %10011 = vmatmul.mubr.f32.gmra.mrb[72].mxu0 %v6255_v16  ;;  %v7113_v16 = vld [vmem:[#allocation5 + $0x18] sm:$0xff] }
 0x5f0   : > { %10082 = vmatmul.mubr.f32.gmra.mrb[72].mxu1 %v13743_v4  ;;  %10013 = vmatprep.mubr.msk.f32.mxu0 %vm11279_vm1, %v11277_v0 }
 0x5f1   : > { %10084 = vmatprep.mubr.msk.f32.mxu1 %vm11279_vm1, %v11277_v0 }
 0x5f3   : > { %10014 = vmatmul.mubr.f32.gmra.mrb[74].mxu0 %v6256_v39 }
 0x5f4   : > { %10085 = vmatmul.mubr.f32.gmra.mrb[74].mxu1 %v13750_v42  ;;  %10016 = vmatprep.mubr.msk.f32.mxu0 %vm11279_vm1, %v11277_v0 }
 0x5f5   : > { %10087 = vmatprep.mubr.msk.f32.mxu1 %vm11279_vm1, %v11277_v0 }
 0x5f7   : > { %10017 = vmatmul.mubr.f32.gmra.mrb[76].mxu0 %v6257_v2 }
 0x5f8   : > { %10088 = vmatmul.mubr.f32.gmra.mrb[76].mxu1 %v6430_v57  ;;  %10122 = vmatprep.mubr.msk.f32.mxu0 %vm11279_vm1, %v11277_v0 }
 0x5f9   : > { %10193 = vmatprep.mubr.msk.f32.mxu1 %vm11279_vm1, %v11277_v0 }
 0x5fb   : > { %10123 = vmatmul.mubr.f32.vlgmr.msra.gmra.mrb[78].mxu0 %v13662_v25  ;;  %v6766_v25 = vld [vmem:[#allocation3 + $0x2a] sm:$0xff] }
 0x5fc   : > { %10544 = vmatpush3.bf16.msra.mxu0 %v10543_v53  ;;  %10194 = vmatmul.mubr.f32.vlgmr.msra.gmra.mrb[78].mxu1 %v6764_v8 }
 0x5fd   : > { %10125 = vmatprep.mubr.msk.f32.mxu0 %vm11279_vm1, %v11277_v0  ;;  %10304 = vmatpush3.msk.msra.mxu1 %vm1165_vm2, %v7123_v1 }
 0x5fe   : > { %10196 = vmatprep.mubr.msk.f32.mxu1 %vm11279_vm1, %v11277_v0  ;;  %10545 = vmatprep.subr.bf16.mxu0 %v11283_v35 }
 0x5ff   : > { %10126 = vmatmul.mubr.f32.gmra.mrb[80].mxu0 %v13673_v58  ;;  %v6767_v58 = vld [vmem:[#allocation3 + $0x32] sm:$0xff] }
 0x600   : > { %10197 = vmatmul.mubr.f32.gmra.mrb[80].mxu1 %v6765_v30  ;;  %10128 = vmatprep.mubr.msk.f32.mxu0 %vm11279_vm1, %v11277_v0  ;;  %v6942_v30 = vld [vmem:[#allocation3 + $0x43] sm:$0xff] }
 0x601   : > { %10547 = vmatpush3.bf16.msra.mxu0 %v10546_v21  ;;  %10199 = vmatprep.mubr.msk.f32.mxu1 %vm11279_vm1, %v11277_v0  ;;  %v7115_v21 = vld [vmem:[#allocation5 + $0x28] sm:$0xff] }
 0x602   : > { %10548 = vmatprep.subr.bf16.mxu0 %v11283_v35 }
 0x603   : > { %10129 = vmatmul.mubr.f32.gmra.mrb[82].mxu0 %v13682_v48  ;;  %v6768_v48 = vld [vmem:[#allocation3 + $0x3a] sm:$0xff] }
 0x604   : > { %10200 = vmatmul.mubr.f32.gmra.mrb[82].mxu1 %v6766_v25  ;;  %10131 = vmatprep.mubr.msk.f32.mxu0 %vm11279_vm1, %v11277_v0 }
 0x605   : > { %10202 = vmatprep.mubr.msk.f32.mxu1 %vm11279_vm1, %v11277_v0  ;;  %10550 = vmatpush3.bf16.msra.mxu0 %v10549_v23 }
 0x606   : > { %10551 = vmatprep.subr.bf16.mxu0 %v11283_v35 }
 0x607   : > { %10132 = vmatmul.mubr.f32.gmra.mrb[84].mxu0 %v13691_v19  ;;  %v6963_v19 = vld [vmem:[#allocation6 + $0x460] sm:$0xff] }
 0x608   : > { %10203 = vmatmul.mubr.f32.gmra.mrb[84].mxu1 %v6767_v58  ;;  %10134 = vmatprep.mubr.msk.f32.mxu0 %vm11279_vm1, %v11277_v0  ;;  %v10561_v55 = vpack.c.bf16 %v6964_v31, %v6963_v19  ;;  %v7116_v58 = vld [vmem:[#allocation5 + $0x30] sm:$0xff] }
 0x609   : > { %10205 = vmatprep.mubr.msk.f32.mxu1 %vm11279_vm1, %v11277_v0  ;;  %10553 = vmatpush3.bf16.msra.mxu0 %v10552_v32 }
 0x60a   : > { %10554 = vmatprep.subr.bf16.mxu0 %v11283_v35 }
 0x60b   : > { %10135 = vmatmul.mubr.f32.gmra.mrb[86].mxu0 %v13700_v43  ;;  %v6772_v43 = vld [vmem:[#allocation3 + $0x5a] sm:$0xff] }
 0x60c   : > { %10206 = vmatmul.mubr.f32.gmra.mrb[86].mxu1 %v6768_v48  ;;  %10137 = vmatprep.mubr.msk.f32.mxu0 %vm11279_vm1, %v11277_v0 }
 0x60d   : > { %10208 = vmatprep.mubr.msk.f32.mxu1 %vm11279_vm1, %v11277_v0  ;;  %10556 = vmatpush3.bf16.msra.mxu0 %v10555_v56 }
 0x60e   : > { %10557 = vmatprep.subr.bf16.mxu0 %v11283_v35 }
 0x60f   : > { %10138 = vmatmul.mubr.f32.gmra.mrb[88].mxu0 %v13709_v9  ;;  %v6938_v9 = vld [vmem:[#allocation3 + $0x23] sm:$0xff] }
 0x610   : > { %10209 = vmatmul.mubr.f32.gmra.mrb[88].mxu1 %v6769_v50  ;;  %10140 = vmatprep.mubr.msk.f32.mxu0 %vm11279_vm1, %v11277_v0 }
 0x611   : > { %10211 = vmatprep.mubr.msk.f32.mxu1 %vm11279_vm1, %v11277_v0  ;;  %10559 = vmatpush3.bf16.msra.mxu0 %v10558_v14 }
 0x612   : > { %10560 = vmatprep.subr.bf16.mxu0 %v11283_v35 }
 0x613   : > { %10141 = vmatmul.mubr.f32.gmra.mrb[90].mxu0 %v13718_v3  ;;  %v7112_v3 = vld [vmem:[#allocation5 + $0x10] sm:$0xff] }
 0x614   : > { %10212 = vmatmul.mubr.f32.gmra.mrb[90].mxu1 %v6770_v41  ;;  %10143 = vmatprep.mubr.msk.f32.mxu0 %vm11279_vm1, %v11277_v0 }
 0x615   : > { %10214 = vmatprep.mubr.msk.f32.mxu1 %vm11279_vm1, %v11277_v0  ;;  %10562 = vmatpush3.bf16.msra.mxu0 %v10561_v55  ;;  %v6945_v55 = vld [vmem:[#allocation3 + $0x5b] sm:$0xff] }
 0x616   : > { %10563 = vmatprep.subr.bf16.mxu0 %v11283_v35  ;;  %v6773_v35 = vld [vmem:[#allocation3 + $0x62] sm:$0xff] }
 0x617   : > { %10144 = vmatmul.mubr.f32.gmra.mrb[92].mxu0 %v13727_v33 }
 0x618   : > { %10215 = vmatmul.mubr.f32.gmra.mrb[92].mxu1 %v6771_v62  ;;  %10146 = vmatprep.mubr.msk.f32.mxu0 %vm11279_vm1, %v11277_v0 }
 0x619   : > { %10217 = vmatprep.mubr.msk.f32.mxu1 %vm11279_vm1, %v11277_v0  ;;  %10565 = vmatpush3.bf16.msra.mxu0 %v10564_v63 }
 0x61b   : > { %10147 = vmatmul.mubr.f32.gmra.mrb[94].mxu0 %v13736_v20  ;;  %v6940_v20 = vld [vmem:[#allocation3 + $0x33] sm:$0xff] }
 0x61c   : > { %10218 = vmatmul.mubr.f32.gmra.mrb[94].mxu1 %v6772_v43  ;;  %10149 = vmatprep.mubr.msk.f32.mxu0 %vm11279_vm1, %v11277_v0 }
 0x61d   : > { %10220 = vmatprep.mubr.msk.f32.mxu1 %vm11279_vm1, %v11277_v0 }
 0x61f   : > { %10150 = vmatmul.mubr.f32.gmra.mrb[96].mxu0 %v13743_v4 }
 0x620   : > { %10221 = vmatmul.mubr.f32.gmra.mrb[96].mxu1 %v6773_v35  ;;  %10152 = vmatprep.mubr.msk.f32.mxu0 %vm11279_vm1, %v11277_v0 }
 0x621   : > { %10223 = vmatprep.mubr.msk.f32.mxu1 %vm11279_vm1, %v11277_v0 }
 0x623   : > { %10153 = vmatmul.mubr.f32.gmra.mrb[98].mxu0 %v13750_v42 }
 0x624   : > { %10224 = vmatmul.mubr.f32.gmra.mrb[98].mxu1 %v6774_v37  ;;  %10155 = vmatprep.mubr.msk.f32.mxu0 %vm11279_vm1, %v11277_v0  ;;  %v6946_v37 = vld [vmem:[#allocation3 + $0x63] sm:$0xff] }
 0x625   : > { %10226 = vmatprep.mubr.msk.f32.mxu1 %vm11279_vm1, %v11277_v0 }
 0x627   : > { %10156 = vmatmul.mubr.f32.gmra.mrb[100].mxu0 %v6602_v15  ;;  %v7119_v15 = vld [vmem:[#allocation5 + $0x48] sm:$0xff] }
 0x628   : > { %10227 = vmatmul.mubr.f32.gmra.mrb[100].mxu1 %v6775_v6  ;;  %10158 = vmatprep.mubr.msk.f32.mxu0 %vm11279_vm1, %v11277_v0 }
 0x629   : > { %10229 = vmatprep.mubr.msk.f32.mxu1 %vm11279_vm1, %v11277_v0 }
 0x62b   : > { %10159 = vmatmul.mubr.f32.gmra.mrb[102].mxu0 %v6603_v27 }
 0x62c   : > { %10230 = vmatmul.mubr.f32.gmra.mrb[102].mxu1 %v6776_v61  ;;  %10264 = vmatprep.mubr.msk.f32.mxu0 %vm11279_vm1, %v11277_v0 }
 0x62d   : > { %10305 = vmatprep.mubr.msk.f32.mxu1 %vm11279_vm1, %v11277_v0 }
 0x62f   : > { %10265 = vmatmul.mubr.f32.vlgmr.msra.gmra.mrb[104].mxu0 %v6937_v5 }
 0x630   : > { %10306 = vmatmul.mubr.msk.f32.vlgmr.msra.gmra.mrb[104].mxu1 %vm867_vm0, %v7110_v40  ;;  %10267 = vmatprep.mubr.msk.f32.mxu0 %vm11279_vm1, %v11277_v0 }
 0x631   : > { %10308 = vmatprep.mubr.msk.f32.mxu1 %vm11279_vm1, %v11277_v0 }
 0x632   : > { %v5705_v44 = vpop.f32.mrb[0].mxu0 }
 0x633   : > { %v9698_v13 = vpop.f32.mrb[1].mxu0  ;;  %v5835_v17 = vpop.f32.mrb[0].mxu1  ;;  %10268 = vmatmul.mubr.f32.gmra.mrb[106].mxu0 %v6938_v9  ;;  %v6947_v9 = vld [vmem:[#allocation3 + $0x6b] sm:$0xff] }
 0x634   : > { %v13840_v45 = vadd.f32 %v5835_v17, %v5705_v44  ;;  %v9769_v60 = vpop.f32.mrb[1].mxu1  ;;  %10309 = vmatmul.mubr.msk.f32.gmra.mrb[106].mxu1 %vm867_vm0, %v7111_v46  ;;  %10270 = vmatprep.mubr.msk.f32.mxu0 %vm11279_vm1, %v11277_v0  ;;  %v7120_v46 = vld [vmem:[#allocation5 + $0x50] sm:$0xff] }
 0x635   : > { %10311 = vmatprep.mubr.msk.f32.mxu1 %vm11279_vm1, %v11277_v0 }
 0x636   : > { %v5710_v52 = vpop.f32.mrb[2].mxu0 }
 0x637   : > { %v9701_v26 = vpop.f32.mrb[3].mxu0  ;;  %v5840_v29 = vpop.f32.mrb[2].mxu1  ;;  %10271 = vmatmul.mubr.f32.gmra.mrb[108].mxu0 %v6939_v24 }
 0x638   : > { %v13847_v33 = vadd.f32 %v5840_v29, %v5710_v52  ;;  %v9772_v49 = vpop.f32.mrb[3].mxu1  ;;  %10312 = vmatmul.mubr.msk.f32.gmra.mrb[108].mxu1 %vm867_vm0, %v7112_v3  ;;  %10273 = vmatprep.mubr.msk.f32.mxu0 %vm11279_vm1, %v11277_v0  ;;  %v6948_v3 = vld [vmem:[#allocation3 + $0x73] sm:$0xff]  ;;  %v7121_v52 = vld [vmem:[#allocation5 + $0x58] sm:$0xff] }
 0x639   : > { %10314 = vmatprep.mubr.msk.f32.mxu1 %vm11279_vm1, %v11277_v0 }
 0x63a   : > { %v5715_v4 = vpop.f32.mrb[4].mxu0 }
 0x63b   : > { %v9704_v39 = vpop.f32.mrb[5].mxu0  ;;  %v5845_v42 = vpop.f32.mrb[4].mxu1  ;;  %10274 = vmatmul.mubr.f32.gmra.mrb[110].mxu0 %v6940_v20 }
 0x63c   : > { %v13854_v2 = vadd.f32 %v5845_v42, %v5715_v4  ;;  %v9775_v57 = vpop.f32.mrb[5].mxu1  ;;  %10315 = vmatmul.mubr.msk.f32.gmra.mrb[110].mxu1 %vm867_vm0, %v7113_v16  ;;  %10276 = vmatprep.mubr.msk.f32.mxu0 %vm11279_vm1, %v11277_v0  ;;  %v6949_v4 = vld [vmem:[#allocation3 + $0x7b] sm:$0xf]  ;;  %v7122_v39 = vld [vmem:[#allocation5 + $0x60] sm:$0xf] }
 0x63d   : > { %10317 = vmatprep.mubr.msk.f32.mxu1 %vm11279_vm1, %v11277_v0 }
 0x63e   : > { %v5720_v53 = vpop.f32.mrb[6].mxu0 }
 0x63f   : > { %v9707_v8 = vpop.f32.mrb[7].mxu0  ;;  %v5850_v1 = vpop.f32.mrb[6].mxu1  ;;  %10277 = vmatmul.mubr.f32.gmra.mrb[112].mxu0 %v6941_v47 }
 0x640   : > { %v13861_v54 = vadd.f32 %v5850_v1, %v5720_v53  ;;  %v9778_v18 = vpop.f32.mrb[7].mxu1  ;;  %10318 = vmatmul.mubr.msk.f32.gmra.mrb[112].mxu1 %vm867_vm0, %v7114_v51  ;;  %10279 = vmatprep.mubr.msk.f32.mxu0 %vm11279_vm1, %v11277_v0 }
 0x641   : > { %10320 = vmatprep.mubr.msk.f32.mxu1 %vm11279_vm1, %v11277_v0 }
 0x642   : > { %v5725_v59 = vpop.f32.mrb[8].mxu0 }
 0x643   : > { %v9710_v12 = vpop.f32.mrb[9].mxu0  ;;  %v5855_v25 = vpop.f32.mrb[8].mxu1  ;;  %10280 = vmatmul.mubr.f32.gmra.mrb[114].mxu0 %v6942_v30 }
 0x644   : > { %v13868_v23 = vadd.f32 %v5855_v25, %v5725_v59  ;;  %v9781_v28 = vpop.f32.mrb[9].mxu1  ;;  %10321 = vmatmul.mubr.msk.f32.gmra.mrb[114].mxu1 %vm867_vm0, %v7115_v21  ;;  %10282 = vmatprep.mubr.msk.f32.mxu0 %vm11279_vm1, %v11277_v0 }
 0x645   : > { %10323 = vmatprep.mubr.msk.f32.mxu1 %vm11279_vm1, %v11277_v0 }
 0x646   : > { %v5730_v32 = vpop.f32.mrb[10].mxu0 }
 0x647   : > { %v9713_v38 = vpop.f32.mrb[11].mxu0  ;;  %v5860_v22 = vpop.f32.mrb[10].mxu1  ;;  %10283 = vmatmul.mubr.f32.gmra.mrb[116].mxu0 %v6943_v34 }
 0x648   : > { %v13875_v48 = vadd.f32 %v5860_v22, %v5730_v32  ;;  %v9784_v56 = vpop.f32.mrb[11].mxu1  ;;  %10324 = vmatmul.mubr.msk.f32.gmra.mrb[116].mxu1 %vm867_vm0, %v7116_v58  ;;  %10285 = vmatprep.mubr.msk.f32.mxu0 %vm11279_vm1, %v11277_v0 }
 0x649   : > { %10326 = vmatprep.mubr.msk.f32.mxu1 %vm11279_vm1, %v11277_v0 }
 0x64a   : > { %v5735_v50 = vpop.f32.mrb[12].mxu0 }
 0x64b   : > { %v9716_v14 = vpop.f32.mrb[13].mxu0  ;;  %v5865_v19 = vpop.f32.mrb[12].mxu1  ;;  %10286 = vmatmul.mubr.f32.gmra.mrb[118].mxu0 %v6944_v36 }
 0x64c   : > { %v13882_v31 = vadd.f32 %v5865_v19, %v5735_v50  ;;  %v9787_v41 = vpop.f32.mrb[13].mxu1  ;;  %10327 = vmatmul.mubr.msk.f32.gmra.mrb[118].mxu1 %vm867_vm0, %v7117_v7  ;;  %10288 = vmatprep.mubr.msk.f32.mxu0 %vm11279_vm1, %v11277_v0 }
 0x64d   : > { %10329 = vmatprep.mubr.msk.f32.mxu1 %vm11279_vm1, %v11277_v0 }
 0x64e   : > { %v5740_v11 = vpop.f32.mrb[14].mxu0 }
 0x64f   : > { %v9719_v62 = vpop.f32.mrb[15].mxu0  ;;  %v5870_v63 = vpop.f32.mrb[14].mxu1  ;;  %10289 = vmatmul.mubr.f32.gmra.mrb[120].mxu0 %v6945_v55 }
 0x650   : > { %v13889_v43 = vadd.f32 %v5870_v63, %v5740_v11  ;;  %v9790_v35 = vpop.f32.mrb[15].mxu1  ;;  %10330 = vmatmul.mubr.msk.f32.gmra.mrb[120].mxu1 %vm867_vm0, %v7118_v10  ;;  %10291 = vmatprep.mubr.msk.f32.mxu0 %vm11279_vm1, %v11277_v0 }
 0x651   : > { %10332 = vmatprep.mubr.msk.f32.mxu1 %vm11279_vm1, %v11277_v0 }
 0x652   : > { %v5745_v6 = vpop.f32.mrb[16].mxu0 }
 0x653   : > { %v9722_v27 = vpop.f32.mrb[17].mxu0  ;;  %v5875_v61 = vpop.f32.mrb[16].mxu1  ;;  %10292 = vmatmul.mubr.f32.gmra.mrb[122].mxu0 %v6946_v37 }
 0x654   : > { %v13896_v5 = vadd.f32 %v5875_v61, %v5745_v6  ;;  %v9793_v40 = vpop.f32.mrb[17].mxu1  ;;  %10333 = vmatmul.mubr.msk.f32.gmra.mrb[122].mxu1 %vm867_vm0, %v7119_v15  ;;  %10294 = vmatprep.mubr.msk.f32.mxu0 %vm11279_vm1, %v11277_v0 }
 0x655   : > { %10335 = vmatprep.mubr.msk.f32.mxu1 %vm11279_vm1, %v11277_v0 }
 0x656   : > { %v5750_v44 = vpop.f32.mrb[18].mxu0 }
 0x657   : > { %v9725_v13 = vpop.f32.mrb[19].mxu0  ;;  %v5880_v17 = vpop.f32.mrb[18].mxu1  ;;  %10295 = vmatmul.mubr.f32.gmra.mrb[124].mxu0 %v6947_v9 }
 0x658   : > { %v13903_v60 = vadd.f32 %v5880_v17, %v5750_v44  ;;  %v9796_v24 = vpop.f32.mrb[19].mxu1  ;;  %10336 = vmatmul.mubr.msk.f32.gmra.mrb[124].mxu1 %vm867_vm0, %v7120_v46  ;;  %10297 = vmatprep.mubr.msk.f32.mxu0 %vm11279_vm1, %v11277_v0 }
 0x659   : > { %10338 = vmatprep.mubr.msk.f32.mxu1 %vm11279_vm1, %v11277_v0 }
 0x65a   : > { %v5755_v26 = vpop.f32.mrb[20].mxu0 }
 0x65b   : > { %v9728_v29 = vpop.f32.mrb[21].mxu0  ;;  %v5885_v49 = vpop.f32.mrb[20].mxu1  ;;  %10298 = vmatmul.mubr.f32.gmra.mrb[126].mxu0 %v6948_v3 }
 0x65c   : > { %v13910_v20 = vadd.f32 %v5885_v49, %v5755_v26  ;;  %v9799_v16 = vpop.f32.mrb[21].mxu1  ;;  %10339 = vmatmul.mubr.msk.f32.gmra.mrb[126].mxu1 %vm867_vm0, %v7121_v52  ;;  %10300 = vmatprep.mubr.msk.f32.mxu0 %vm11279_vm1, %v11277_v0 }
 0x65d   : > { %10341 = vmatprep.mubr.msk.f32.mxu1 %vm11279_vm1, %v11277_v0 }
 0x65e   : > { %v5760_v42 = vpop.f32.mrb[22].mxu0 }
 0x65f   : > { %v9731_v57 = vpop.f32.mrb[23].mxu0  ;;  %v5890_v47 = vpop.f32.mrb[22].mxu1  ;;  %10301 = vmatmul.mubr.f32.gmra.mrb[128].mxu0 %v6949_v4 }
 0x660   : > { %v13917_v51 = vadd.f32 %v5890_v47, %v5760_v42  ;;  %v9802_v53 = vpop.f32.mrb[23].mxu1  ;;  %10342 = vmatmul.mubr.msk.f32.gmra.mrb[128].mxu1 %vm867_vm0, %v7122_v39 }
 0x662   : > { %v5765_v8 = vpop.f32.mrb[24].mxu0 }
 0x663   : > { %v9734_v1 = vpop.f32.mrb[25].mxu0  ;;  %v5895_v18 = vpop.f32.mrb[24].mxu1 }
 0x664   : > { %v13920_v30 = vadd.f32 %v5895_v18, %v5765_v8  ;;  %v9805_v21 = vpop.f32.mrb[25].mxu1 }
 0x666   : > { %v5995_v59 = vpop.f32.mrb[26].mxu0 }
 0x667   : > { %v6059_v12 = vadd.f32 %v5995_v59, %v13840_v45  ;;  %v9840_v0 = vpop.f32.mrb[27].mxu0  ;;  %v6168_v25 = vpop.f32.mrb[26].mxu1 }
 0x668   : > { %v9911_v28 = vpop.f32.mrb[27].mxu1 }
 0x669   : > { %v13923_v34 = vadd.f32 %v6168_v25, %v6059_v12 }
 0x66a   : > { %v6000_v58 = vpop.f32.mrb[28].mxu0 }
 0x66b   : > { %v6060_v32 = vadd.f32 %v6000_v58, %v13847_v33  ;;  %v9843_v38 = vpop.f32.mrb[29].mxu0  ;;  %v6173_v22 = vpop.f32.mrb[28].mxu1 }
 0x66c   : > { %v9914_v56 = vpop.f32.mrb[29].mxu1 }
 0x66d   : > { %v13926_v36 = vadd.f32 %v6173_v22, %v6060_v32 }
 0x66e   : > { %v6005_v7 = vpop.f32.mrb[30].mxu0 }
 0x66f   : > { %v6061_v50 = vadd.f32 %v6005_v7, %v13854_v2  ;;  %v9846_v14 = vpop.f32.mrb[31].mxu0  ;;  %v6178_v19 = vpop.f32.mrb[30].mxu1 }
 0x670   : > { %v9917_v41 = vpop.f32.mrb[31].mxu1 }
 0x671   : > { %v13929_v45 = vadd.f32 %v6178_v19, %v6061_v50 }
 0x672   : > { %v6010_v55 = vpop.f32.mrb[32].mxu0 }
 0x673   : > { %v6062_v10 = vadd.f32 %v6010_v55, %v13861_v54  ;;  %v9849_v11 = vpop.f32.mrb[33].mxu0  ;;  %v6183_v62 = vpop.f32.mrb[32].mxu1 }
 0x674   : > { %v9920_v63 = vpop.f32.mrb[33].mxu1 }
 0x675   : > { %v13932_v33 = vadd.f32 %v6183_v62, %v6062_v10 }
 0x676   : > { %v6015_v35 = vpop.f32.mrb[34].mxu0 }
 0x677   : > { %v6063_v37 = vadd.f32 %v6015_v35, %v13868_v23  ;;  %v9852_v15 = vpop.f32.mrb[35].mxu0  ;;  %v6188_v6 = vpop.f32.mrb[34].mxu1 }
 0x678   : > { %v9923_v27 = vpop.f32.mrb[35].mxu1 }
 0x679   : > { %v13935_v2 = vadd.f32 %v6188_v6, %v6063_v37 }
 0x67a   : > { %v6020_v61 = vpop.f32.mrb[36].mxu0 }
 0x67b   : > { %v6064_v40 = vadd.f32 %v6020_v61, %v13875_v48  ;;  %v9855_v9 = vpop.f32.mrb[37].mxu0  ;;  %v6193_v46 = vpop.f32.mrb[36].mxu1 }
 0x67c   : > { %v9926_v44 = vpop.f32.mrb[37].mxu1 }
 0x67d   : > { %v13938_v54 = vadd.f32 %v6193_v46, %v6064_v40 }
 0x67e   : > { %v6025_v13 = vpop.f32.mrb[38].mxu0 }
 0x67f   : > { %v6065_v17 = vadd.f32 %v6025_v13, %v13882_v31  ;;  %v9858_v24 = vpop.f32.mrb[39].mxu0  ;;  %v6198_v3 = vpop.f32.mrb[38].mxu1 }
 0x680   : > { %v9929_v52 = vpop.f32.mrb[39].mxu1 }
 0x681   : > { %v13941_v23 = vadd.f32 %v6198_v3, %v6065_v17 }
 0x682   : > { %v6030_v26 = vpop.f32.mrb[40].mxu0 }
 0x683   : > { %v6066_v29 = vadd.f32 %v6030_v26, %v13889_v43  ;;  %v9861_v49 = vpop.f32.mrb[41].mxu0  ;;  %v6203_v16 = vpop.f32.mrb[40].mxu1 }
 0x684   : > { %v9932_v4 = vpop.f32.mrb[41].mxu1 }
 0x685   : > { %v13944_v48 = vadd.f32 %v6203_v16, %v6066_v29 }
 0x686   : > { %v6035_v39 = vpop.f32.mrb[42].mxu0 }
 0x687   : > { %v6067_v42 = vadd.f32 %v6035_v39, %v13896_v5  ;;  %v9864_v57 = vpop.f32.mrb[43].mxu0  ;;  %v6208_v47 = vpop.f32.mrb[42].mxu1 }
 0x688   : > { %v9935_v53 = vpop.f32.mrb[43].mxu1 }
 0x689   : > { %v13947_v31 = vadd.f32 %v6208_v47, %v6067_v42 }
 0x68a   : > { %v6040_v8 = vpop.f32.mrb[44].mxu0 }
 0x68b   : > { %v6068_v1 = vadd.f32 %v6040_v8, %v13903_v60  ;;  %v9867_v18 = vpop.f32.mrb[45].mxu0  ;;  %v6213_v21 = vpop.f32.mrb[44].mxu1 }
 0x68c   : > { %v9938_v59 = vpop.f32.mrb[45].mxu1 }
 0x68d   : > { %v13950_v43 = vadd.f32 %v6213_v21, %v6068_v1 }
 0x68e   : > { %v6045_v12 = vpop.f32.mrb[46].mxu0 }
 0x68f   : > { %v6069_v0 = vadd.f32 %v6045_v12, %v13910_v20  ;;  %v9870_v25 = vpop.f32.mrb[47].mxu0  ;;  %v6218_v28 = vpop.f32.mrb[46].mxu1 }
 0x690   : > { %v9941_v58 = vpop.f32.mrb[47].mxu1 }
 0x691   : > { %v13953_v5 = vadd.f32 %v6218_v28, %v6069_v0 }
 0x692   : > { %v6050_v32 = vpop.f32.mrb[48].mxu0 }
 0x693   : > { %v6070_v38 = vadd.f32 %v6050_v32, %v13917_v51  ;;  %v9873_v22 = vpop.f32.mrb[49].mxu0  ;;  %v6223_v56 = vpop.f32.mrb[48].mxu1 }
 0x694   : > { %v9944_v7 = vpop.f32.mrb[49].mxu1 }
 0x695   : > { %v13956_v60 = vadd.f32 %v6223_v56, %v6070_v38 }
 0x696   : > { %v6055_v50 = vpop.f32.mrb[50].mxu0 }
 0x697   : > { %v6071_v14 = vadd.f32 %v6055_v50, %v13920_v30  ;;  %v9876_v19 = vpop.f32.mrb[51].mxu0  ;;  %v6228_v41 = vpop.f32.mrb[50].mxu1 }
 0x698   : > { %v9947_v55 = vpop.f32.mrb[51].mxu1 }
 0x699   : > { %v13959_v20 = vadd.f32 %v6228_v41, %v6071_v14 }
 0x69a   : > { %v6341_v10 = vpop.f32.mrb[52].mxu0 }
 0x69b   : > { %v6405_v11 = vadd.f32 %v6341_v10, %v13923_v34  ;;  %v9982_v62 = vpop.f32.mrb[53].mxu0  ;;  %v6514_v63 = vpop.f32.mrb[52].mxu1 }
 0x69c   : > { %v10053_v35 = vpop.f32.mrb[53].mxu1 }
 0x69d   : > { %v13962_v51 = vadd.f32 %v6514_v63, %v6405_v11 }
 0x69e   : > { %v6346_v37 = vpop.f32.mrb[54].mxu0 }
 0x69f   : > { %v6406_v15 = vadd.f32 %v6346_v37, %v13926_v36  ;;  %v9985_v6 = vpop.f32.mrb[55].mxu0  ;;  %v6519_v27 = vpop.f32.mrb[54].mxu1 }
 0x6a0   : > { %v10056_v61 = vpop.f32.mrb[55].mxu1 }
 0x6a1   : > { %v13965_v30 = vadd.f32 %v6519_v27, %v6406_v15 }
 0x6a2   : > { %v6351_v40 = vpop.f32.mrb[56].mxu0 }
 0x6a3   : > { %v6407_v9 = vadd.f32 %v6351_v40, %v13929_v45  ;;  %v9988_v46 = vpop.f32.mrb[57].mxu0  ;;  %v6524_v44 = vpop.f32.mrb[56].mxu1 }
 0x6a4   : > { %v10059_v13 = vpop.f32.mrb[57].mxu1 }
 0x6a5   : > { %v13968_v34 = vadd.f32 %v6524_v44, %v6407_v9 }
 0x6a6   : > { %v6356_v17 = vpop.f32.mrb[58].mxu0 }
 0x6a7   : > { %v6408_v24 = vadd.f32 %v6356_v17, %v13932_v33  ;;  %v9991_v3 = vpop.f32.mrb[59].mxu0  ;;  %v6529_v52 = vpop.f32.mrb[58].mxu1 }
 0x6a8   : > { %v10062_v26 = vpop.f32.mrb[59].mxu1 }
 0x6a9   : > { %v13971_v36 = vadd.f32 %v6529_v52, %v6408_v24 }
 0x6aa   : > { %v6361_v29 = vpop.f32.mrb[60].mxu0 }
 0x6ab   : > { %v6409_v49 = vadd.f32 %v6361_v29, %v13935_v2  ;;  %v9994_v16 = vpop.f32.mrb[61].mxu0  ;;  %v6534_v4 = vpop.f32.mrb[60].mxu1 }
 0x6ac   : > { %v10065_v39 = vpop.f32.mrb[61].mxu1 }
 0x6ad   : > { %v13974_v45 = vadd.f32 %v6534_v4, %v6409_v49 }
 0x6ae   : > { %v6366_v42 = vpop.f32.mrb[62].mxu0 }
 0x6af   : > { %v6410_v57 = vadd.f32 %v6366_v42, %v13938_v54  ;;  %v9997_v47 = vpop.f32.mrb[63].mxu0  ;;  %v6539_v53 = vpop.f32.mrb[62].mxu1 }
 0x6b0   : > { %v10068_v8 = vpop.f32.mrb[63].mxu1 }
 0x6b1   : > { %v13977_v33 = vadd.f32 %v6539_v53, %v6410_v57 }
 0x6b2   : > { %v6371_v1 = vpop.f32.mrb[64].mxu0 }
 0x6b3   : > { %v6411_v18 = vadd.f32 %v6371_v1, %v13941_v23  ;;  %v10000_v21 = vpop.f32.mrb[65].mxu0  ;;  %v6544_v59 = vpop.f32.mrb[64].mxu1 }
 0x6b4   : > { %v10071_v12 = vpop.f32.mrb[65].mxu1 }
 0x6b5   : > { %v13980_v2 = vadd.f32 %v6544_v59, %v6411_v18 }
 0x6b6   : > { %v6376_v0 = vpop.f32.mrb[66].mxu0 }
 0x6b7   : > { %v6412_v25 = vadd.f32 %v6376_v0, %v13944_v48  ;;  %v10003_v28 = vpop.f32.mrb[67].mxu0  ;;  %v6549_v58 = vpop.f32.mrb[66].mxu1 }
 0x6b8   : > { %v10074_v32 = vpop.f32.mrb[67].mxu1 }
 0x6b9   : > { %v13983_v54 = vadd.f32 %v6549_v58, %v6412_v25 }
 0x6ba   : > { %v6381_v38 = vpop.f32.mrb[68].mxu0 }
 0x6bb   : > { %v6413_v22 = vadd.f32 %v6381_v38, %v13947_v31  ;;  %v10006_v56 = vpop.f32.mrb[69].mxu0  ;;  %v6554_v7 = vpop.f32.mrb[68].mxu1 }
 0x6bc   : > { %v10077_v50 = vpop.f32.mrb[69].mxu1 }
 0x6bd   : > { %v13986_v23 = vadd.f32 %v6554_v7, %v6413_v22 }
 0x6be   : > { %v6386_v14 = vpop.f32.mrb[70].mxu0 }
 0x6bf   : > { %v6414_v19 = vadd.f32 %v6386_v14, %v13950_v43  ;;  %v10009_v41 = vpop.f32.mrb[71].mxu0  ;;  %v6559_v55 = vpop.f32.mrb[70].mxu1 }
 0x6c0   : > { %v10080_v10 = vpop.f32.mrb[71].mxu1 }
 0x6c1   : > { %v13989_v48 = vadd.f32 %v6559_v55, %v6414_v19 }
 0x6c2   : > { %v6391_v11 = vpop.f32.mrb[72].mxu0 }
 0x6c3   : > { %v6415_v62 = vadd.f32 %v6391_v11, %v13953_v5  ;;  %v10012_v63 = vpop.f32.mrb[73].mxu0  ;;  %v6564_v35 = vpop.f32.mrb[72].mxu1 }
 0x6c4   : > { %v10083_v37 = vpop.f32.mrb[73].mxu1 }
 0x6c5   : > { %v13992_v31 = vadd.f32 %v6564_v35, %v6415_v62 }
 0x6c6   : > { %v6396_v15 = vpop.f32.mrb[74].mxu0 }
 0x6c7   : > { %v6416_v6 = vadd.f32 %v6396_v15, %v13956_v60  ;;  %v10015_v27 = vpop.f32.mrb[75].mxu0  ;;  %v6569_v61 = vpop.f32.mrb[74].mxu1 }
 0x6c8   : > { %v10086_v40 = vpop.f32.mrb[75].mxu1 }
 0x6c9   : > { %v13995_v43 = vadd.f32 %v6569_v61, %v6416_v6 }
 0x6ca   : > { %v6401_v9 = vpop.f32.mrb[76].mxu0 }
 0x6cb   : > { %v6417_v46 = vadd.f32 %v6401_v9, %v13959_v20  ;;  %v10018_v44 = vpop.f32.mrb[77].mxu0  ;;  %v6574_v13 = vpop.f32.mrb[76].mxu1 }
 0x6cc   : > { %v10089_v17 = vpop.f32.mrb[77].mxu1 }
 0x6cd   : > { %v13998_v5 = vadd.f32 %v6574_v13, %v6417_v46 }
 0x6ce   : > { %v6687_v24 = vpop.f32.mrb[78].mxu0 }
 0x6cf   : > { %v6751_v3 = vadd.f32 %v6687_v24, %v13962_v51  ;;  %v10124_v52 = vpop.f32.mrb[79].mxu0  ;;  %v6860_v26 = vpop.f32.mrb[78].mxu1 }
 0x6d0   : > { %v10195_v29 = vpop.f32.mrb[79].mxu1 }
 0x6d1   : > { %v14001_v60 = vadd.f32 %v6860_v26, %v6751_v3 }
 0x6d2   : > { %v6692_v49 = vpop.f32.mrb[80].mxu0 }
 0x6d3   : > { %v6752_v16 = vadd.f32 %v6692_v49, %v13965_v30  ;;  %v10127_v4 = vpop.f32.mrb[81].mxu0  ;;  %v6865_v39 = vpop.f32.mrb[80].mxu1 }
 0x6d4   : > { %v10198_v42 = vpop.f32.mrb[81].mxu1 }
 0x6d5   : > { %v14004_v20 = vadd.f32 %v6865_v39, %v6752_v16 }
 0x6d6   : > { %v6697_v57 = vpop.f32.mrb[82].mxu0 }
 0x6d7   : > { %v6753_v47 = vadd.f32 %v6697_v57, %v13968_v34  ;;  %v10130_v53 = vpop.f32.mrb[83].mxu0  ;;  %v6870_v8 = vpop.f32.mrb[82].mxu1 }
 0x6d8   : > { %v10201_v1 = vpop.f32.mrb[83].mxu1 }
 0x6d9   : > { %v14007_v51 = vadd.f32 %v6870_v8, %v6753_v47 }
 0x6da   : > { %v6702_v18 = vpop.f32.mrb[84].mxu0 }
 0x6db   : > { %v6754_v21 = vadd.f32 %v6702_v18, %v13971_v36  ;;  %v10133_v59 = vpop.f32.mrb[85].mxu0  ;;  %v6875_v12 = vpop.f32.mrb[84].mxu1 }
 0x6dc   : > { %v10204_v0 = vpop.f32.mrb[85].mxu1 }
 0x6dd   : > { %v14010_v30 = vadd.f32 %v6875_v12, %v6754_v21 }
 0x6de   : > { %v6707_v25 = vpop.f32.mrb[86].mxu0 }
 0x6df   : > { %v6755_v28 = vadd.f32 %v6707_v25, %v13974_v45  ;;  %v10136_v58 = vpop.f32.mrb[87].mxu0  ;;  %v6880_v32 = vpop.f32.mrb[86].mxu1 }
 0x6e0   : > { %v10207_v38 = vpop.f32.mrb[87].mxu1 }
 0x6e1   : > { %v14013_v34 = vadd.f32 %v6880_v32, %v6755_v28 }
 0x6e2   : > { %v6712_v22 = vpop.f32.mrb[88].mxu0 }
 0x6e3   : > { %v6756_v56 = vadd.f32 %v6712_v22, %v13977_v33  ;;  %v10139_v7 = vpop.f32.mrb[89].mxu0  ;;  %v6885_v50 = vpop.f32.mrb[88].mxu1 }
 0x6e4   : > { %v10210_v14 = vpop.f32.mrb[89].mxu1 }
 0x6e5   : > { %v14016_v36 = vadd.f32 %v6885_v50, %v6756_v56 }
 0x6e6   : > { %v6717_v19 = vpop.f32.mrb[90].mxu0 }
 0x6e7   : > { %v6757_v41 = vadd.f32 %v6717_v19, %v13980_v2  ;;  %v10142_v55 = vpop.f32.mrb[91].mxu0  ;;  %v6890_v10 = vpop.f32.mrb[90].mxu1 }
 0x6e8   : > { %v10213_v11 = vpop.f32.mrb[91].mxu1 }
 0x6e9   : > { %v14019_v45 = vadd.f32 %v6890_v10, %v6757_v41 }
 0x6ea   : > { %v6722_v62 = vpop.f32.mrb[92].mxu0 }
 0x6eb   : > { %v6758_v63 = vadd.f32 %v6722_v62, %v13983_v54  ;;  %v10145_v35 = vpop.f32.mrb[93].mxu0  ;;  %v6895_v37 = vpop.f32.mrb[92].mxu1 }
 0x6ec   : > { %v10216_v15 = vpop.f32.mrb[93].mxu1 }
 0x6ed   : > { %v14022_v33 = vadd.f32 %v6895_v37, %v6758_v63 }
 0x6ee   : > { %v6727_v6 = vpop.f32.mrb[94].mxu0 }
 0x6ef   : > { %v6759_v27 = vadd.f32 %v6727_v6, %v13986_v23  ;;  %v10148_v61 = vpop.f32.mrb[95].mxu0  ;;  %v6900_v40 = vpop.f32.mrb[94].mxu1 }
 0x6f0   : > { %v10219_v9 = vpop.f32.mrb[95].mxu1 }
 0x6f1   : > { %v14025_v2 = vadd.f32 %v6900_v40, %v6759_v27 }
 0x6f2   : > { %v6732_v46 = vpop.f32.mrb[96].mxu0 }
 0x6f3   : > { %v6760_v44 = vadd.f32 %v6732_v46, %v13989_v48  ;;  %v10151_v13 = vpop.f32.mrb[97].mxu0  ;;  %v6905_v17 = vpop.f32.mrb[96].mxu1 }
 0x6f4   : > { %v10222_v24 = vpop.f32.mrb[97].mxu1 }
 0x6f5   : > { %v14028_v54 = vadd.f32 %v6905_v17, %v6760_v44 }
 0x6f6   : > { %v6737_v3 = vpop.f32.mrb[98].mxu0 }
 0x6f7   : > { %v6761_v52 = vadd.f32 %v6737_v3, %v13992_v31  ;;  %v10154_v26 = vpop.f32.mrb[99].mxu0  ;;  %v6910_v29 = vpop.f32.mrb[98].mxu1 }
 0x6f8   : > { %v10225_v49 = vpop.f32.mrb[99].mxu1 }
 0x6f9   : > { %v14031_v23 = vadd.f32 %v6910_v29, %v6761_v52 }
 0x6fa   : > { %v6742_v16 = vpop.f32.mrb[100].mxu0 }
 0x6fb   : > { %v6762_v4 = vadd.f32 %v6742_v16, %v13995_v43  ;;  %v10157_v39 = vpop.f32.mrb[101].mxu0  ;;  %v6915_v42 = vpop.f32.mrb[100].mxu1  ;;  %v14043_v43 = vld [vmem:[%s14095_s9] ss:$0 sm:$0xff] }
 0x6fc   : > { %v10228_v57 = vpop.f32.mrb[101].mxu1 }
 0x6fd   : > { %v14034_v48 = vadd.f32 %v6915_v42, %v6762_v4 }
 0x6fe   : > { %v6747_v47 = vpop.f32.mrb[102].mxu0 }
 0x6ff   : > { %v6763_v53 = vadd.f32 %v6747_v47, %v13998_v5  ;;  %v10160_v8 = vpop.f32.mrb[103].mxu0  ;;  %v6920_v1 = vpop.f32.mrb[102].mxu1 }
 0x700   : > { %v10231_v31 = vpop.f32.mrb[103].mxu1 }
 0x701   : > { %v14037_v18 = vadd.f32 %v6920_v1, %v6763_v53 }
 0x702   : > { %v7033_v21 = vpop.f32.mrb[104].mxu0 }
 0x703   : > { %v7097_v59 = vadd.f32 %v7033_v21, %v14001_v60  ;;  %v10266_v12 = vpop.f32.mrb[105].mxu0  ;;  %v7232_v0 = vpop.f32.mrb[104].mxu1 }
 0x704   : > { %v10307_v25 = vpop.f32.mrb[105].mxu1 }
 0x705   : > { %v7296_v28 = vadd.f32 %v7232_v0, %v7097_v59 }
 0x706   : > { %v7038_v5 = vpop.f32.mrb[106].mxu0 }
 0x707   : > { %v7316_v58 = vadd.f32 %v14043_v43, %v7296_v28  ;;  %v7098_v32 = vadd.f32 %v7038_v5, %v14004_v20  ;;  %v10269_v38 = vpop.f32.mrb[107].mxu0  ;;  %v7237_v22 = vpop.f32.mrb[106].mxu1 }
 0x708   : > { %v10310_v56 = vpop.f32.mrb[107].mxu1 }
 0x709   : > { %7329 = vst [vmem:[%s11564_s22] sm:$0xff] %v7316_v58  ;;  %v7297_v60 = vadd.f32 %v7237_v22, %v7098_v32 }
 0x70a   : > { %v7043_v7 = vpop.f32.mrb[108].mxu0 }
 0x70b   : > { %v7317_v50 = vadd.f32 %v14043_v43, %v7297_v60  ;;  %v7099_v14 = vadd.f32 %v7043_v7, %v14007_v51  ;;  %v10272_v19 = vpop.f32.mrb[109].mxu0  ;;  %v7242_v41 = vpop.f32.mrb[108].mxu1 }
 0x70c   : > { %v10313_v55 = vpop.f32.mrb[109].mxu1 }
 0x70d   : > { %7330 = vst [vmem:[%s11564_s22 + $0x8] sm:$0xff] %v7317_v50  ;;  %v7298_v10 = vadd.f32 %v7242_v41, %v7099_v14 }
 0x70e   : > { %v7048_v11 = vpop.f32.mrb[110].mxu0 }
 0x70f   : > { %v7318_v20 = vadd.f32 %v14043_v43, %v7298_v10  ;;  %v7100_v62 = vadd.f32 %v7048_v11, %v14010_v30  ;;  %v10275_v63 = vpop.f32.mrb[111].mxu0  ;;  %v7247_v35 = vpop.f32.mrb[110].mxu1 }
 0x710   : > { %v10316_v37 = vpop.f32.mrb[111].mxu1 }
 0x711   : > { %7331 = vst [vmem:[%s11564_s22 + $0x10] sm:$0xff] %v7318_v20  ;;  %v7299_v15 = vadd.f32 %v7247_v35, %v7100_v62 }
 0x712   : > { %v7053_v6 = vpop.f32.mrb[112].mxu0 }
 0x713   : > { %v7319_v51 = vadd.f32 %v14043_v43, %v7299_v15  ;;  %v7101_v27 = vadd.f32 %v7053_v6, %v14013_v34  ;;  %v10278_v61 = vpop.f32.mrb[113].mxu0  ;;  %v7252_v40 = vpop.f32.mrb[112].mxu1 }
 0x714   : > { %v10319_v9 = vpop.f32.mrb[113].mxu1 }
 0x715   : > { %7332 = vst [vmem:[%s11564_s22 + $0x18] sm:$0xff] %v7319_v51  ;;  %v7300_v46 = vadd.f32 %v7252_v40, %v7101_v27 }
 0x716   : > { %v7058_v44 = vpop.f32.mrb[114].mxu0 }
 0x717   : > { %v7320_v30 = vadd.f32 %v14043_v43, %v7300_v46  ;;  %v7102_v13 = vadd.f32 %v7058_v44, %v14016_v36  ;;  %v10281_v17 = vpop.f32.mrb[115].mxu0  ;;  %v7257_v24 = vpop.f32.mrb[114].mxu1 }
 0x718   : > { %v10322_v3 = vpop.f32.mrb[115].mxu1 }
 0x719   : > { %7333 = vst [vmem:[%s11564_s22 + $0x20] sm:$0xff] %v7320_v30  ;;  %v7301_v52 = vadd.f32 %v7257_v24, %v7102_v13 }
 0x71a   : > { %v7063_v26 = vpop.f32.mrb[116].mxu0 }
 0x71b   : > { %v7321_v34 = vadd.f32 %v14043_v43, %v7301_v52  ;;  %v7103_v29 = vadd.f32 %v7063_v26, %v14019_v45  ;;  %v10284_v49 = vpop.f32.mrb[117].mxu0  ;;  %v7262_v16 = vpop.f32.mrb[116].mxu1 }
 0x71c   : > { %v10325_v4 = vpop.f32.mrb[117].mxu1 }
 0x71d   : > { %7334 = vst [vmem:[%s11564_s22 + $0x28] sm:$0xff] %v7321_v34  ;;  %v7302_v39 = vadd.f32 %v7262_v16, %v7103_v29 }
 0x71e   : > { %v7068_v42 = vpop.f32.mrb[118].mxu0 }
 0x71f   : > { %v7322_v36 = vadd.f32 %v14043_v43, %v7302_v39  ;;  %v7104_v57 = vadd.f32 %v7068_v42, %v14022_v33  ;;  %v10287_v47 = vpop.f32.mrb[119].mxu0  ;;  %v7267_v53 = vpop.f32.mrb[118].mxu1 }
 0x720   : > { %v10328_v8 = vpop.f32.mrb[119].mxu1 }
 0x721   : > { %7335 = vst [vmem:[%s11564_s22 + $0x30] sm:$0xff] %v7322_v36  ;;  %v7303_v1 = vadd.f32 %v7267_v53, %v7104_v57 }
 0x722   : > { %v7073_v31 = vpop.f32.mrb[120].mxu0 }
 0x723   : > { %v7323_v45 = vadd.f32 %v14043_v43, %v7303_v1  ;;  %v7105_v21 = vadd.f32 %v7073_v31, %v14025_v2  ;;  %v10290_v59 = vpop.f32.mrb[121].mxu0  ;;  %v7272_v12 = vpop.f32.mrb[120].mxu1 }
 0x724   : > { %v10331_v0 = vpop.f32.mrb[121].mxu1 }
 0x725   : > { %7336 = vst [vmem:[%s11564_s22 + $0x38] sm:$0xff] %v7323_v45  ;;  %v7304_v25 = vadd.f32 %v7272_v12, %v7105_v21 }
 0x726   : > { %v7078_v28 = vpop.f32.mrb[122].mxu0 }
 0x727   : > { %v7324_v33 = vadd.f32 %v14043_v43, %v7304_v25  ;;  %v7106_v5 = vadd.f32 %v7078_v28, %v14028_v54  ;;  %v10293_v58 = vpop.f32.mrb[123].mxu0  ;;  %v7277_v32 = vpop.f32.mrb[122].mxu1 }
 0x728   : > { %v10334_v38 = vpop.f32.mrb[123].mxu1 }
 0x729   : > { %7337 = vst [vmem:[%s11564_s22 + $0x40] sm:$0xff] %v7324_v33  ;;  %v7305_v22 = vadd.f32 %v7277_v32, %v7106_v5 }
 0x72a   : > { %v7083_v56 = vpop.f32.mrb[124].mxu0 }
 0x72b   : > { %v7325_v2 = vadd.f32 %v14043_v43, %v7305_v22  ;;  %v7107_v60 = vadd.f32 %v7083_v56, %v14031_v23  ;;  %v10296_v7 = vpop.f32.mrb[125].mxu0  ;;  %v7282_v50 = vpop.f32.mrb[124].mxu1 }
 0x72c   : > { %v10337_v14 = vpop.f32.mrb[125].mxu1 }
 0x72d   : > { %7338 = vst [vmem:[%s11564_s22 + $0x48] sm:$0xff] %v7325_v2  ;;  %v7306_v19 = vadd.f32 %v7282_v50, %v7107_v60 }
 0x72e   : > { %v7088_v41 = vpop.f32.mrb[126].mxu0 }
 0x72f   : > { %v7326_v54 = vadd.f32 %v14043_v43, %v7306_v19  ;;  %v7108_v55 = vadd.f32 %v7088_v41, %v14034_v48  ;;  %v10299_v10 = vpop.f32.mrb[127].mxu0  ;;  %v7287_v11 = vpop.f32.mrb[126].mxu1 }
 0x730   : > { %v10340_v20 = vpop.f32.mrb[127].mxu1 }
 0x731   : > { %7339 = vst [vmem:[%s11564_s22 + $0x50] sm:$0xff] %v7326_v54  ;;  %v7307_v62 = vadd.f32 %v7287_v11, %v7108_v55 }
 0x732   : > { %v7093_v63 = vpop.f32.mrb[128].mxu0 }
 0x733   : > { %v7327_v23 = vadd.f32 %v14043_v43, %v7307_v62  ;;  %v7109_v35 = vadd.f32 %v7093_v63, %v14037_v18  ;;  %v10302_v37 = vpop.f32.mrb[129].mxu0  ;;  %v7292_v15 = vpop.f32.mrb[128].mxu1 }
 0x734   : > { %v10343_v6 = vpop.f32.mrb[129].mxu1 }
 0x735   : > { %7340 = vst [vmem:[%s11564_s22 + $0x58] sm:$0xff] %v7327_v23  ;;  %v7308_v51 = vadd.f32 %v7292_v15, %v7109_v35 }
 0x737   : > { %v7328_v27 = vadd.f32 %v14043_v43, %v7308_v51 }
 0x739   : > { %7341 = vst [vmem:[%s11564_s22 + $0x60] sm:$0xf] %v7328_v27 }
 0x73a PF: > { %s22_s17 = sadd.s32 1, %s11268_s17  }
 0x73b   : > { %p19_p5 = scmp.ge.s32.totalorder %s22_s17, 4  }
 0x73d   :  { %21 = sbr.rel (!%p19_p5) target bundleno = 1 (0x1), region = 137 }
 0x744   :  { %7363 = vsyncpa [#allocation7], 1 }
 0x745   :  { %7365 = vsyncpa [#allocation7 + $0x1], 1 }

</bundles_post_ra>
